<compile_context>
chip_gen: v5e
topology: v5e:2x2
jax: 0.10.0
libtpu: 0.0.40
codegen_flags: <defaults>
</compile_context>

<pallas_src>
import math

import jax
import jax.numpy as jnp
import numpy as np
from jax.experimental import pallas as pl
from jax.experimental.pallas import tpu as pltpu

# ---- model / problem sizes (small, consistent with the module) ----------------
B = 2          # batch
L = 16         # input_length (sequence length)
F = 4          # feature_dim
H = 32         # hidden_size
NS = 4         # n_splits (heads)
NBLK = 2       # n_enc_blocks
DK = H // NS   # per-head dim (dk passed to AnomalyAttention)
G = NS * B     # flattened (head, batch) association batch (== torch.cat(split, dim=0))
EPS = 1e-5     # LayerNorm eps (PyTorch default)

N_BLK_PARAMS = 10  # w_qkvs, wo, g1, b1, wf1, bf1, wf2, bf2, g2, b2

_INV_SQRT_2PI = 1.0 / math.sqrt(2.0 * math.pi)
_SM_SCALE = 1.0 / math.sqrt(float(DK))


def _vmem_spec(shape):
    nd = len(shape)
    return pl.BlockSpec(shape, lambda i, _nd=nd: (0,) * _nd)


# ------------------------------------------------------------------------------
# helpers traced inside the kernel (all reshapes keep the minor dim fixed and a
# second-minor that is a multiple of the 8-sublane tile -> layout-compatible)
# ------------------------------------------------------------------------------
def _split_heads(m, width):
    """(B*L, NS*width) -> (NS*B, L, width), head-major (== torch.cat(split, dim=0))."""
    parts = [m[:, h * width:(h + 1) * width].reshape(1, B, L, width) for h in range(NS)]
    return jnp.concatenate(parts, axis=0).reshape(G, L, width)


def _merge_heads(m):
    """(NS*B, L, DK) -> (B*L, NS*DK) (== torch.cat(out.split(B, dim=0), dim=-1))."""
    m = m.reshape(NS, B * L, DK)
    return jnp.concatenate([m[h] for h in range(NS)], axis=-1)


def _layer_norm(z, g, b):
    mu = jnp.mean(z, axis=-1, keepdims=True)
    zc = z - mu
    var = jnp.mean(zc * zc, axis=-1, keepdims=True)
    return zc * jax.lax.rsqrt(var + EPS) * g + b


# ------------------------------------------------------------------------------
# fused forward kernel: embedding -> NBLK encoder blocks -> projection
# ------------------------------------------------------------------------------
def _fused_forward_kernel(*refs):
    (xc_ref, w_emb_ref, pos_ref, ndsq_ref, wp_ref, bp_ref) = refs[:6]
    blk_refs = refs[6:6 + NBLK * N_BLK_PARAMS]
    prior_ref, series_ref, y_ref = refs[6 + NBLK * N_BLK_PARAMS:]

    f32 = jnp.float32
    ndsq = ndsq_ref[...]                                                  # (L, L): -(|i-j|^2)/2

    # --- DataEmbedding: circular Conv1d(k=3) folded into one (B*L,3F)x(3F,H) GEMM + pos enc
    h = jnp.dot(xc_ref[...], w_emb_ref[...], preferred_element_type=f32) + pos_ref[...]

    # --- encoder blocks (unrolled; all weights stay resident in VMEM) --------
    for blk in range(NBLK):
        (wqkvs_ref, wo_ref, g1_ref, b1_ref, wf1_ref, bf1_ref,
         wf2_ref, bf2_ref, g2_ref, b2_ref) = blk_refs[
            blk * N_BLK_PARAMS:(blk + 1) * N_BLK_PARAMS]

        # one wide GEMM for Q | K | V | Sigma
        qkvs = jnp.dot(h, wqkvs_ref[...], preferred_element_type=f32)     # (B*L, 3H+NS)
        q = _split_heads(qkvs[:, 0 * H:1 * H], DK)                        # (G, L, DK)
        k = _split_heads(qkvs[:, 1 * H:2 * H], DK)
        v = _split_heads(qkvs[:, 2 * H:3 * H], DK)
        sigma = _split_heads(qkvs[:, 3 * H:3 * H + NS], 1)                # (G, L, 1)

        # series association: softmax(Q K^T / sqrt(dk)), batched over all heads*batch
        scores = jnp.einsum('gid,gjd->gij', q, k,
                            preferred_element_type=f32) * _SM_SCALE       # (G, L, L)
        scores = scores - jnp.max(scores, axis=-1, keepdims=True)
        e = jnp.exp(scores)
        series = e * pl.reciprocal(jnp.sum(e, axis=-1, keepdims=True), approx=True)

        # prior association: row-normalised Gaussian kernel of |i-j| with width Sigma
        inv_sigma = pl.reciprocal(sigma, approx=True)                     # (G, L, 1)
        kw = (_INV_SQRT_2PI * inv_sigma) * jnp.exp(ndsq * (inv_sigma * inv_sigma))
        prior = kw * pl.reciprocal(jnp.sum(kw, axis=-1, keepdims=True), approx=True)

        prior_ref[blk] = prior
        series_ref[blk] = series

        # attention output, head merge, output projection
        attn = jnp.einsum('gij,gjd->gid', series, v,
                          preferred_element_type=f32)                     # (G, L, DK)
        out = jnp.dot(_merge_heads(attn), wo_ref[...], preferred_element_type=f32)

        # residual + LayerNorm (attn_dropout is identity in eval mode)
        z = _layer_norm(out + h, g1_ref[...], b1_ref[...])

        # FFN: Linear(H, 4H) -> ReLU -> Linear(4H, H)   (biases per nn.Linear default)
        hid = jnp.maximum(
            jnp.dot(z, wf1_ref[...], preferred_element_type=f32) + bf1_ref[...], 0.0)
        f = jnp.dot(hid, wf2_ref[...], preferred_element_type=f32) + bf2_ref[...]

        # residual + LayerNorm (fc_dropout is identity in eval mode)
        h = _layer_norm(f + z, g2_ref[...], b2_ref[...])

    # --- final projection: Linear(H -> F, bias=True) ---------------------------
    y_ref[...] = jnp.dot(h, wp_ref[...], preferred_element_type=f32) + bp_ref[...]


# ------------------------------------------------------------------------------
# wrapper
# ------------------------------------------------------------------------------
def anomaly_transformer_forward(x, params):
    # circular padding realised as circular shifts of the raw (B, L, F) input;
    # packed so the 3 conv taps become one GEMM in-kernel (host-side layout glue).
    x_m1 = jnp.roll(x, 1, axis=1)    # x[t-1 mod L]
    x_p1 = jnp.roll(x, -1, axis=1)   # x[t+1 mod L]
    xc = jnp.concatenate([x_m1, x, x_p1], axis=-1).reshape(B * L, 3 * F)

    flat_blk = []
    for p in params["blocks"]:
        flat_blk += [p["w_qkvs"], p["wo"], p["g1"], p["b1"], p["wf1"],
                     p["bf1"], p["wf2"], p["bf2"], p["g2"], p["b2"]]

    inputs = [xc, params["w_emb"], params["pos_enc"], params["neg_half_dsq"],
              params["wp"], params["bp"]] + flat_blk

    prior, series, y = pl.pallas_call(
        _fused_forward_kernel,
        grid=(1,),
        in_specs=[_vmem_spec(a.shape) for a in inputs],
        out_specs=(
            _vmem_spec((NBLK, G, L, L)),
            _vmem_spec((NBLK, G, L, L)),
            _vmem_spec((B * L, F)),
        ),
        out_shape=(
            jax.ShapeDtypeStruct((NBLK, G, L, L), jnp.float32),
            jax.ShapeDtypeStruct((NBLK, G, L, L), jnp.float32),
            jax.ShapeDtypeStruct((B * L, F), jnp.float32),
        ),
        compiler_params=pltpu.CompilerParams(dimension_semantics=("arbitrary",)),
    )(*inputs)

    prior_list = [prior[i] for i in range(NBLK)]
    series_list = [series[i] for i in range(NBLK)]
    return prior_list, series_list, y.reshape(B, L, F)


# ------------------------------------------------------------------------------
# pure-JAX reference (mirrors the PyTorch module; exact divisions) for self-check
# ------------------------------------------------------------------------------
def reference_forward(x, params):
    x_m1 = jnp.roll(x, 1, axis=1)
    x_p1 = jnp.roll(x, -1, axis=1)
    xc = jnp.concatenate([x_m1, x, x_p1], axis=-1).reshape(B * L, 3 * F)
    h = xc @ params["w_emb"] + params["pos_enc"]
    ndsq = params["neg_half_dsq"]

    def split(m, w):
        parts = [m[:, i * w:(i + 1) * w].reshape(1, B, L, w) for i in range(NS)]
        return jnp.concatenate(parts, axis=0).reshape(G, L, w)

    priors, seriess = [], []
    for p in params["blocks"]:
        qkvs = h @ p["w_qkvs"]
        q = split(qkvs[:, 0 * H:1 * H], DK)
        k = split(qkvs[:, 1 * H:2 * H], DK)
        v = split(qkvs[:, 2 * H:3 * H], DK)
        sg = split(qkvs[:, 3 * H:3 * H + NS], 1)

        scores = jnp.einsum('gid,gjd->gij', q, k) * _SM_SCALE
        series = jax.nn.softmax(scores, axis=-1)
        kw = (_INV_SQRT_2PI / sg) * jnp.exp(ndsq / (sg * sg))
        prior = kw / jnp.sum(kw, axis=-1, keepdims=True)
        priors.append(prior)
        seriess.append(series)

        attn = jnp.einsum('gij,gjd->gid', series, v)
        merged = jnp.concatenate(
            [attn.reshape(NS, B * L, DK)[i] for i in range(NS)], axis=-1)
        out = merged @ p["wo"]
        z = _layer_norm(out + h, p["g1"], p["b1"])
        hid = jnp.maximum(z @ p["wf1"] + p["bf1"], 0.0)
        f = hid @ p["wf2"] + p["bf2"]
        h = _layer_norm(f + z, p["g2"], p["b2"])

    y = h @ params["wp"] + params["bp"]
    return priors, seriess, y.reshape(B, L, F)


# ------------------------------------------------------------------------------
# deterministic synthetic parameters (matching the module's init schemes)
# ------------------------------------------------------------------------------
def make_pos_enc():
    pos = jnp.arange(L, dtype=jnp.float32)[:, None]
    dim = jnp.arange(H // 2, dtype=jnp.float32)[None, :]
    angle = pos / jnp.power(10000.0, dim / float(H))
    enc = jnp.zeros((L, H), jnp.float32)
    enc = enc.at[:, 0::2].set(jnp.sin(angle))
    enc = enc.at[:, 1::2].set(jnp.cos(angle))
    return jnp.tile(enc, (B, 1))          # pre-tiled to (B*L, H)


def make_params(key):
    keys = jax.random.split(key, 64)
    ki = iter(keys)

    def uniform(k, shape, fan_in):
        bound = 1.0 / math.sqrt(fan_in)
        return jax.random.uniform(k, shape, jnp.float32, -bound, bound)

    # Conv1d weight (H, F, 3): kaiming_normal_(fan_in=F*3, leaky_relu)
    gain = math.sqrt(2.0 / (1.0 + 0.01 ** 2))
    std = gain / math.sqrt(F * 3)
    w_conv = jax.random.normal(next(ki), (H, F, 3), jnp.float32) * std
    # packed taps: row block k multiplies x[t-1+k mod L]; w_emb[k*F + f, h] = w_conv[h, f, k]
    w_emb = jnp.concatenate([jnp.transpose(w_conv[:, :, k]) for k in range(3)], axis=0)

    blocks = []
    for _ in range(NBLK):
        wq = uniform(next(ki), (H, H), H)
        wk = uniform(next(ki), (H, H), H)
        wv = uniform(next(ki), (H, H), H)
        wsig = uniform(next(ki), (H, NS), H)
        blocks.append({
            "w_qkvs": jnp.concatenate([wq, wk, wv, wsig], axis=1),  # (H, 3H+NS)
            "wo": uniform(next(ki), (H, H), H),
            "g1": jnp.ones((1, H), jnp.float32),
            "b1": jnp.zeros((1, H), jnp.float32),
            "wf1": uniform(next(ki), (H, 4 * H), H),
            "bf1": uniform(next(ki), (1, 4 * H), H),
            "wf2": uniform(next(ki), (4 * H, H), 4 * H),
            "bf2": uniform(next(ki), (1, H), 4 * H),
            "g2": jnp.ones((1, H), jnp.float32),
            "b2": jnp.zeros((1, H), jnp.float32),
        })

    wp = uniform(next(ki), (H, F), H)
    bp = uniform(next(ki), (1, F), H)

    idx = jnp.arange(L, dtype=jnp.float32)
    dist = jnp.abs(idx[:, None] - idx[None, :])     # |i - j|
    neg_half_dsq = -0.5 * dist * dist               # precomputed -(dist^2)/2

    return {
        "w_emb": w_emb,
        "pos_enc": make_pos_enc(),
        "blocks": blocks,
        "wp": wp,
        "bp": bp,
        "neg_half_dsq": neg_half_dsq,
    }


if __name__ == "__main__":
    key = jax.random.PRNGKey(0)
    k_x, k_p = jax.random.split(key)
    x = jax.random.normal(k_x, (B, L, F), jnp.float32)
    params = make_params(k_p)

    fwd = jax.jit(anomaly_transformer_forward)
    prior_list, series_list, y_hat = fwd(x, params)

    jax.block_until_ready(y_hat)
    for p_, s_ in zip(prior_list, series_list):
        jax.block_until_ready(p_)
        jax.block_until_ready(s_)

    assert y_hat.shape == (B, L, F)
    assert all(p_.shape == (G, L, L) for p_ in prior_list)
    assert all(s_.shape == (G, L, L) for s_ in series_list)

    # self-check against pure-JAX reference (generous tolerance: kernel uses
    # EUP approximate reciprocals for softmax / prior normalisation).
    p_ref, s_ref, y_ref = reference_forward(x, params)
    assert np.allclose(np.asarray(y_hat), np.asarray(y_ref), atol=5e-2, rtol=5e-2)
    for a, b in zip(prior_list, p_ref):
        assert np.allclose(np.asarray(a), np.asarray(b), atol=5e-2, rtol=5e-2)
    for a, b in zip(series_list, s_ref):
        assert np.allclose(np.asarray(a), np.asarray(b), atol=5e-2, rtol=5e-2)

    print("KERNEL_OK")
</pallas_src>

<mosaic_0001>
module attributes {stable_mosaic.version = 11 : i64} {
  func.func @_fused_forward_kernel(%arg0: i32, %arg1: memref<32x12xf32, #tpu.memory_space<vmem>>, %arg2: memref<12x32xf32, #tpu.memory_space<vmem>>, %arg3: memref<32x32xf32, #tpu.memory_space<vmem>>, %arg4: memref<16x16xf32, #tpu.memory_space<vmem>>, %arg5: memref<32x4xf32, #tpu.memory_space<vmem>>, %arg6: memref<1x4xf32, #tpu.memory_space<vmem>>, %arg7: memref<32x100xf32, #tpu.memory_space<vmem>>, %arg8: memref<32x32xf32, #tpu.memory_space<vmem>>, %arg9: memref<1x32xf32, #tpu.memory_space<vmem>>, %arg10: memref<1x32xf32, #tpu.memory_space<vmem>>, %arg11: memref<32x128xf32, #tpu.memory_space<vmem>>, %arg12: memref<1x128xf32, #tpu.memory_space<vmem>>, %arg13: memref<128x32xf32, #tpu.memory_space<vmem>>, %arg14: memref<1x32xf32, #tpu.memory_space<vmem>>, %arg15: memref<1x32xf32, #tpu.memory_space<vmem>>, %arg16: memref<1x32xf32, #tpu.memory_space<vmem>>, %arg17: memref<32x100xf32, #tpu.memory_space<vmem>>, %arg18: memref<32x32xf32, #tpu.memory_space<vmem>>, %arg19: memref<1x32xf32, #tpu.memory_space<vmem>>, %arg20: memref<1x32xf32, #tpu.memory_space<vmem>>, %arg21: memref<32x128xf32, #tpu.memory_space<vmem>>, %arg22: memref<1x128xf32, #tpu.memory_space<vmem>>, %arg23: memref<128x32xf32, #tpu.memory_space<vmem>>, %arg24: memref<1x32xf32, #tpu.memory_space<vmem>>, %arg25: memref<1x32xf32, #tpu.memory_space<vmem>>, %arg26: memref<1x32xf32, #tpu.memory_space<vmem>>, %arg27: memref<2x8x16x16xf32, #tpu.memory_space<vmem>>, %arg28: memref<2x8x16x16xf32, #tpu.memory_space<vmem>>, %arg29: memref<32x4xf32, #tpu.memory_space<vmem>>) attributes {dimension_semantics = [#tpu.dimension_semantics<arbitrary>], iteration_bounds = array<i64: 1>, scalar_prefetch = 0 : i64, scratch_operands = 0 : i64, tpu.core_type = #tpu.core_type<tc>, window_params = [{pipeline_mode = #tpu.pipeline_mode<synchronous>, transform_indices = @transform_0, window_bounds = array<i64: 32, 12>}, {pipeline_mode = #tpu.pipeline_mode<synchronous>, transform_indices = @transform_1, window_bounds = array<i64: 12, 32>}, {pipeline_mode = #tpu.pipeline_mode<synchronous>, transform_indices = @transform_2, window_bounds = array<i64: 32, 32>}, {pipeline_mode = #tpu.pipeline_mode<synchronous>, transform_indices = @transform_3, window_bounds = array<i64: 16, 16>}, {pipeline_mode = #tpu.pipeline_mode<synchronous>, transform_indices = @transform_4, window_bounds = array<i64: 32, 4>}, {pipeline_mode = #tpu.pipeline_mode<synchronous>, transform_indices = @transform_5, window_bounds = array<i64: 1, 4>}, {pipeline_mode = #tpu.pipeline_mode<synchronous>, transform_indices = @transform_6, window_bounds = array<i64: 32, 100>}, {pipeline_mode = #tpu.pipeline_mode<synchronous>, transform_indices = @transform_7, window_bounds = array<i64: 32, 32>}, {pipeline_mode = #tpu.pipeline_mode<synchronous>, transform_indices = @transform_8, window_bounds = array<i64: 1, 32>}, {pipeline_mode = #tpu.pipeline_mode<synchronous>, transform_indices = @transform_9, window_bounds = array<i64: 1, 32>}, {pipeline_mode = #tpu.pipeline_mode<synchronous>, transform_indices = @transform_10, window_bounds = array<i64: 32, 128>}, {pipeline_mode = #tpu.pipeline_mode<synchronous>, transform_indices = @transform_11, window_bounds = array<i64: 1, 128>}, {pipeline_mode = #tpu.pipeline_mode<synchronous>, transform_indices = @transform_12, window_bounds = array<i64: 128, 32>}, {pipeline_mode = #tpu.pipeline_mode<synchronous>, transform_indices = @transform_13, window_bounds = array<i64: 1, 32>}, {pipeline_mode = #tpu.pipeline_mode<synchronous>, transform_indices = @transform_14, window_bounds = array<i64: 1, 32>}, {pipeline_mode = #tpu.pipeline_mode<synchronous>, transform_indices = @transform_15, window_bounds = array<i64: 1, 32>}, {pipeline_mode = #tpu.pipeline_mode<synchronous>, transform_indices = @transform_16, window_bounds = array<i64: 32, 100>}, {pipeline_mode = #tpu.pipeline_mode<synchronous>, transform_indices = @transform_17, window_bounds = array<i64: 32, 32>}, {pipeline_mode = #tpu.pipeline_mode<synchronous>, transform_indices = @transform_18, window_bounds = array<i64: 1, 32>}, {pipeline_mode = #tpu.pipeline_mode<synchronous>, transform_indices = @transform_19, window_bounds = array<i64: 1, 32>}, {pipeline_mode = #tpu.pipeline_mode<synchronous>, transform_indices = @transform_20, window_bounds = array<i64: 32, 128>}, {pipeline_mode = #tpu.pipeline_mode<synchronous>, transform_indices = @transform_21, window_bounds = array<i64: 1, 128>}, {pipeline_mode = #tpu.pipeline_mode<synchronous>, transform_indices = @transform_22, window_bounds = array<i64: 128, 32>}, {pipeline_mode = #tpu.pipeline_mode<synchronous>, transform_indices = @transform_23, window_bounds = array<i64: 1, 32>}, {pipeline_mode = #tpu.pipeline_mode<synchronous>, transform_indices = @transform_24, window_bounds = array<i64: 1, 32>}, {pipeline_mode = #tpu.pipeline_mode<synchronous>, transform_indices = @transform_25, window_bounds = array<i64: 1, 32>}, {pipeline_mode = #tpu.pipeline_mode<synchronous>, transform_indices = @transform_26, window_bounds = array<i64: 2, 8, 16, 16>}, {pipeline_mode = #tpu.pipeline_mode<synchronous>, transform_indices = @transform_27, window_bounds = array<i64: 2, 8, 16, 16>}, {pipeline_mode = #tpu.pipeline_mode<synchronous>, transform_indices = @transform_28, window_bounds = array<i64: 32, 4>}]} {
    %c0 = arith.constant 0 : index
    %c0_0 = arith.constant 0 : index
    %0 = vector.load %arg4[%c0, %c0_0] : memref<16x16xf32, #tpu.memory_space<vmem>>, vector<16x16xf32>
    %c0_1 = arith.constant 0 : index
    %c0_2 = arith.constant 0 : index
    %1 = vector.load %arg1[%c0_1, %c0_2] : memref<32x12xf32, #tpu.memory_space<vmem>>, vector<32x12xf32>
    %c0_3 = arith.constant 0 : index
    %c0_4 = arith.constant 0 : index
    %2 = vector.load %arg2[%c0_3, %c0_4] : memref<12x32xf32, #tpu.memory_space<vmem>>, vector<12x32xf32>
    %cst = arith.constant dense<0.000000e+00> : vector<32x32xf32>
    %3 = tpu.matmul %1, %2, %cst {dimension_numbers = #tpu.dot_dimension_numbers<[1], [0], [0], [1], [0, 0, 1, 1], [], []>} : vector<32x12xf32>, vector<12x32xf32>, vector<32x32xf32> -> vector<32x32xf32>
    %c0_5 = arith.constant 0 : index
    %c0_6 = arith.constant 0 : index
    %4 = vector.load %arg3[%c0_5, %c0_6] : memref<32x32xf32, #tpu.memory_space<vmem>>, vector<32x32xf32>
    %5 = arith.addf %3, %4 : vector<32x32xf32>
    %c0_7 = arith.constant 0 : index
    %c0_8 = arith.constant 0 : index
    %6 = vector.load %arg7[%c0_7, %c0_8] : memref<32x100xf32, #tpu.memory_space<vmem>>, vector<32x100xf32>
    %cst_9 = arith.constant dense<0.000000e+00> : vector<32x100xf32>
    %7 = tpu.matmul %5, %6, %cst_9 {dimension_numbers = #tpu.dot_dimension_numbers<[1], [0], [0], [1], [0, 0, 1, 1], [], []>} : vector<32x32xf32>, vector<32x100xf32>, vector<32x100xf32> -> vector<32x100xf32>
    %8 = vector.extract_strided_slice %7 {offsets = [0, 0], sizes = [32, 32], strides = [1, 1]} : vector<32x100xf32> to vector<32x32xf32>
    %9 = vector.extract_strided_slice %8 {offsets = [0, 0], sizes = [32, 8], strides = [1, 1]} : vector<32x32xf32> to vector<32x8xf32>
    %10 = vector.shape_cast %9 : vector<32x8xf32> to vector<1x2x16x8xf32>
    %11 = vector.extract_strided_slice %8 {offsets = [0, 8], sizes = [32, 8], strides = [1, 1]} : vector<32x32xf32> to vector<32x8xf32>
    %12 = vector.shape_cast %11 : vector<32x8xf32> to vector<1x2x16x8xf32>
    %13 = vector.extract_strided_slice %8 {offsets = [0, 16], sizes = [32, 8], strides = [1, 1]} : vector<32x32xf32> to vector<32x8xf32>
    %14 = vector.shape_cast %13 : vector<32x8xf32> to vector<1x2x16x8xf32>
    %15 = vector.extract_strided_slice %8 {offsets = [0, 24], sizes = [32, 8], strides = [1, 1]} : vector<32x32xf32> to vector<32x8xf32>
    %16 = vector.shape_cast %15 : vector<32x8xf32> to vector<1x2x16x8xf32>
    %17 = tpu.concatenate %10, %12, %14, %16 in 0 : vector<1x2x16x8xf32>, vector<1x2x16x8xf32>, vector<1x2x16x8xf32>, vector<1x2x16x8xf32> -> vector<4x2x16x8xf32>
    %18 = vector.shape_cast %17 : vector<4x2x16x8xf32> to vector<8x16x8xf32>
    %19 = vector.extract_strided_slice %7 {offsets = [0, 32], sizes = [32, 32], strides = [1, 1]} : vector<32x100xf32> to vector<32x32xf32>
    %20 = vector.extract_strided_slice %19 {offsets = [0, 0], sizes = [32, 8], strides = [1, 1]} : vector<32x32xf32> to vector<32x8xf32>
    %21 = vector.shape_cast %20 : vector<32x8xf32> to vector<1x2x16x8xf32>
    %22 = vector.extract_strided_slice %19 {offsets = [0, 8], sizes = [32, 8], strides = [1, 1]} : vector<32x32xf32> to vector<32x8xf32>
    %23 = vector.shape_cast %22 : vector<32x8xf32> to vector<1x2x16x8xf32>
    %24 = vector.extract_strided_slice %19 {offsets = [0, 16], sizes = [32, 8], strides = [1, 1]} : vector<32x32xf32> to vector<32x8xf32>
    %25 = vector.shape_cast %24 : vector<32x8xf32> to vector<1x2x16x8xf32>
    %26 = vector.extract_strided_slice %19 {offsets = [0, 24], sizes = [32, 8], strides = [1, 1]} : vector<32x32xf32> to vector<32x8xf32>
    %27 = vector.shape_cast %26 : vector<32x8xf32> to vector<1x2x16x8xf32>
    %28 = tpu.concatenate %21, %23, %25, %27 in 0 : vector<1x2x16x8xf32>, vector<1x2x16x8xf32>, vector<1x2x16x8xf32>, vector<1x2x16x8xf32> -> vector<4x2x16x8xf32>
    %29 = vector.shape_cast %28 : vector<4x2x16x8xf32> to vector<8x16x8xf32>
    %30 = vector.extract_strided_slice %7 {offsets = [0, 64], sizes = [32, 32], strides = [1, 1]} : vector<32x100xf32> to vector<32x32xf32>
    %31 = vector.extract_strided_slice %30 {offsets = [0, 0], sizes = [32, 8], strides = [1, 1]} : vector<32x32xf32> to vector<32x8xf32>
    %32 = vector.shape_cast %31 : vector<32x8xf32> to vector<1x2x16x8xf32>
    %33 = vector.extract_strided_slice %30 {offsets = [0, 8], sizes = [32, 8], strides = [1, 1]} : vector<32x32xf32> to vector<32x8xf32>
    %34 = vector.shape_cast %33 : vector<32x8xf32> to vector<1x2x16x8xf32>
    %35 = vector.extract_strided_slice %30 {offsets = [0, 16], sizes = [32, 8], strides = [1, 1]} : vector<32x32xf32> to vector<32x8xf32>
    %36 = vector.shape_cast %35 : vector<32x8xf32> to vector<1x2x16x8xf32>
    %37 = vector.extract_strided_slice %30 {offsets = [0, 24], sizes = [32, 8], strides = [1, 1]} : vector<32x32xf32> to vector<32x8xf32>
    %38 = vector.shape_cast %37 : vector<32x8xf32> to vector<1x2x16x8xf32>
    %39 = tpu.concatenate %32, %34, %36, %38 in 0 : vector<1x2x16x8xf32>, vector<1x2x16x8xf32>, vector<1x2x16x8xf32>, vector<1x2x16x8xf32> -> vector<4x2x16x8xf32>
    %40 = vector.shape_cast %39 : vector<4x2x16x8xf32> to vector<8x16x8xf32>
    %41 = vector.extract_strided_slice %7 {offsets = [0, 96], sizes = [32, 4], strides = [1, 1]} : vector<32x100xf32> to vector<32x4xf32>
    %42 = vector.extract_strided_slice %41 {offsets = [0, 0], sizes = [32, 1], strides = [1, 1]} : vector<32x4xf32> to vector<32x1xf32>
    %43 = vector.shape_cast %42 : vector<32x1xf32> to vector<1x2x16x1xf32>
    %44 = vector.extract_strided_slice %41 {offsets = [0, 1], sizes = [32, 1], strides = [1, 1]} : vector<32x4xf32> to vector<32x1xf32>
    %45 = vector.shape_cast %44 : vector<32x1xf32> to vector<1x2x16x1xf32>
    %46 = vector.extract_strided_slice %41 {offsets = [0, 2], sizes = [32, 1], strides = [1, 1]} : vector<32x4xf32> to vector<32x1xf32>
    %47 = vector.shape_cast %46 : vector<32x1xf32> to vector<1x2x16x1xf32>
    %48 = vector.extract_strided_slice %41 {offsets = [0, 3], sizes = [32, 1], strides = [1, 1]} : vector<32x4xf32> to vector<32x1xf32>
    %49 = vector.shape_cast %48 : vector<32x1xf32> to vector<1x2x16x1xf32>
    %50 = tpu.concatenate %43, %45, %47, %49 in 0 : vector<1x2x16x1xf32>, vector<1x2x16x1xf32>, vector<1x2x16x1xf32>, vector<1x2x16x1xf32> -> vector<4x2x16x1xf32>
    %51 = vector.shape_cast %50 : vector<4x2x16x1xf32> to vector<8x16x1xf32>
    "tpu.trace_start"() <{level = 10 : i32, message = "gid,gjd->gij"}> : () -> ()
    %cst_10 = arith.constant dense<0.000000e+00> : vector<8x16x16xf32>
    %52 = tpu.matmul %18, %29, %cst_10 {dimension_numbers = #tpu.dot_dimension_numbers<[2], [2], [1], [1], [0, 0, 0, 1, 1, 1], [0], [0]>} : vector<8x16x8xf32>, vector<8x16x8xf32>, vector<8x16x16xf32> -> vector<8x16x16xf32>
    "tpu.trace_stop"() : () -> ()
    %cst_11 = arith.constant 0.353553385 : f32
    %53 = vector.broadcast %cst_11 : f32 to vector<8x16x16xf32>
    %54 = arith.mulf %52, %53 : vector<8x16x16xf32>
    %cst_12 = arith.constant dense<0xFF800000> : vector<8x16xf32>
    %55 = vector.multi_reduction <maximumf>, %54, %cst_12 [2] : vector<8x16x16xf32> to vector<8x16xf32>
    %56 = vector.shape_cast %55 : vector<8x16xf32> to vector<8x16x1xf32>
    %57 = vector.broadcast %56 : vector<8x16x1xf32> to vector<8x16x16xf32>
    %58 = arith.subf %54, %57 : vector<8x16x16xf32>
    %59 = math.exp %58 : vector<8x16x16xf32>
    %cst_13 = arith.constant dense<0.000000e+00> : vector<8x16xf32>
    %60 = vector.multi_reduction <add>, %59, %cst_13 [2] : vector<8x16x16xf32> to vector<8x16xf32>
    %61 = vector.shape_cast %60 : vector<8x16xf32> to vector<8x16x1xf32>
    %62 = tpu.reciprocal %61 {approx = true} : vector<8x16x1xf32> -> vector<8x16x1xf32>
    %63 = vector.broadcast %62 : vector<8x16x1xf32> to vector<8x16x16xf32>
    %64 = arith.mulf %59, %63 : vector<8x16x16xf32>
    %65 = tpu.reciprocal %51 {approx = true} : vector<8x16x1xf32> -> vector<8x16x1xf32>
    %cst_14 = arith.constant 0.398942292 : f32
    %66 = vector.broadcast %cst_14 : f32 to vector<8x16x1xf32>
    %67 = arith.mulf %66, %65 : vector<8x16x1xf32>
    %68 = arith.mulf %65, %65 : vector<8x16x1xf32>
    %69 = vector.shape_cast %0 : vector<16x16xf32> to vector<1x16x16xf32>
    %70 = vector.broadcast %69 : vector<1x16x16xf32> to vector<8x16x16xf32>
    %71 = vector.broadcast %68 : vector<8x16x1xf32> to vector<8x16x16xf32>
    %72 = arith.mulf %70, %71 : vector<8x16x16xf32>
    %73 = math.exp %72 : vector<8x16x16xf32>
    %74 = vector.broadcast %67 : vector<8x16x1xf32> to vector<8x16x16xf32>
    %75 = arith.mulf %74, %73 : vector<8x16x16xf32>
    %cst_15 = arith.constant dense<0.000000e+00> : vector<8x16xf32>
    %76 = vector.multi_reduction <add>, %75, %cst_15 [2] : vector<8x16x16xf32> to vector<8x16xf32>
    %77 = vector.shape_cast %76 : vector<8x16xf32> to vector<8x16x1xf32>
    %78 = tpu.reciprocal %77 {approx = true} : vector<8x16x1xf32> -> vector<8x16x1xf32>
    %79 = vector.broadcast %78 : vector<8x16x1xf32> to vector<8x16x16xf32>
    %80 = arith.mulf %75, %79 : vector<8x16x16xf32>
    %c0_16 = arith.constant 0 : index
    %c0_17 = arith.constant 0 : index
    %c0_18 = arith.constant 0 : index
    %c0_19 = arith.constant 0 : index
    %81 = vector.load %arg27[%c0_16, %c0_17, %c0_18, %c0_19] : memref<2x8x16x16xf32, #tpu.memory_space<vmem>>, vector<1x8x16x16xf32>
    %82 = vector.shape_cast %81 : vector<1x8x16x16xf32> to vector<8x16x16xf32>
    %83 = vector.shape_cast %80 : vector<8x16x16xf32> to vector<1x8x16x16xf32>
    tpu.vector_store %arg27[%c0_16, %c0_17, %c0_18, %c0_19], %83 {strides = array<i32>} : memref<2x8x16x16xf32, #tpu.memory_space<vmem>>, vector<1x8x16x16xf32>,
    %c0_20 = arith.constant 0 : index
    %c0_21 = arith.constant 0 : index
    %c0_22 = arith.constant 0 : index
    %c0_23 = arith.constant 0 : index
    %84 = vector.load %arg28[%c0_20, %c0_21, %c0_22, %c0_23] : memref<2x8x16x16xf32, #tpu.memory_space<vmem>>, vector<1x8x16x16xf32>
    %85 = vector.shape_cast %84 : vector<1x8x16x16xf32> to vector<8x16x16xf32>
    %86 = vector.shape_cast %64 : vector<8x16x16xf32> to vector<1x8x16x16xf32>
    tpu.vector_store %arg28[%c0_20, %c0_21, %c0_22, %c0_23], %86 {strides = array<i32>} : memref<2x8x16x16xf32, #tpu.memory_space<vmem>>, vector<1x8x16x16xf32>,
    "tpu.trace_start"() <{level = 10 : i32, message = "gij,gjd->gid"}> : () -> ()
    %cst_24 = arith.constant dense<0.000000e+00> : vector<8x16x8xf32>
    %87 = tpu.matmul %64, %40, %cst_24 {dimension_numbers = #tpu.dot_dimension_numbers<[2], [1], [1], [2], [0, 0, 0, 1, 1, 2], [0], [0]>} : vector<8x16x16xf32>, vector<8x16x8xf32>, vector<8x16x8xf32> -> vector<8x16x8xf32>
    "tpu.trace_stop"() : () -> ()
    %88 = vector.shape_cast %87 : vector<8x16x8xf32> to vector<4x32x8xf32>
    %89 = vector.extract_strided_slice %88 {offsets = [0, 0, 0], sizes = [1, 32, 8], strides = [1, 1, 1]} : vector<4x32x8xf32> to vector<1x32x8xf32>
    %90 = vector.shape_cast %89 : vector<1x32x8xf32> to vector<32x8xf32>
    %91 = vector.extract_strided_slice %88 {offsets = [1, 0, 0], sizes = [1, 32, 8], strides = [1, 1, 1]} : vector<4x32x8xf32> to vector<1x32x8xf32>
    %92 = vector.shape_cast %91 : vector<1x32x8xf32> to vector<32x8xf32>
    %93 = vector.extract_strided_slice %88 {offsets = [2, 0, 0], sizes = [1, 32, 8], strides = [1, 1, 1]} : vector<4x32x8xf32> to vector<1x32x8xf32>
    %94 = vector.shape_cast %93 : vector<1x32x8xf32> to vector<32x8xf32>
    %95 = vector.extract_strided_slice %88 {offsets = [3, 0, 0], sizes = [1, 32, 8], strides = [1, 1, 1]} : vector<4x32x8xf32> to vector<1x32x8xf32>
    %96 = vector.shape_cast %95 : vector<1x32x8xf32> to vector<32x8xf32>
    %97 = tpu.concatenate %90, %92, %94, %96 in 1 : vector<32x8xf32>, vector<32x8xf32>, vector<32x8xf32>, vector<32x8xf32> -> vector<32x32xf32>
    %c0_25 = arith.constant 0 : index
    %c0_26 = arith.constant 0 : index
    %98 = vector.load %arg8[%c0_25, %c0_26] : memref<32x32xf32, #tpu.memory_space<vmem>>, vector<32x32xf32>
    %cst_27 = arith.constant dense<0.000000e+00> : vector<32x32xf32>
    %99 = tpu.matmul %97, %98, %cst_27 {dimension_numbers = #tpu.dot_dimension_numbers<[1], [0], [0], [1], [0, 0, 1, 1], [], []>} : vector<32x32xf32>, vector<32x32xf32>, vector<32x32xf32> -> vector<32x32xf32>
    %100 = arith.addf %99, %5 : vector<32x32xf32>
    %c0_28 = arith.constant 0 : index
    %c0_29 = arith.constant 0 : index
    %101 = vector.load %arg9[%c0_28, %c0_29] : memref<1x32xf32, #tpu.memory_space<vmem>>, vector<1x32xf32>
    %c0_30 = arith.constant 0 : index
    %c0_31 = arith.constant 0 : index
    %102 = vector.load %arg10[%c0_30, %c0_31] : memref<1x32xf32, #tpu.memory_space<vmem>>, vector<1x32xf32>
    %cst_32 = arith.constant dense<0.000000e+00> : vector<32xf32>
    %103 = vector.multi_reduction <add>, %100, %cst_32 [1] : vector<32x32xf32> to vector<32xf32>
    %104 = vector.shape_cast %103 : vector<32xf32> to vector<32x1xf32>
    %cst_33 = arith.constant 3.200000e+01 : f32
    %105 = vector.broadcast %cst_33 : f32 to vector<32x1xf32>
    %106 = arith.divf %104, %105 : vector<32x1xf32>
    %107 = vector.broadcast %106 : vector<32x1xf32> to vector<32x32xf32>
    %108 = arith.subf %100, %107 : vector<32x32xf32>
    %109 = arith.mulf %108, %108 : vector<32x32xf32>
    %cst_34 = arith.constant dense<0.000000e+00> : vector<32xf32>
    %110 = vector.multi_reduction <add>, %109, %cst_34 [1] : vector<32x32xf32> to vector<32xf32>
    %111 = vector.shape_cast %110 : vector<32xf32> to vector<32x1xf32>
    %cst_35 = arith.constant 3.200000e+01 : f32
    %112 = vector.broadcast %cst_35 : f32 to vector<32x1xf32>
    %113 = arith.divf %111, %112 : vector<32x1xf32>
    %cst_36 = arith.constant 9.99999974E-6 : f32
    %114 = vector.broadcast %cst_36 : f32 to vector<32x1xf32>
    %115 = arith.addf %113, %114 : vector<32x1xf32>
    %116 = math.rsqrt %115 : vector<32x1xf32>
    %117 = vector.broadcast %116 : vector<32x1xf32> to vector<32x32xf32>
    %118 = arith.mulf %108, %117 : vector<32x32xf32>
    %119 = vector.broadcast %101 : vector<1x32xf32> to vector<32x32xf32>
    %120 = arith.mulf %118, %119 : vector<32x32xf32>
    %121 = vector.broadcast %102 : vector<1x32xf32> to vector<32x32xf32>
    %122 = arith.addf %120, %121 : vector<32x32xf32>
    %c0_37 = arith.constant 0 : index
    %c0_38 = arith.constant 0 : index
    %123 = vector.load %arg11[%c0_37, %c0_38] : memref<32x128xf32, #tpu.memory_space<vmem>>, vector<32x128xf32>
    %cst_39 = arith.constant dense<0.000000e+00> : vector<32x128xf32>
    %124 = tpu.matmul %122, %123, %cst_39 {dimension_numbers = #tpu.dot_dimension_numbers<[1], [0], [0], [1], [0, 0, 1, 1], [], []>} : vector<32x32xf32>, vector<32x128xf32>, vector<32x128xf32> -> vector<32x128xf32>
    %c0_40 = arith.constant 0 : index
    %c0_41 = arith.constant 0 : index
    %125 = vector.load %arg12[%c0_40, %c0_41] : memref<1x128xf32, #tpu.memory_space<vmem>>, vector<1x128xf32>
    %126 = vector.broadcast %125 : vector<1x128xf32> to vector<32x128xf32>
    %127 = arith.addf %124, %126 : vector<32x128xf32>
    %cst_42 = arith.constant 0.000000e+00 : f32
    %128 = vector.broadcast %cst_42 : f32 to vector<32x128xf32>
    %129 = arith.maximumf %127, %128 : vector<32x128xf32>
    %c0_43 = arith.constant 0 : index
    %c0_44 = arith.constant 0 : index
    %130 = vector.load %arg13[%c0_43, %c0_44] : memref<128x32xf32, #tpu.memory_space<vmem>>, vector<128x32xf32>
    %cst_45 = arith.constant dense<0.000000e+00> : vector<32x32xf32>
    %131 = tpu.matmul %129, %130, %cst_45 {dimension_numbers = #tpu.dot_dimension_numbers<[1], [0], [0], [1], [0, 0, 1, 1], [], []>} : vector<32x128xf32>, vector<128x32xf32>, vector<32x32xf32> -> vector<32x32xf32>
    %c0_46 = arith.constant 0 : index
    %c0_47 = arith.constant 0 : index
    %132 = vector.load %arg14[%c0_46, %c0_47] : memref<1x32xf32, #tpu.memory_space<vmem>>, vector<1x32xf32>
    %133 = vector.broadcast %132 : vector<1x32xf32> to vector<32x32xf32>
    %134 = arith.addf %131, %133 : vector<32x32xf32>
    %135 = arith.addf %134, %122 : vector<32x32xf32>
    %c0_48 = arith.constant 0 : index
    %c0_49 = arith.constant 0 : index
    %136 = vector.load %arg15[%c0_48, %c0_49] : memref<1x32xf32, #tpu.memory_space<vmem>>, vector<1x32xf32>
    %c0_50 = arith.constant 0 : index
    %c0_51 = arith.constant 0 : index
    %137 = vector.load %arg16[%c0_50, %c0_51] : memref<1x32xf32, #tpu.memory_space<vmem>>, vector<1x32xf32>
    %cst_52 = arith.constant dense<0.000000e+00> : vector<32xf32>
    %138 = vector.multi_reduction <add>, %135, %cst_52 [1] : vector<32x32xf32> to vector<32xf32>
    %139 = vector.shape_cast %138 : vector<32xf32> to vector<32x1xf32>
    %cst_53 = arith.constant 3.200000e+01 : f32
    %140 = vector.broadcast %cst_53 : f32 to vector<32x1xf32>
    %141 = arith.divf %139, %140 : vector<32x1xf32>
    %142 = vector.broadcast %141 : vector<32x1xf32> to vector<32x32xf32>
    %143 = arith.subf %135, %142 : vector<32x32xf32>
    %144 = arith.mulf %143, %143 : vector<32x32xf32>
    %cst_54 = arith.constant dense<0.000000e+00> : vector<32xf32>
    %145 = vector.multi_reduction <add>, %144, %cst_54 [1] : vector<32x32xf32> to vector<32xf32>
    %146 = vector.shape_cast %145 : vector<32xf32> to vector<32x1xf32>
    %cst_55 = arith.constant 3.200000e+01 : f32
    %147 = vector.broadcast %cst_55 : f32 to vector<32x1xf32>
    %148 = arith.divf %146, %147 : vector<32x1xf32>
    %cst_56 = arith.constant 9.99999974E-6 : f32
    %149 = vector.broadcast %cst_56 : f32 to vector<32x1xf32>
    %150 = arith.addf %148, %149 : vector<32x1xf32>
    %151 = math.rsqrt %150 : vector<32x1xf32>
    %152 = vector.broadcast %151 : vector<32x1xf32> to vector<32x32xf32>
    %153 = arith.mulf %143, %152 : vector<32x32xf32>
    %154 = vector.broadcast %136 : vector<1x32xf32> to vector<32x32xf32>
    %155 = arith.mulf %153, %154 : vector<32x32xf32>
    %156 = vector.broadcast %137 : vector<1x32xf32> to vector<32x32xf32>
    %157 = arith.addf %155, %156 : vector<32x32xf32>
    %c0_57 = arith.constant 0 : index
    %c0_58 = arith.constant 0 : index
    %158 = vector.load %arg17[%c0_57, %c0_58] : memref<32x100xf32, #tpu.memory_space<vmem>>, vector<32x100xf32>
    %cst_59 = arith.constant dense<0.000000e+00> : vector<32x100xf32>
    %159 = tpu.matmul %157, %158, %cst_59 {dimension_numbers = #tpu.dot_dimension_numbers<[1], [0], [0], [1], [0, 0, 1, 1], [], []>} : vector<32x32xf32>, vector<32x100xf32>, vector<32x100xf32> -> vector<32x100xf32>
    %160 = vector.extract_strided_slice %159 {offsets = [0, 0], sizes = [32, 32], strides = [1, 1]} : vector<32x100xf32> to vector<32x32xf32>
    %161 = vector.extract_strided_slice %160 {offsets = [0, 0], sizes = [32, 8], strides = [1, 1]} : vector<32x32xf32> to vector<32x8xf32>
    %162 = vector.shape_cast %161 : vector<32x8xf32> to vector<1x2x16x8xf32>
    %163 = vector.extract_strided_slice %160 {offsets = [0, 8], sizes = [32, 8], strides = [1, 1]} : vector<32x32xf32> to vector<32x8xf32>
    %164 = vector.shape_cast %163 : vector<32x8xf32> to vector<1x2x16x8xf32>
    %165 = vector.extract_strided_slice %160 {offsets = [0, 16], sizes = [32, 8], strides = [1, 1]} : vector<32x32xf32> to vector<32x8xf32>
    %166 = vector.shape_cast %165 : vector<32x8xf32> to vector<1x2x16x8xf32>
    %167 = vector.extract_strided_slice %160 {offsets = [0, 24], sizes = [32, 8], strides = [1, 1]} : vector<32x32xf32> to vector<32x8xf32>
    %168 = vector.shape_cast %167 : vector<32x8xf32> to vector<1x2x16x8xf32>
    %169 = tpu.concatenate %162, %164, %166, %168 in 0 : vector<1x2x16x8xf32>, vector<1x2x16x8xf32>, vector<1x2x16x8xf32>, vector<1x2x16x8xf32> -> vector<4x2x16x8xf32>
    %170 = vector.shape_cast %169 : vector<4x2x16x8xf32> to vector<8x16x8xf32>
    %171 = vector.extract_strided_slice %159 {offsets = [0, 32], sizes = [32, 32], strides = [1, 1]} : vector<32x100xf32> to vector<32x32xf32>
    %172 = vector.extract_strided_slice %171 {offsets = [0, 0], sizes = [32, 8], strides = [1, 1]} : vector<32x32xf32> to vector<32x8xf32>
    %173 = vector.shape_cast %172 : vector<32x8xf32> to vector<1x2x16x8xf32>
    %174 = vector.extract_strided_slice %171 {offsets = [0, 8], sizes = [32, 8], strides = [1, 1]} : vector<32x32xf32> to vector<32x8xf32>
    %175 = vector.shape_cast %174 : vector<32x8xf32> to vector<1x2x16x8xf32>
    %176 = vector.extract_strided_slice %171 {offsets = [0, 16], sizes = [32, 8], strides = [1, 1]} : vector<32x32xf32> to vector<32x8xf32>
    %177 = vector.shape_cast %176 : vector<32x8xf32> to vector<1x2x16x8xf32>
    %178 = vector.extract_strided_slice %171 {offsets = [0, 24], sizes = [32, 8], strides = [1, 1]} : vector<32x32xf32> to vector<32x8xf32>
    %179 = vector.shape_cast %178 : vector<32x8xf32> to vector<1x2x16x8xf32>
    %180 = tpu.concatenate %173, %175, %177, %179 in 0 : vector<1x2x16x8xf32>, vector<1x2x16x8xf32>, vector<1x2x16x8xf32>, vector<1x2x16x8xf32> -> vector<4x2x16x8xf32>
    %181 = vector.shape_cast %180 : vector<4x2x16x8xf32> to vector<8x16x8xf32>
    %182 = vector.extract_strided_slice %159 {offsets = [0, 64], sizes = [32, 32], strides = [1, 1]} : vector<32x100xf32> to vector<32x32xf32>
    %183 = vector.extract_strided_slice %182 {offsets = [0, 0], sizes = [32, 8], strides = [1, 1]} : vector<32x32xf32> to vector<32x8xf32>
    %184 = vector.shape_cast %183 : vector<32x8xf32> to vector<1x2x16x8xf32>
    %185 = vector.extract_strided_slice %182 {offsets = [0, 8], sizes = [32, 8], strides = [1, 1]} : vector<32x32xf32> to vector<32x8xf32>
    %186 = vector.shape_cast %185 : vector<32x8xf32> to vector<1x2x16x8xf32>
    %187 = vector.extract_strided_slice %182 {offsets = [0, 16], sizes = [32, 8], strides = [1, 1]} : vector<32x32xf32> to vector<32x8xf32>
    %188 = vector.shape_cast %187 : vector<32x8xf32> to vector<1x2x16x8xf32>
    %189 = vector.extract_strided_slice %182 {offsets = [0, 24], sizes = [32, 8], strides = [1, 1]} : vector<32x32xf32> to vector<32x8xf32>
    %190 = vector.shape_cast %189 : vector<32x8xf32> to vector<1x2x16x8xf32>
    %191 = tpu.concatenate %184, %186, %188, %190 in 0 : vector<1x2x16x8xf32>, vector<1x2x16x8xf32>, vector<1x2x16x8xf32>, vector<1x2x16x8xf32> -> vector<4x2x16x8xf32>
    %192 = vector.shape_cast %191 : vector<4x2x16x8xf32> to vector<8x16x8xf32>
    %193 = vector.extract_strided_slice %159 {offsets = [0, 96], sizes = [32, 4], strides = [1, 1]} : vector<32x100xf32> to vector<32x4xf32>
    %194 = vector.extract_strided_slice %193 {offsets = [0, 0], sizes = [32, 1], strides = [1, 1]} : vector<32x4xf32> to vector<32x1xf32>
    %195 = vector.shape_cast %194 : vector<32x1xf32> to vector<1x2x16x1xf32>
    %196 = vector.extract_strided_slice %193 {offsets = [0, 1], sizes = [32, 1], strides = [1, 1]} : vector<32x4xf32> to vector<32x1xf32>
    %197 = vector.shape_cast %196 : vector<32x1xf32> to vector<1x2x16x1xf32>
    %198 = vector.extract_strided_slice %193 {offsets = [0, 2], sizes = [32, 1], strides = [1, 1]} : vector<32x4xf32> to vector<32x1xf32>
    %199 = vector.shape_cast %198 : vector<32x1xf32> to vector<1x2x16x1xf32>
    %200 = vector.extract_strided_slice %193 {offsets = [0, 3], sizes = [32, 1], strides = [1, 1]} : vector<32x4xf32> to vector<32x1xf32>
    %201 = vector.shape_cast %200 : vector<32x1xf32> to vector<1x2x16x1xf32>
    %202 = tpu.concatenate %195, %197, %199, %201 in 0 : vector<1x2x16x1xf32>, vector<1x2x16x1xf32>, vector<1x2x16x1xf32>, vector<1x2x16x1xf32> -> vector<4x2x16x1xf32>
    %203 = vector.shape_cast %202 : vector<4x2x16x1xf32> to vector<8x16x1xf32>
    "tpu.trace_start"() <{level = 10 : i32, message = "gid,gjd->gij"}> : () -> ()
    %cst_60 = arith.constant dense<0.000000e+00> : vector<8x16x16xf32>
    %204 = tpu.matmul %170, %181, %cst_60 {dimension_numbers = #tpu.dot_dimension_numbers<[2], [2], [1], [1], [0, 0, 0, 1, 1, 1], [0], [0]>} : vector<8x16x8xf32>, vector<8x16x8xf32>, vector<8x16x16xf32> -> vector<8x16x16xf32>
    "tpu.trace_stop"() : () -> ()
    %cst_61 = arith.constant 0.353553385 : f32
    %205 = vector.broadcast %cst_61 : f32 to vector<8x16x16xf32>
    %206 = arith.mulf %204, %205 : vector<8x16x16xf32>
    %cst_62 = arith.constant dense<0xFF800000> : vector<8x16xf32>
    %207 = vector.multi_reduction <maximumf>, %206, %cst_62 [2] : vector<8x16x16xf32> to vector<8x16xf32>
    %208 = vector.shape_cast %207 : vector<8x16xf32> to vector<8x16x1xf32>
    %209 = vector.broadcast %208 : vector<8x16x1xf32> to vector<8x16x16xf32>
    %210 = arith.subf %206, %209 : vector<8x16x16xf32>
    %211 = math.exp %210 : vector<8x16x16xf32>
    %cst_63 = arith.constant dense<0.000000e+00> : vector<8x16xf32>
    %212 = vector.multi_reduction <add>, %211, %cst_63 [2] : vector<8x16x16xf32> to vector<8x16xf32>
    %213 = vector.shape_cast %212 : vector<8x16xf32> to vector<8x16x1xf32>
    %214 = tpu.reciprocal %213 {approx = true} : vector<8x16x1xf32> -> vector<8x16x1xf32>
    %215 = vector.broadcast %214 : vector<8x16x1xf32> to vector<8x16x16xf32>
    %216 = arith.mulf %211, %215 : vector<8x16x16xf32>
    %217 = tpu.reciprocal %203 {approx = true} : vector<8x16x1xf32> -> vector<8x16x1xf32>
    %cst_64 = arith.constant 0.398942292 : f32
    %218 = vector.broadcast %cst_64 : f32 to vector<8x16x1xf32>
    %219 = arith.mulf %218, %217 : vector<8x16x1xf32>
    %220 = arith.mulf %217, %217 : vector<8x16x1xf32>
    %221 = vector.shape_cast %0 : vector<16x16xf32> to vector<1x16x16xf32>
    %222 = vector.broadcast %221 : vector<1x16x16xf32> to vector<8x16x16xf32>
    %223 = vector.broadcast %220 : vector<8x16x1xf32> to vector<8x16x16xf32>
    %224 = arith.mulf %222, %223 : vector<8x16x16xf32>
    %225 = math.exp %224 : vector<8x16x16xf32>
    %226 = vector.broadcast %219 : vector<8x16x1xf32> to vector<8x16x16xf32>
    %227 = arith.mulf %226, %225 : vector<8x16x16xf32>
    %cst_65 = arith.constant dense<0.000000e+00> : vector<8x16xf32>
    %228 = vector.multi_reduction <add>, %227, %cst_65 [2] : vector<8x16x16xf32> to vector<8x16xf32>
    %229 = vector.shape_cast %228 : vector<8x16xf32> to vector<8x16x1xf32>
    %230 = tpu.reciprocal %229 {approx = true} : vector<8x16x1xf32> -> vector<8x16x1xf32>
    %231 = vector.broadcast %230 : vector<8x16x1xf32> to vector<8x16x16xf32>
    %232 = arith.mulf %227, %231 : vector<8x16x16xf32>
    %c1 = arith.constant 1 : index
    %c0_66 = arith.constant 0 : index
    %c0_67 = arith.constant 0 : index
    %c0_68 = arith.constant 0 : index
    %233 = vector.load %arg27[%c1, %c0_66, %c0_67, %c0_68] : memref<2x8x16x16xf32, #tpu.memory_space<vmem>>, vector<1x8x16x16xf32>
    %234 = vector.shape_cast %233 : vector<1x8x16x16xf32> to vector<8x16x16xf32>
    %235 = vector.shape_cast %232 : vector<8x16x16xf32> to vector<1x8x16x16xf32>
    tpu.vector_store %arg27[%c1, %c0_66, %c0_67, %c0_68], %235 {strides = array<i32>} : memref<2x8x16x16xf32, #tpu.memory_space<vmem>>, vector<1x8x16x16xf32>,
    %c1_69 = arith.constant 1 : index
    %c0_70 = arith.constant 0 : index
    %c0_71 = arith.constant 0 : index
    %c0_72 = arith.constant 0 : index
    %236 = vector.load %arg28[%c1_69, %c0_70, %c0_71, %c0_72] : memref<2x8x16x16xf32, #tpu.memory_space<vmem>>, vector<1x8x16x16xf32>
    %237 = vector.shape_cast %236 : vector<1x8x16x16xf32> to vector<8x16x16xf32>
    %238 = vector.shape_cast %216 : vector<8x16x16xf32> to vector<1x8x16x16xf32>
    tpu.vector_store %arg28[%c1_69, %c0_70, %c0_71, %c0_72], %238 {strides = array<i32>} : memref<2x8x16x16xf32, #tpu.memory_space<vmem>>, vector<1x8x16x16xf32>,
    "tpu.trace_start"() <{level = 10 : i32, message = "gij,gjd->gid"}> : () -> ()
    %cst_73 = arith.constant dense<0.000000e+00> : vector<8x16x8xf32>
    %239 = tpu.matmul %216, %192, %cst_73 {dimension_numbers = #tpu.dot_dimension_numbers<[2], [1], [1], [2], [0, 0, 0, 1, 1, 2], [0], [0]>} : vector<8x16x16xf32>, vector<8x16x8xf32>, vector<8x16x8xf32> -> vector<8x16x8xf32>
    "tpu.trace_stop"() : () -> ()
    %240 = vector.shape_cast %239 : vector<8x16x8xf32> to vector<4x32x8xf32>
    %241 = vector.extract_strided_slice %240 {offsets = [0, 0, 0], sizes = [1, 32, 8], strides = [1, 1, 1]} : vector<4x32x8xf32> to vector<1x32x8xf32>
    %242 = vector.shape_cast %241 : vector<1x32x8xf32> to vector<32x8xf32>
    %243 = vector.extract_strided_slice %240 {offsets = [1, 0, 0], sizes = [1, 32, 8], strides = [1, 1, 1]} : vector<4x32x8xf32> to vector<1x32x8xf32>
    %244 = vector.shape_cast %243 : vector<1x32x8xf32> to vector<32x8xf32>
    %245 = vector.extract_strided_slice %240 {offsets = [2, 0, 0], sizes = [1, 32, 8], strides = [1, 1, 1]} : vector<4x32x8xf32> to vector<1x32x8xf32>
    %246 = vector.shape_cast %245 : vector<1x32x8xf32> to vector<32x8xf32>
    %247 = vector.extract_strided_slice %240 {offsets = [3, 0, 0], sizes = [1, 32, 8], strides = [1, 1, 1]} : vector<4x32x8xf32> to vector<1x32x8xf32>
    %248 = vector.shape_cast %247 : vector<1x32x8xf32> to vector<32x8xf32>
    %249 = tpu.concatenate %242, %244, %246, %248 in 1 : vector<32x8xf32>, vector<32x8xf32>, vector<32x8xf32>, vector<32x8xf32> -> vector<32x32xf32>
    %c0_74 = arith.constant 0 : index
    %c0_75 = arith.constant 0 : index
    %250 = vector.load %arg18[%c0_74, %c0_75] : memref<32x32xf32, #tpu.memory_space<vmem>>, vector<32x32xf32>
    %cst_76 = arith.constant dense<0.000000e+00> : vector<32x32xf32>
    %251 = tpu.matmul %249, %250, %cst_76 {dimension_numbers = #tpu.dot_dimension_numbers<[1], [0], [0], [1], [0, 0, 1, 1], [], []>} : vector<32x32xf32>, vector<32x32xf32>, vector<32x32xf32> -> vector<32x32xf32>
    %252 = arith.addf %251, %157 : vector<32x32xf32>
    %c0_77 = arith.constant 0 : index
    %c0_78 = arith.constant 0 : index
    %253 = vector.load %arg19[%c0_77, %c0_78] : memref<1x32xf32, #tpu.memory_space<vmem>>, vector<1x32xf32>
    %c0_79 = arith.constant 0 : index
    %c0_80 = arith.constant 0 : index
    %254 = vector.load %arg20[%c0_79, %c0_80] : memref<1x32xf32, #tpu.memory_space<vmem>>, vector<1x32xf32>
    %cst_81 = arith.constant dense<0.000000e+00> : vector<32xf32>
    %255 = vector.multi_reduction <add>, %252, %cst_81 [1] : vector<32x32xf32> to vector<32xf32>
    %256 = vector.shape_cast %255 : vector<32xf32> to vector<32x1xf32>
    %cst_82 = arith.constant 3.200000e+01 : f32
    %257 = vector.broadcast %cst_82 : f32 to vector<32x1xf32>
    %258 = arith.divf %256, %257 : vector<32x1xf32>
    %259 = vector.broadcast %258 : vector<32x1xf32> to vector<32x32xf32>
    %260 = arith.subf %252, %259 : vector<32x32xf32>
    %261 = arith.mulf %260, %260 : vector<32x32xf32>
    %cst_83 = arith.constant dense<0.000000e+00> : vector<32xf32>
    %262 = vector.multi_reduction <add>, %261, %cst_83 [1] : vector<32x32xf32> to vector<32xf32>
    %263 = vector.shape_cast %262 : vector<32xf32> to vector<32x1xf32>
    %cst_84 = arith.constant 3.200000e+01 : f32
    %264 = vector.broadcast %cst_84 : f32 to vector<32x1xf32>
    %265 = arith.divf %263, %264 : vector<32x1xf32>
    %cst_85 = arith.constant 9.99999974E-6 : f32
    %266 = vector.broadcast %cst_85 : f32 to vector<32x1xf32>
    %267 = arith.addf %265, %266 : vector<32x1xf32>
    %268 = math.rsqrt %267 : vector<32x1xf32>
    %269 = vector.broadcast %268 : vector<32x1xf32> to vector<32x32xf32>
    %270 = arith.mulf %260, %269 : vector<32x32xf32>
    %271 = vector.broadcast %253 : vector<1x32xf32> to vector<32x32xf32>
    %272 = arith.mulf %270, %271 : vector<32x32xf32>
    %273 = vector.broadcast %254 : vector<1x32xf32> to vector<32x32xf32>
    %274 = arith.addf %272, %273 : vector<32x32xf32>
    %c0_86 = arith.constant 0 : index
    %c0_87 = arith.constant 0 : index
    %275 = vector.load %arg21[%c0_86, %c0_87] : memref<32x128xf32, #tpu.memory_space<vmem>>, vector<32x128xf32>
    %cst_88 = arith.constant dense<0.000000e+00> : vector<32x128xf32>
    %276 = tpu.matmul %274, %275, %cst_88 {dimension_numbers = #tpu.dot_dimension_numbers<[1], [0], [0], [1], [0, 0, 1, 1], [], []>} : vector<32x32xf32>, vector<32x128xf32>, vector<32x128xf32> -> vector<32x128xf32>
    %c0_89 = arith.constant 0 : index
    %c0_90 = arith.constant 0 : index
    %277 = vector.load %arg22[%c0_89, %c0_90] : memref<1x128xf32, #tpu.memory_space<vmem>>, vector<1x128xf32>
    %278 = vector.broadcast %277 : vector<1x128xf32> to vector<32x128xf32>
    %279 = arith.addf %276, %278 : vector<32x128xf32>
    %cst_91 = arith.constant 0.000000e+00 : f32
    %280 = vector.broadcast %cst_91 : f32 to vector<32x128xf32>
    %281 = arith.maximumf %279, %280 : vector<32x128xf32>
    %c0_92 = arith.constant 0 : index
    %c0_93 = arith.constant 0 : index
    %282 = vector.load %arg23[%c0_92, %c0_93] : memref<128x32xf32, #tpu.memory_space<vmem>>, vector<128x32xf32>
    %cst_94 = arith.constant dense<0.000000e+00> : vector<32x32xf32>
    %283 = tpu.matmul %281, %282, %cst_94 {dimension_numbers = #tpu.dot_dimension_numbers<[1], [0], [0], [1], [0, 0, 1, 1], [], []>} : vector<32x128xf32>, vector<128x32xf32>, vector<32x32xf32> -> vector<32x32xf32>
    %c0_95 = arith.constant 0 : index
    %c0_96 = arith.constant 0 : index
    %284 = vector.load %arg24[%c0_95, %c0_96] : memref<1x32xf32, #tpu.memory_space<vmem>>, vector<1x32xf32>
    %285 = vector.broadcast %284 : vector<1x32xf32> to vector<32x32xf32>
    %286 = arith.addf %283, %285 : vector<32x32xf32>
    %287 = arith.addf %286, %274 : vector<32x32xf32>
    %c0_97 = arith.constant 0 : index
    %c0_98 = arith.constant 0 : index
    %288 = vector.load %arg25[%c0_97, %c0_98] : memref<1x32xf32, #tpu.memory_space<vmem>>, vector<1x32xf32>
    %c0_99 = arith.constant 0 : index
    %c0_100 = arith.constant 0 : index
    %289 = vector.load %arg26[%c0_99, %c0_100] : memref<1x32xf32, #tpu.memory_space<vmem>>, vector<1x32xf32>
    %cst_101 = arith.constant dense<0.000000e+00> : vector<32xf32>
    %290 = vector.multi_reduction <add>, %287, %cst_101 [1] : vector<32x32xf32> to vector<32xf32>
    %291 = vector.shape_cast %290 : vector<32xf32> to vector<32x1xf32>
    %cst_102 = arith.constant 3.200000e+01 : f32
    %292 = vector.broadcast %cst_102 : f32 to vector<32x1xf32>
    %293 = arith.divf %291, %292 : vector<32x1xf32>
    %294 = vector.broadcast %293 : vector<32x1xf32> to vector<32x32xf32>
    %295 = arith.subf %287, %294 : vector<32x32xf32>
    %296 = arith.mulf %295, %295 : vector<32x32xf32>
    %cst_103 = arith.constant dense<0.000000e+00> : vector<32xf32>
    %297 = vector.multi_reduction <add>, %296, %cst_103 [1] : vector<32x32xf32> to vector<32xf32>
    %298 = vector.shape_cast %297 : vector<32xf32> to vector<32x1xf32>
    %cst_104 = arith.constant 3.200000e+01 : f32
    %299 = vector.broadcast %cst_104 : f32 to vector<32x1xf32>
    %300 = arith.divf %298, %299 : vector<32x1xf32>
    %cst_105 = arith.constant 9.99999974E-6 : f32
    %301 = vector.broadcast %cst_105 : f32 to vector<32x1xf32>
    %302 = arith.addf %300, %301 : vector<32x1xf32>
    %303 = math.rsqrt %302 : vector<32x1xf32>
    %304 = vector.broadcast %303 : vector<32x1xf32> to vector<32x32xf32>
    %305 = arith.mulf %295, %304 : vector<32x32xf32>
    %306 = vector.broadcast %288 : vector<1x32xf32> to vector<32x32xf32>
    %307 = arith.mulf %305, %306 : vector<32x32xf32>
    %308 = vector.broadcast %289 : vector<1x32xf32> to vector<32x32xf32>
    %309 = arith.addf %307, %308 : vector<32x32xf32>
    %c0_106 = arith.constant 0 : index
    %c0_107 = arith.constant 0 : index
    %310 = vector.load %arg5[%c0_106, %c0_107] : memref<32x4xf32, #tpu.memory_space<vmem>>, vector<32x4xf32>
    %cst_108 = arith.constant dense<0.000000e+00> : vector<32x4xf32>
    %311 = tpu.matmul %309, %310, %cst_108 {dimension_numbers = #tpu.dot_dimension_numbers<[1], [0], [0], [1], [0, 0, 1, 1], [], []>} : vector<32x32xf32>, vector<32x4xf32>, vector<32x4xf32> -> vector<32x4xf32>
    %c0_109 = arith.constant 0 : index
    %c0_110 = arith.constant 0 : index
    %312 = vector.load %arg6[%c0_109, %c0_110] : memref<1x4xf32, #tpu.memory_space<vmem>>, vector<1x4xf32>
    %313 = vector.broadcast %312 : vector<1x4xf32> to vector<32x4xf32>
    %314 = arith.addf %311, %313 : vector<32x4xf32>
    %c0_111 = arith.constant 0 : index
    %c0_112 = arith.constant 0 : index
    %315 = vector.load %arg29[%c0_111, %c0_112] : memref<32x4xf32, #tpu.memory_space<vmem>>, vector<32x4xf32>
    tpu.vector_store %arg29[%c0_111, %c0_112], %314 {strides = array<i32>} : memref<32x4xf32, #tpu.memory_space<vmem>>, vector<32x4xf32>,
    return
  }
  func.func @transform_0(%arg0: i32) -> (i32, i32) {
    %c0_i32 = arith.constant 0 : i32
    %c0_i32_0 = arith.constant 0 : i32
    %c0_i32_1 = arith.constant 0 : i32
    return %c0_i32, %c0_i32_0 : i32, i32
  }
  func.func @transform_1(%arg0: i32) -> (i32, i32) {
    %c0_i32 = arith.constant 0 : i32
    %c0_i32_0 = arith.constant 0 : i32
    %c0_i32_1 = arith.constant 0 : i32
    return %c0_i32, %c0_i32_0 : i32, i32
  }
  func.func @transform_2(%arg0: i32) -> (i32, i32) {
    %c0_i32 = arith.constant 0 : i32
    %c0_i32_0 = arith.constant 0 : i32
    %c0_i32_1 = arith.constant 0 : i32
    return %c0_i32, %c0_i32_0 : i32, i32
  }
  func.func @transform_3(%arg0: i32) -> (i32, i32) {
    %c0_i32 = arith.constant 0 : i32
    %c0_i32_0 = arith.constant 0 : i32
    %c0_i32_1 = arith.constant 0 : i32
    return %c0_i32, %c0_i32_0 : i32, i32
  }
  func.func @transform_4(%arg0: i32) -> (i32, i32) {
    %c0_i32 = arith.constant 0 : i32
    %c0_i32_0 = arith.constant 0 : i32
    %c0_i32_1 = arith.constant 0 : i32
    return %c0_i32, %c0_i32_0 : i32, i32
  }
  func.func @transform_5(%arg0: i32) -> (i32, i32) {
    %c0_i32 = arith.constant 0 : i32
    %c0_i32_0 = arith.constant 0 : i32
    %c0_i32_1 = arith.constant 0 : i32
    return %c0_i32, %c0_i32_0 : i32, i32
  }
  func.func @transform_6(%arg0: i32) -> (i32, i32) {
    %c0_i32 = arith.constant 0 : i32
    %c0_i32_0 = arith.constant 0 : i32
    %c0_i32_1 = arith.constant 0 : i32
    return %c0_i32, %c0_i32_0 : i32, i32
  }
  func.func @transform_7(%arg0: i32) -> (i32, i32) {
    %c0_i32 = arith.constant 0 : i32
    %c0_i32_0 = arith.constant 0 : i32
    %c0_i32_1 = arith.constant 0 : i32
    return %c0_i32, %c0_i32_0 : i32, i32
  }
  func.func @transform_8(%arg0: i32) -> (i32, i32) {
    %c0_i32 = arith.constant 0 : i32
    %c0_i32_0 = arith.constant 0 : i32
    %c0_i32_1 = arith.constant 0 : i32
    return %c0_i32, %c0_i32_0 : i32, i32
  }
  func.func @transform_9(%arg0: i32) -> (i32, i32) {
    %c0_i32 = arith.constant 0 : i32
    %c0_i32_0 = arith.constant 0 : i32
    %c0_i32_1 = arith.constant 0 : i32
    return %c0_i32, %c0_i32_0 : i32, i32
  }
  func.func @transform_10(%arg0: i32) -> (i32, i32) {
    %c0_i32 = arith.constant 0 : i32
    %c0_i32_0 = arith.constant 0 : i32
    %c0_i32_1 = arith.constant 0 : i32
    return %c0_i32, %c0_i32_0 : i32, i32
  }
  func.func @transform_11(%arg0: i32) -> (i32, i32) {
    %c0_i32 = arith.constant 0 : i32
    %c0_i32_0 = arith.constant 0 : i32
    %c0_i32_1 = arith.constant 0 : i32
    return %c0_i32, %c0_i32_0 : i32, i32
  }
  func.func @transform_12(%arg0: i32) -> (i32, i32) {
    %c0_i32 = arith.constant 0 : i32
    %c0_i32_0 = arith.constant 0 : i32
    %c0_i32_1 = arith.constant 0 : i32
    return %c0_i32, %c0_i32_0 : i32, i32
  }
  func.func @transform_13(%arg0: i32) -> (i32, i32) {
    %c0_i32 = arith.constant 0 : i32
    %c0_i32_0 = arith.constant 0 : i32
    %c0_i32_1 = arith.constant 0 : i32
    return %c0_i32, %c0_i32_0 : i32, i32
  }
  func.func @transform_14(%arg0: i32) -> (i32, i32) {
    %c0_i32 = arith.constant 0 : i32
    %c0_i32_0 = arith.constant 0 : i32
    %c0_i32_1 = arith.constant 0 : i32
    return %c0_i32, %c0_i32_0 : i32, i32
  }
  func.func @transform_15(%arg0: i32) -> (i32, i32) {
    %c0_i32 = arith.constant 0 : i32
    %c0_i32_0 = arith.constant 0 : i32
    %c0_i32_1 = arith.constant 0 : i32
    return %c0_i32, %c0_i32_0 : i32, i32
  }
  func.func @transform_16(%arg0: i32) -> (i32, i32) {
    %c0_i32 = arith.constant 0 : i32
    %c0_i32_0 = arith.constant 0 : i32
    %c0_i32_1 = arith.constant 0 : i32
    return %c0_i32, %c0_i32_0 : i32, i32
  }
  func.func @transform_17(%arg0: i32) -> (i32, i32) {
    %c0_i32 = arith.constant 0 : i32
    %c0_i32_0 = arith.constant 0 : i32
    %c0_i32_1 = arith.constant 0 : i32
    return %c0_i32, %c0_i32_0 : i32, i32
  }
  func.func @transform_18(%arg0: i32) -> (i32, i32) {
    %c0_i32 = arith.constant 0 : i32
    %c0_i32_0 = arith.constant 0 : i32
    %c0_i32_1 = arith.constant 0 : i32
    return %c0_i32, %c0_i32_0 : i32, i32
  }
  func.func @transform_19(%arg0: i32) -> (i32, i32) {
    %c0_i32 = arith.constant 0 : i32
    %c0_i32_0 = arith.constant 0 : i32
    %c0_i32_1 = arith.constant 0 : i32
    return %c0_i32, %c0_i32_0 : i32, i32
  }
  func.func @transform_20(%arg0: i32) -> (i32, i32) {
    %c0_i32 = arith.constant 0 : i32
    %c0_i32_0 = arith.constant 0 : i32
    %c0_i32_1 = arith.constant 0 : i32
    return %c0_i32, %c0_i32_0 : i32, i32
  }
  func.func @transform_21(%arg0: i32) -> (i32, i32) {
    %c0_i32 = arith.constant 0 : i32
    %c0_i32_0 = arith.constant 0 : i32
    %c0_i32_1 = arith.constant 0 : i32
    return %c0_i32, %c0_i32_0 : i32, i32
  }
  func.func @transform_22(%arg0: i32) -> (i32, i32) {
    %c0_i32 = arith.constant 0 : i32
    %c0_i32_0 = arith.constant 0 : i32
    %c0_i32_1 = arith.constant 0 : i32
    return %c0_i32, %c0_i32_0 : i32, i32
  }
  func.func @transform_23(%arg0: i32) -> (i32, i32) {
    %c0_i32 = arith.constant 0 : i32
    %c0_i32_0 = arith.constant 0 : i32
    %c0_i32_1 = arith.constant 0 : i32
    return %c0_i32, %c0_i32_0 : i32, i32
  }
  func.func @transform_24(%arg0: i32) -> (i32, i32) {
    %c0_i32 = arith.constant 0 : i32
    %c0_i32_0 = arith.constant 0 : i32
    %c0_i32_1 = arith.constant 0 : i32
    return %c0_i32, %c0_i32_0 : i32, i32
  }
  func.func @transform_25(%arg0: i32) -> (i32, i32) {
    %c0_i32 = arith.constant 0 : i32
    %c0_i32_0 = arith.constant 0 : i32
    %c0_i32_1 = arith.constant 0 : i32
    return %c0_i32, %c0_i32_0 : i32, i32
  }
  func.func @transform_26(%arg0: i32) -> (i32, i32, i32, i32) {
    %c0_i32 = arith.constant 0 : i32
    %c0_i32_0 = arith.constant 0 : i32
    %c0_i32_1 = arith.constant 0 : i32
    %c0_i32_2 = arith.constant 0 : i32
    %c0_i32_3 = arith.constant 0 : i32
    return %c0_i32, %c0_i32_0, %c0_i32_1, %c0_i32_2 : i32, i32, i32, i32
  }
  func.func @transform_27(%arg0: i32) -> (i32, i32, i32, i32) {
    %c0_i32 = arith.constant 0 : i32
    %c0_i32_0 = arith.constant 0 : i32
    %c0_i32_1 = arith.constant 0 : i32
    %c0_i32_2 = arith.constant 0 : i32
    %c0_i32_3 = arith.constant 0 : i32
    return %c0_i32, %c0_i32_0, %c0_i32_1, %c0_i32_2 : i32, i32, i32, i32
  }
  func.func @transform_28(%arg0: i32) -> (i32, i32) {
    %c0_i32 = arith.constant 0 : i32
    %c0_i32_0 = arith.constant 0 : i32
    %c0_i32_1 = arith.constant 0 : i32
    return %c0_i32, %c0_i32_0 : i32, i32
  }
}

</mosaic_0001>

<bundles_post_ra>
// kernel: anomaly_transformer_forward.1
= control target key start
LH: loop header
LB: loop body
LE: loop exit
PB: predicated region body
PF: predicated region fallthrough
CT: control target
= control target key end

     0   :  { %vm111_vm0 = vcmask 1043456   ;;  %vm98_vm1 = vcmask 97280   ;;  %vm148_vm2 = vcmask 261120   ;;  %s4180_s30 = smov 112   ;;  %vm258_vm3 = vcmask 64512   ;;  %s6363_s1 = inlined_call_operand.vmem [shape: f32[12,32], index: 1, kind: input, shape index: {}]   ;;  %s6364_s0 = inlined_call_operand.vmem [shape: f32[32,12], index: 0, kind: input, shape index: {}]   ;;  %s6365_s6 = inlined_call_operand.vmem [shape: f32[32,100], index: 6, kind: input, shape index: {}]   ;;  %s6366_s2 = inlined_call_operand.vmem [shape: f32[32,32], index: 2, kind: input, shape index: {}]   ;;  %s6367_s27 = inlined_call_operand.vmem [shape: f32[2,8,16,16], index: 27, kind: output, shape index: {1}]   ;;  %s6368_s7 = inlined_call_operand.vmem [shape: f32[32,32], index: 7, kind: input, shape index: {}]   ;;  %s6369_s8 = inlined_call_operand.vmem [shape: f32[1,32], index: 8, kind: input, shape index: {}]   ;;  %s6370_s9 = inlined_call_operand.vmem [shape: f32[1,32], index: 9, kind: input, shape index: {}]   ;;  %s6371_s11 = inlined_call_operand.vmem [shape: f32[1,128], index: 11, kind: input, shape index: {}]   ;;  %s6372_s10 = inlined_call_operand.vmem [shape: f32[32,128], index: 10, kind: input, shape index: {}]   ;;  %s6373_s12 = inlined_call_operand.vmem [shape: f32[128,32], index: 12, kind: input, shape index: {}]   ;;  %s6374_s13 = inlined_call_operand.vmem [shape: f32[1,32], index: 13, kind: input, shape index: {}]   ;;  %s6375_s14 = inlined_call_operand.vmem [shape: f32[1,32], index: 14, kind: input, shape index: {}]   ;;  %s6376_s15 = inlined_call_operand.vmem [shape: f32[1,32], index: 15, kind: input, shape index: {}]   ;;  %s6377_s16 = inlined_call_operand.vmem [shape: f32[32,100], index: 16, kind: input, shape index: {}]   ;;  %s6378_s17 = inlined_call_operand.vmem [shape: f32[32,32], index: 17, kind: input, shape index: {}]   ;;  %s6379_s18 = inlined_call_operand.vmem [shape: f32[1,32], index: 18, kind: input, shape index: {}]   ;;  %s6380_s19 = inlined_call_operand.vmem [shape: f32[1,32], index: 19, kind: input, shape index: {}]   ;;  %s6381_s20 = inlined_call_operand.vmem [shape: f32[32,128], index: 20, kind: input, shape index: {}]   ;;  %s6382_s21 = inlined_call_operand.vmem [shape: f32[1,128], index: 21, kind: input, shape index: {}]   ;;  %s6383_s22 = inlined_call_operand.vmem [shape: f32[128,32], index: 22, kind: input, shape index: {}]   ;;  %s6384_s23 = inlined_call_operand.vmem [shape: f32[1,32], index: 23, kind: input, shape index: {}]   ;;  %s6385_s3 = inlined_call_operand.vmem [shape: f32[16,16], index: 3, kind: input, shape index: {}]   ;;  %s6386_s24 = inlined_call_operand.vmem [shape: f32[1,32], index: 24, kind: input, shape index: {}]   ;;  %s6387_s25 = inlined_call_operand.vmem [shape: f32[1,32], index: 25, kind: input, shape index: {}]   ;;  %s6388_s4 = inlined_call_operand.vmem [shape: f32[32,4], index: 4, kind: input, shape index: {}]   ;;  %s6389_s5 = inlined_call_operand.vmem [shape: f32[1,4], index: 5, kind: input, shape index: {}]   ;;  %s6390_s26 = inlined_call_operand.vmem [shape: f32[2,8,16,16], index: 26, kind: output, shape index: {0}]   ;;  %s6391_s28 = inlined_call_operand.vmem [shape: f32[32,4], index: 28, kind: output, shape index: {2}]  }
   0x1   :  { %6408 = sst [smem:[#allocation2_spill]] %s6363_s1  ;;  %vm551_vm4 = vcmask 130048   ;;  %vm1448_vm5 = vcmask 195584  }
   0x2   :  { %6409 = sst [smem:[#allocation3_spill]] %s6364_s0 }
   0x3   :  { %6410 = sst [smem:[#allocation4_spill]] %s6365_s6 }
   0x4   :  { %6411 = sst [smem:[#allocation5_spill]] %s6366_s2  ;;  %s4181_s2 = smov 120  }
   0x5   :  { %6412 = sst [smem:[#allocation6_spill]] %s6367_s27 }
   0x6   :  { %6413 = sst [smem:[#allocation7_spill]] %s6368_s7  ;;  %s6402_s7 = smov 24  }
   0x7   :  { %6414 = sst [smem:[#allocation8_spill]] %s6369_s8  ;;  %s4182_s8 = smov 104  }
   0x8   :  { %6415 = sst [smem:[#allocation9_spill]] %s6370_s9 }
   0x9   :  { %6416 = sst [smem:[#allocation10_spill]] %s6371_s11  ;;  %s6404_s11 = smov 16  }
   0xa   :  { %6417 = sst [smem:[#allocation11_spill]] %s6372_s10 }
   0xb   :  { %6418 = sst [smem:[#allocation12_spill]] %s6373_s12  ;;  %s6400_s12 = smov 64  }
   0xc   :  { %6419 = sst [smem:[#allocation13_spill]] %s6374_s13  ;;  %s6406_s13 = smov 8  }
   0xd   :  { %6420 = sst [smem:[#allocation14_spill]] %s6375_s14 }
   0xe   :  { %s6421_s10 = sld [smem:[#allocation2_spill]] }
   0xf   :  { %s6422_s0 = sld [smem:[#allocation3_spill]] }
  0x10   :  { %s6423_s6 = sld [smem:[#allocation4_spill]] }
  0x11   :  { %s6424_s14 = sld [smem:[#allocation5_spill]] }
  0x12   :  { %s6425_s9 = sld [smem:[#allocation6_spill]] }
  0x13   :  { %s6429_s1 = sld [smem:[#allocation9_spill]] }
  0x14   :  { %v93_v0 = vld [vmem:[%s6421_s10 + $0x8] sm:$0xf]  ;;  %v92_v1 = vld [vmem:[%s6421_s10] sm:$0xff]  ;;  %s4179_s10 = smov 96  }
  0x15   :  { %3551 = vmatpush.msk.msra.mxu0 %vm111_vm0, %v93_v0  ;;  %v88_v2 = vld [vmem:[%s6422_s0] sm:$0xff]  ;;  %v89_v5 = vld [vmem:[%s6422_s0 + $0x8] sm:$0xff]  ;;  %v90_v6 = vld [vmem:[%s6422_s0 + $0x10] sm:$0xff] }
  0x16   :  { %v147_v3 = vld [vmem:[%s6423_s6 + $0x18] sm:$0xff]  ;;  %v146_v4 = vld [vmem:[%s6423_s6 + $0x10] sm:$0xff]  ;;  %v145_v8 = vld [vmem:[%s6423_s6 + $0x8] sm:$0xff] }
  0x17   :  { %130 = vmatpush.msra.mxu0 %v92_v1  ;;  %173 = vmatpush.msra.mxu1 %v147_v3  ;;  %v91_v7 = vld [vmem:[%s6422_s0 + $0x18] sm:$0xff]  ;;  %v144_v9 = vld [vmem:[%s6423_s6] sm:$0xff]  ;;  %v95_v13 = vld [vmem:[%s6424_s14 + $0x8] sm:$0xff]  ;;  %s6426_s0 = sld [smem:[#allocation7_spill]] }
  0x18   :  { %3552 = vmatmul.msk.f32.vlgmr.msra.gmra.mxu0 %vm98_vm1, %v88_v2  ;;  %v94_v10 = vld [vmem:[%s6424_s14] sm:$0xff]  ;;  %v96_v16 = vld [vmem:[%s6424_s14 + $0x10] sm:$0xff]  ;;  %v97_v19 = vld [vmem:[%s6424_s14 + $0x18] sm:$0xff]  ;;  %s6427_s6 = sld [smem:[#allocation11_spill]] }
  0x19   :  { %174 = vmatpush.msra.mxu1 %v146_v4  ;;  %s6430_s14 = sld [smem:[#allocation12_spill]] }
  0x1b   :  { %175 = vmatpush.msra.mxu1 %v145_v8 }
  0x1d   :  { %176 = vmatpush.msra.mxu1 %v144_v9 }
  0x20   :  { %3553 = vmatmul.msk.f32.gmra.mxu0 %vm98_vm1, %v89_v5 }
  0x28   :  { %3554 = vmatmul.msk.f32.gmra.mxu0 %vm98_vm1, %v90_v6 }
  0x30   :  { %3555 = vmatmul.msk.f32.gmra.mxu0 %vm98_vm1, %v91_v7 }
  0x95   :  { %v132_v11 = vpop.f32.mrf.mxu0 }
  0x96   :  { %v4370_v12 = vadd.f32 %v132_v11, %v94_v10 }
  0x98   :  { %3556 = vmatmul.msk.f32.vlgmr.msra.gmra.mxu1 %vm148_vm2, %v4370_v12 }
  0x9d   :  { %v135_v14 = vpop.f32.mrf.mxu0 }
  0x9e   :  { %v4377_v15 = vadd.f32 %v135_v14, %v95_v13 }
  0xa0   :  { %3557 = vmatmul.msk.f32.gmra.mxu1 %vm148_vm2, %v4377_v15 }
  0xa5   :  { %v138_v17 = vpop.f32.mrf.mxu0 }
  0xa6   :  { %v4384_v18 = vadd.f32 %v138_v17, %v96_v16 }
  0xa8   :  { %3558 = vmatmul.msk.f32.gmra.mxu1 %vm148_vm2, %v4384_v18 }
  0xad   :  { %v141_v20 = vpop.f32.mrf.mxu0 }
  0xae   :  { %v4391_v21 = vadd.f32 %v141_v20, %v97_v19 }
  0xb0   :  { %3559 = vmatmul.msk.f32.gmra.mxu1 %vm148_vm2, %v4391_v21 }
 0x115   :  { %v4395_v22 = vpop.f32.mrf.mxu1 }
 0x11d   :  { %v4397_v23 = vpop.f32.mrf.mxu1 }
 0x11e   :  { %256 = vrot.lane.b32.xlu2 %v4397_v23, %s4179_s10  ;;  %204 = vrot.lane.b32.xlu1 %v4397_v23, %s4180_s30  ;;  %v3734_v46 = vpack.i.bf16 %v4395_v22, %v4397_v23 }
 0x11f   :  { %196 = vrot.lane.b32.xlu0 %v4397_v23, %s4181_s2 }
 0x125   :  { %v4405_v24 = vpop.f32.mrf.mxu1 }
 0x126   :  { %212 = vrot.lane.b32.xlu2 %v4397_v23, %s4182_s8  ;;  %202 = vrot.lane.b32.xlu1 %v4395_v22, %s4180_s30 }
 0x127   :  { %194 = vrot.lane.b32.xlu0 %v4395_v22, %s4181_s2 }
 0x12d   :  { %v4413_v25 = vpop.f32.mrf.mxu1 }
 0x12e   :  { %210 = vrot.lane.b32.xlu1 %v4395_v22, %s4182_s8  ;;  %200 = vrot.lane.b32.xlu2 %v4413_v25, %s4181_s2 }
 0x12f   :  { %254 = vrot.lane.b32.xlu0 %v4395_v22, %s4179_s10 }
 0x136   :  { %198 = vrot.lane.b32.xlu1 %v4405_v24, %s4181_s2 }
 0x178   :  { %v257_v26 = vpop.permute.xlu2 %256 }
 0x179   :  { %3560 = vmatpush.xpose.msk.msra.mxu2 %vm258_vm3, %v257_v26 }
 0x180   :  { %v4437_v30 = vpop.permute.xlu2 %212 }
 0x188   :  { %v4450_v33 = vpop.permute.xlu2 %200 }
 0x190   :  { %v4424_v27 = vpop.permute.xlu1 %204 }
 0x191   :  { %v4426_v28 = vpop.permute.xlu0 %196  ;;  %397 = vrot.lane.b32.xlu1 %v4424_v27, %s4179_s10 }
 0x192   :  { %327 = vrot.lane.b32.xlu0 %v4426_v28, %s4179_s10 }
 0x198   :  { %v4439_v31 = vpop.permute.xlu1 %202 }
 0x199   :  { %v195_v29 = vpop.permute.xlu0 %194  ;;  %208 = vrot.lane.b32.xlu1 %v4413_v25, %s4180_s30  ;;  %v3744_v53 = vpack.i.bf16 %v4439_v31, %v4424_v27 }
 0x19a   :  { %216 = vrot.lane.b32.xlu0 %v4413_v25, %s4182_s8  ;;  %325 = vrot.lane.b32.xlu2 %v195_v29, %s4179_s10  ;;  %v3729_v49 = vpack.i.bf16 %v195_v29, %v4426_v28 }
 0x1a0   :  { %v211_v34 = vpop.permute.xlu1 %210 }
 0x1a1   :  { %v255_v32 = vpop.permute.xlu0 %254  ;;  %292 = vrot.lane.b32.xlu1 %v4413_v25, %s4179_s10  ;;  %v3739_v40 = vpack.i.bf16 %v211_v34, %v4437_v30 }
 0x1a2   :  { %3561 = vmatpush.xpose.msk.msra.mxu2 %vm258_vm3, %v255_v32  ;;  %395 = vrot.lane.b32.xlu0 %v4439_v31, %s4179_s10 }
 0x1a3   :  { %214 = vrot.lane.b32.xlu2 %v4405_v24, %s4182_s8 }
 0x1a5   :  { %3562 = vmatmul.msk.f32.vlgmr.msra.gmra.mxu2 %vm258_vm3, %v4395_v22 }
 0x1a8   :  { %v199_v35 = vpop.permute.xlu1 %198 }
 0x1a9   :  { %362 = vrot.lane.b32.xlu1 %v4450_v33, %s4179_s10  ;;  %v3749_v54 = vpack.i.bf16 %v199_v35, %v4450_v33 }
 0x1aa   :  { %206 = vrot.lane.b32.xlu0 %v4405_v24, %s4180_s30 }
 0x1ab   :  { %467 = vrot.lane.b32.xlu2 %v4437_v30, %s4179_s10 }
 0x1ad   :  { %3563 = vmatmul.msk.f32.gmra.mxu2 %vm258_vm3, %v4397_v23 }
 0x1b2   :  { %290 = vrot.lane.b32.xlu0 %v4405_v24, %s4179_s10 }
 0x1b3   :  { %465 = vrot.lane.b32.xlu2 %v211_v34, %s4179_s10 }
 0x1bb   :  { %360 = vrot.lane.b32.xlu2 %v199_v35, %s4179_s10 }
 0x1f4   :  { %v326_v36 = vpop.permute.xlu2 %325 }
 0x1fd   :  { %v4464_v37 = vpop.permute.xlu2 %214 }
 0x1fe   :  { %500 = vrot.lane.b32.xlu1 %v4464_v37, %s4179_s10 }
 0x203   :  { %v398_v38 = vpop.permute.xlu1 %397 }
 0x204   :  { %v328_v39 = vpop.permute.xlu0 %327  ;;  %3576 = vmatpush.xpose.msk.msrb.mxu0 %vm258_vm3, %v398_v38 }
 0x205   :  { %3568 = vmatpush.xpose.msk.msrb.mxu2 %vm258_vm3, %v328_v39  ;;  %v468_v43 = vpop.permute.xlu2 %467 }
 0x206   :  { %3740 = vrot.lane.b32.xlu1 %v3739_v40, %s6400_s12 }
 0x209   :  { %3569 = vmatpush.xpose.msk.msrb.mxu2 %vm258_vm3, %v326_v36 }
 0x20b   :  { %v4474_v41 = vpop.permute.xlu1 %208 }
 0x20c   :  { %v4476_v42 = vpop.permute.xlu0 %216  ;;  %3570 = vmatmul.msk.f32.vlgmr.msrb.gmra.mxu2 %vm258_vm3, %v195_v29  ;;  %432 = vrot.lane.b32.xlu2 %v4474_v41, %s4179_s10 }
 0x20d   :  { %3714 = vmatpush.xpose.msk.msra.mxu2 %vm258_vm3, %v398_v38  ;;  %502 = vrot.lane.b32.xlu0 %v4476_v42, %s4179_s10  ;;  %v466_v47 = vpop.permute.xlu2 %465 }
 0x213   :  { %v293_v44 = vpop.permute.xlu1 %292 }
 0x214   :  { %v396_v45 = vpop.permute.xlu0 %395  ;;  %3571 = vmatmul.msk.f32.gmra.mxu2 %vm258_vm3, %v4426_v28  ;;  %3564 = vmatpush.xpose.msk.msrb.mxu1 %vm258_vm3, %v293_v44 }
 0x215   :  { %3712 = vmatpush.xpose.msk.msra.mxu3 %vm258_vm3, %v293_v44  ;;  %3577 = vmatpush.xpose.msk.msrb.mxu0 %vm258_vm3, %v396_v45  ;;  %v361_v52 = vpop.permute.xlu2 %360 }
 0x216   :  { %3735 = vrot.lane.b32.xlu2 %v3734_v46, %s6400_s12  ;;  %3715 = vmatpush.xpose.msk.msra.mxu2 %vm258_vm3, %v396_v45 }
 0x218   :  { %3578 = vmatmul.msk.f32.vlgmr.msrb.gmra.mxu0 %vm258_vm3, %v4439_v31 }
 0x21a   :  { %3584 = vmatpush.xpose.msk.msrb.mxu2 %vm258_vm3, %v468_v43 }
 0x21b   :  { %v363_v51 = vpop.permute.xlu1 %362 }
 0x21c   :  { %v4496_v48 = vpop.permute.xlu0 %206  ;;  %3579 = vmatmul.msk.f32.vlgmr.msra.gmra.mxu2 %vm258_vm3, %v4424_v27 }
 0x21d   :  { %430 = vrot.lane.b32.xlu0 %v4496_v48, %s4179_s10 }
 0x21e   :  { %3585 = vmatpush.xpose.msk.msrb.mxu2 %vm258_vm3, %v466_v47 }
 0x224   :  { %v291_v50 = vpop.permute.xlu0 %290  ;;  %3586 = vmatmul.msk.f32.vlgmr.msrb.gmra.mxu2 %vm258_vm3, %v211_v34 }
 0x225   :  { %3730 = vrot.lane.b32.xlu0 %v3729_v49, %s6400_s12  ;;  %3565 = vmatpush.xpose.msk.msrb.mxu1 %vm258_vm3, %v291_v50 }
 0x226   :  { %3713 = vmatpush.xpose.msk.msra.mxu3 %vm258_vm3, %v291_v50 }
 0x228   :  { %3566 = vmatmul.msk.f32.vlgmr.msrb.gmra.mxu1 %vm258_vm3, %v4405_v24  ;;  %v284_v55 = vpop.f32.mrf.mxu2 }
 0x229   :  { %3567 = vmatmul.msk.f32.vlgmr.msra.gmra.mxu3 %vm258_vm3, %v4413_v25  ;;  %v4523_v56 = vmul.f32 0.35355338, %v284_v55 }
 0x22a   :  { %3572 = vmatpush.xpose.msk.msrb.mxu3 %vm258_vm3, %v363_v51 }
 0x22b   :  { %v552_v57 = vsel %vm551_vm4, %v4523_v56, -inf }
 0x22c   :  { %3587 = vmatmul.msk.f32.gmra.mxu2 %vm258_vm3, %v4437_v30 }
 0x22d   :  { %3745 = vrot.lane.b32.xlu0 %v3744_v53, %s6400_s12 }
 0x22e   :  { %3573 = vmatpush.xpose.msk.msrb.mxu3 %vm258_vm3, %v361_v52 }
 0x230   :  { %v287_v58 = vpop.f32.mrf.mxu2 }
 0x231   :  { %3574 = vmatmul.msk.f32.vlgmr.msrb.gmra.mxu3 %vm258_vm3, %v199_v35  ;;  %v4527_v59 = vmul.f32 0.35355338, %v287_v58 }
 0x233   :  { %v555_v60 = vsel %vm551_vm4, %v4527_v59, -inf }
 0x235   :  { %3750 = vrot.lane.b32.xlu0 %v3749_v54, %s6400_s12 }
 0x239   :  { %3575 = vmatmul.msk.f32.gmra.mxu3 %vm258_vm3, %v4450_v33 }
 0x23f   :  { %553 = vmax.xlane.f32.xlu2 %v552_v57 }
 0x247   :  { %556 = vmax.xlane.f32.xlu2 %v555_v60 }
 0x266   :  { %v433_v61 = vpop.permute.xlu2 %432 }
 0x267   :  { %3580 = vmatpush.xpose.msk.msra.mxu1 %vm258_vm3, %v433_v61 }
 0x270   :  { %v3736_v62 = vpop.permute.xlu2 %3735  ;;  %v501_v2 = vpop.permute.xlu1 %500 }
 0x271   :  { %v3737_v63 = vunpack.i.l.bf16 %v3736_v62  ;;  %v3738_v0 = vunpack.i.h.bf16 %v3736_v62 }
 0x273   :  { %1138 = vmatpush.msra.mxu0 %v3737_v63 }
 0x275   :  { %1139 = vmatpush.msra.mxu0 %v3738_v0 }
 0x278   :  { %v3741_v9 = vpop.permute.xlu1 %3740 }
 0x279   :  { %v3742_v13 = vunpack.i.l.bf16 %v3741_v9  ;;  %v3743_v14 = vunpack.i.h.bf16 %v3741_v9 }
 0x27f   :  { %v503_v1 = vpop.permute.xlu0 %502 }
 0x280   :  { %3588 = vmatpush.xpose.msk.msra.mxu3 %vm258_vm3, %v503_v1 }
 0x284   :  { %3589 = vmatpush.xpose.msk.msra.mxu3 %vm258_vm3, %v501_v2 }
 0x287   :  { %3590 = vmatmul.msk.f32.vlgmr.msra.gmra.mxu3 %vm258_vm3, %v4464_v37 }
 0x28f   :  { %v431_v3 = vpop.permute.xlu0 %430  ;;  %v354_v4 = vpop.f32.mrf.mxu2  ;;  %3591 = vmatmul.msk.f32.gmra.mxu3 %vm258_vm3, %v4476_v42 }
 0x290   :  { %v4538_v5 = vmul.f32 0.35355338, %v354_v4  ;;  %3581 = vmatpush.xpose.msk.msra.mxu1 %vm258_vm3, %v431_v3 }
 0x292   :  { %v564_v6 = vsel %vm551_vm4, %v4538_v5, -inf }
 0x293   :  { %565 = vmax.xlane.f32.xlu1 %v564_v6  ;;  %3582 = vmatmul.msk.f32.vlgmr.msra.gmra.mxu1 %vm258_vm3, %v4496_v48 }
 0x295   :  { %v424_v38 = vpop.f32.mrf.mxu0 }
 0x296   :  { %v543_v44 = vmul.f32 0.35355338, %v424_v38 }
 0x297   :  { %v3731_v7 = vpop.permute.xlu0 %3730  ;;  %v357_v8 = vpop.f32.mrf.mxu2 }
 0x298   :  { %v3732_v10 = vunpack.i.l.bf16 %v3731_v7  ;;  %v3733_v11 = vunpack.i.h.bf16 %v3731_v7  ;;  %v4550_v33 = vmul.f32 0.35355338, %v357_v8  ;;  %v576_v49 = vsel %vm551_vm4, %v543_v44, -inf }
 0x29a   :  { %1208 = vmatpush.msra.mxu2 %v3732_v10  ;;  %v567_v39 = vsel %vm551_vm4, %v4550_v33, -inf }
 0x29b   :  { %3583 = vmatmul.msk.f32.gmra.mxu1 %vm258_vm3, %v4474_v41 }
 0x29c   :  { %1209 = vmatpush.msra.mxu2 %v3733_v11 }
 0x29e   :  { %1348 = vmatpush.msrb.mxu2 %v3742_v13 }
 0x29f   :  { %v3746_v16 = vpop.permute.xlu0 %3745  ;;  %v427_v17 = vpop.f32.mrf.mxu2 }
 0x2a0   :  { %1349 = vmatpush.msrb.mxu2 %v3743_v14  ;;  %v3747_v19 = vunpack.i.l.bf16 %v3746_v16  ;;  %v3748_v20 = vunpack.i.h.bf16 %v3746_v16  ;;  %v4568_v53 = vmul.f32 0.35355338, %v427_v17 }
 0x2a2   :  { %1278 = vmatpush.msrb.mxu0 %v3747_v19  ;;  %v579_v54 = vsel %vm551_vm4, %v4568_v53, -inf }
 0x2a4   :  { %1279 = vmatpush.msrb.mxu0 %v3748_v20 }
 0x2a5   :  { %v319_v26 = vpop.f32.mrf.mxu1 }
 0x2a6   :  { %v537_v27 = vmul.f32 0.35355338, %v319_v26 }
 0x2a7   :  { %v3751_v28 = vpop.permute.xlu0 %3750  ;;  %v4547_v29 = vpop.f32.mrf.mxu2 }
 0x2a8   :  { %v3752_v30 = vunpack.i.l.bf16 %v3751_v28  ;;  %v558_v31 = vsel %vm551_vm4, %v537_v27, -inf  ;;  %v3753_v32 = vunpack.i.h.bf16 %v3751_v28 }
 0x2a9   :  { %559 = vmax.xlane.f32.xlu0 %v558_v31 }
 0x2aa   :  { %1243 = vmatpush.msrb.mxu3 %v3752_v30 }
 0x2ac   :  { %v322_v34 = vpop.f32.mrf.mxu3  ;;  %1244 = vmatpush.msrb.mxu3 %v3753_v32  ;;  %v4601_v32 = vmul.f32 0.35355338, %v4547_v29 }
 0x2ad   :  { %v4552_v35 = vmul.f32 0.35355338, %v322_v34 }
 0x2af   :  { %v561_v36 = vsel %vm551_vm4, %v4552_v35, -inf  ;;  %v497_v40 = vpop.f32.mrf.mxu2 }
 0x2b0   :  { %562 = vmax.xlane.f32.xlu2 %v561_v36  ;;  %v4559_v46 = vmul.f32 0.35355338, %v497_v40  ;;  %v588_v40 = vsel %vm551_vm4, %v4601_v32, -inf }
 0x2b1   :  { %568 = vmax.xlane.f32.xlu0 %v567_v39 }
 0x2b2   :  { %v554_v43 = vpop.xlane.xlu2 %553  ;;  %v591_v50 = vsel %vm551_vm4, %v4559_v46, -inf }
 0x2b3   :  { %v600_v45 = vsub.f32 %v4523_v56, %v554_v43 }
 0x2b4   :  { %v389_v55 = vpop.f32.mrf.mxu3 }
 0x2b5   :  { %v616_v47 = vmul.f32 1.442695, %v600_v45  ;;  %v4580_v0 = vmul.f32 0.35355338, %v389_v55 }
 0x2b7   :  { %3825 = vpow2.f32 %v616_v47  ;;  %v570_v3 = vsel %vm551_vm4, %v4580_v0, -inf }
 0x2b8   :  { %577 = vmax.xlane.f32.xlu2 %v576_v49 }
 0x2b9   :  { %592 = vmax.xlane.f32.xlu0 %v591_v50 }
 0x2ba   :  { %v557_v1 = vpop.xlane.xlu2 %556 }
 0x2bb   :  { %v601_v2 = vsub.f32 %v4527_v59, %v557_v1 }
 0x2bc   :  { %v392_v56 = vpop.f32.mrf.mxu3 }
 0x2bd   :  { %v4564_v51 = vpop.eup %3825  ;;  %v618_v8 = vmul.f32 1.442695, %v601_v2  ;;  %v4610_v29 = vmul.f32 0.35355338, %v392_v56  ;;  %v3754_v2 = vpack.i.bf16 %v4405_v24, %v4413_v25 }
 0x2be   :  { %v648_v52 = vsel %vm551_vm4, %v4564_v51, 0.0 }
 0x2c0   :  { %649 = vadd.xlane.f32.xlu2 %v648_v52  ;;  %v573_v52 = vsel %vm551_vm4, %v4610_v29, -inf }
 0x2c8   :  { %580 = vmax.xlane.f32.xlu2 %v579_v54 }
 0x306   :  { %v566_v19 = vpop.xlane.xlu1 %565 }
 0x307   :  { %v604_v30 = vsub.f32 %v4538_v5, %v566_v19 }
 0x309   :  { %v624_v36 = vmul.f32 1.442695, %v604_v30 }
 0x30a   :  { %v529_v57 = vpop.f32.mrf.mxu3 }
 0x30b   :  { %v4572_v58 = vmul.f32 0.35355338, %v529_v57 }
 0x30d   :  { %v594_v60 = vsel %vm551_vm4, %v4572_v58, -inf }
 0x30e   :  { %595 = vmax.xlane.f32.xlu0 %v594_v60 }
 0x310   :  { %v459_v61 = vpop.f32.mrf.mxu1 }
 0x311   :  { %v4576_v62 = vmul.f32 0.35355338, %v459_v61 }
 0x312   :  { %v532_v17 = vpop.f32.mrf.mxu3 }
 0x313   :  { %v582_v63 = vsel %vm551_vm4, %v4576_v62, -inf }
 0x314   :  { %583 = vmax.xlane.f32.xlu1 %v582_v63 }
 0x318   :  { %v462_v4 = vpop.f32.mrf.mxu1 }
 0x319   :  { %v4585_v9 = vmul.f32 0.35355338, %v462_v4 }
 0x31b   :  { %v585_v13 = vsel %vm551_vm4, %v4585_v9, -inf }
 0x31c   :  { %v560_v6 = vpop.xlane.xlu0 %559  ;;  %571 = vmax.xlane.f32.xlu1 %v570_v3 }
 0x31d   :  { %v602_v7 = vsub.f32 %v537_v27, %v560_v6  ;;  %v4597_v27 = vmul.f32 0.35355338, %v532_v17 }
 0x31f   :  { %v620_v10 = vmul.f32 1.442695, %v602_v7  ;;  %v597_v34 = vsel %vm551_vm4, %v4597_v27, -inf }
 0x321   :  { %3827 = vpow2.f32 %v620_v10 }
 0x322   :  { %3829 = vpow2.f32 %v618_v8 }
 0x323   :  { %v563_v11 = vpop.xlane.xlu2 %562 }
 0x324   :  { %586 = vmax.xlane.f32.xlu1 %v585_v13  ;;  %v603_v38 = vsub.f32 %v4552_v35, %v563_v11 }
 0x326   :  { %v622_v5 = vmul.f32 1.442695, %v603_v38 }
 0x327   :  { %v4589_v14 = vpop.eup %3827 }
 0x328   :  { %v4591_v59 = vpop.eup %3829  ;;  %v654_v16 = vsel %vm551_vm4, %v4589_v14, 0.0 }
 0x329   :  { %655 = vadd.xlane.f32.xlu2 %v654_v16  ;;  %v651_v26 = vsel %vm551_vm4, %v4591_v59, 0.0 }
 0x32b   :  { %v578_v20 = vpop.xlane.xlu2 %577 }
 0x32c   :  { %v608_v28 = vsub.f32 %v543_v44, %v578_v20  ;;  %652 = vadd.xlane.f32.xlu1 %v651_v26  ;;  %v569_v44 = vpop.xlane.xlu0 %568 }
 0x32d   :  { %v605_v35 = vsub.f32 %v4550_v33, %v569_v44 }
 0x32e   :  { %v632_v31 = vmul.f32 1.442695, %v608_v28 }
 0x32f   :  { %v626_v56 = vmul.f32 1.442695, %v605_v35 }
 0x330   :  { %3831 = vpow2.f32 %v632_v31 }
 0x331   :  { %598 = vmax.xlane.f32.xlu2 %v597_v34 }
 0x333   :  { %v650_v39 = vpop.xlane.xlu2 %649 }
 0x334   :  { %3833 = vrcp.f32 %v650_v39  ;;  %589 = vmax.xlane.f32.xlu1 %v588_v40  ;;  %v593_v19 = vpop.xlane.xlu0 %592 }
 0x335   :  { %3835 = vpow2.f32 %v624_v36 }
 0x336   :  { %v4608_v43 = vpop.eup %3831  ;;  %3837 = vpow2.f32 %v622_v5 }
 0x337   :  { %v672_v45 = vsel %vm551_vm4, %v4608_v43, 0.0 }
 0x338   :  { %673 = vadd.xlane.f32.xlu0 %v672_v45 }
 0x33a   :  { %v3834_v47 = vpop.eup %3833 }
 0x33b   :  { %v712_v49 = vmul.f32 %v3834_v47, %v4564_v51  ;;  %v581_v50 = vpop.xlane.xlu2 %580  ;;  %v4618_v54 = vpop.eup %3835 }
 0x33c   :  { %v609_v55 = vsub.f32 %v4568_v53, %v581_v50  ;;  %574 = vmax.xlane.f32.xlu1 %v573_v52  ;;  %v660_v51 = vsel %vm551_vm4, %v4618_v54, 0.0  ;;  %v4628_v57 = vpop.eup %3837 }
 0x33d   :  { %1096 = vst.msk [vmem:[%s6425_s9] sm:$0xff] %vm551_vm4, %v712_v49  ;;  %3592 = vmatmul.msk.f32.vlgmr.msra.gmra.mxu0 %vm551_vm4, %v712_v49  ;;  %v657_v53 = vsel %vm551_vm4, %v4628_v57, 0.0 }
 0x33e   :  { %v634_v33 = vmul.f32 1.442695, %v609_v55 }
 0x340   :  { %3839 = vpow2.f32 %v634_v33  ;;  %661 = vadd.xlane.f32.xlu0 %v660_v51 }
 0x341   :  { %3841 = vpow2.f32 %v626_v56 }
 0x344   :  { %658 = vadd.xlane.f32.xlu1 %v657_v53 }
 0x346   :  { %v4632_v60 = vpop.eup %3839 }
 0x347   :  { %v675_v61 = vsel %vm551_vm4, %v4632_v60, 0.0  ;;  %v4636_v63 = vpop.eup %3841 }
 0x348   :  { %676 = vadd.xlane.f32.xlu2 %v675_v61  ;;  %v663_v1 = vsel %vm551_vm4, %v4636_v63, 0.0 }
 0x34c   :  { %664 = vadd.xlane.f32.xlu1 %v663_v1 }
 0x354   :  { %3755 = vrot.lane.b32.xlu0 %v3754_v2, %s6400_s12 }
 0x381   :  { %v596_v28 = vpop.xlane.xlu0 %595 }
 0x382   :  { %v614_v55 = vsub.f32 %v4572_v58, %v596_v28 }
 0x384   :  { %v644_v61 = vmul.f32 1.442695, %v614_v55 }
 0x387   :  { %v584_v3 = vpop.xlane.xlu1 %583 }
 0x388   :  { %v610_v4 = vsub.f32 %v4576_v62, %v584_v3 }
 0x38a   :  { %v636_v6 = vmul.f32 1.442695, %v610_v4 }
 0x38c   :  { %3843 = vpow2.f32 %v636_v6 }
 0x38f   :  { %v572_v7 = vpop.xlane.xlu1 %571 }
 0x390   :  { %v606_v8 = vsub.f32 %v4580_v0, %v572_v7 }
 0x392   :  { %v4645_v10 = vpop.eup %3843  ;;  %v628_v11 = vmul.f32 1.442695, %v606_v8 }
 0x393   :  { %v678_v13 = vsel %vm551_vm4, %v4645_v10, 0.0 }
 0x394   :  { %3845 = vpow2.f32 %v628_v11  ;;  %679 = vadd.xlane.f32.xlu0 %v678_v13 }
 0x397   :  { %v4649_v16 = vpop.xlane.xlu1 %586 }
 0x39a   :  { %v4651_v17 = vpop.eup %3845 }
 0x39b   :  { %v666_v62 = vsel %vm551_vm4, %v4651_v17, 0.0 }
 0x39c   :  { %667 = vadd.xlane.f32.xlu1 %v666_v62  ;;  %v656_v20 = vpop.xlane.xlu2 %655  ;;  %v3759_v62 = vpack.i.bf16 %v4464_v37, %v4476_v42  ;;  %v3764_v37 = vpack.i.bf16 %v4496_v48, %v4474_v41 }
 0x39d   :  { %3847 = vrcp.f32 %v656_v20 }
 0x39f   :  { %v653_v0 = vpop.xlane.xlu1 %652 }
 0x3a0   :  { %3849 = vrcp.f32 %v653_v0  ;;  %v611_v0 = vsub.f32 %v4585_v9, %v4649_v16 }
 0x3a3   :  { %v3848_v26 = vpop.eup %3847 }
 0x3a4   :  { %v4656_v30 = vmul.f32 %v3848_v26, %v4589_v14  ;;  %v599_v47 = vpop.xlane.xlu2 %598  ;;  %v638_v26 = vmul.f32 1.442695, %v611_v0 }
 0x3a5   :  { %v615_v3 = vsub.f32 %v4597_v27, %v599_v47 }
 0x3a6   :  { %v3850_v31 = vpop.eup %3849  ;;  %1098 = vst.msk [vmem:[%s6425_s9 + $0x10] sm:$0xff] %vm551_vm4, %v4656_v30 }
 0x3a7   :  { %v590_v34 = vpop.xlane.xlu1 %589  ;;  %v713_v36 = vmul.f32 %v3850_v31, %v4591_v59  ;;  %v613_v59 = vsub.f32 %v4559_v46, %v593_v19  ;;  %v646_v7 = vmul.f32 1.442695, %v615_v3 }
 0x3a8   :  { %v612_v38 = vsub.f32 %v4601_v32, %v590_v34 }
 0x3a9   :  { %1097 = vst.msk [vmem:[%s6425_s9 + $0x8] sm:$0xff] %vm551_vm4, %v713_v36  ;;  %3593 = vmatmul.msk.f32.gmra.mxu0 %vm551_vm4, %v713_v36  ;;  %v642_v52 = vmul.f32 1.442695, %v613_v59 }
 0x3aa   :  { %v640_v14 = vmul.f32 1.442695, %v612_v38 }
 0x3ab   :  { %v674_v39 = vpop.xlane.xlu0 %673 }
 0x3ac   :  { %3851 = vpow2.f32 %v640_v14 }
 0x3ad   :  { %3853 = vrcp.f32 %v674_v39 }
 0x3af   :  { %v575_v40 = vpop.xlane.xlu1 %574 }
 0x3b0   :  { %v607_v5 = vsub.f32 %v4610_v29, %v575_v40 }
 0x3b2   :  { %v4671_v44 = vpop.eup %3851  ;;  %v630_v45 = vmul.f32 1.442695, %v607_v5 }
 0x3b3   :  { %v3854_v32 = vpop.eup %3853  ;;  %v662_v35 = vpop.xlane.xlu0 %661  ;;  %v684_v49 = vsel %vm551_vm4, %v4671_v44, 0.0 }
 0x3b4   :  { %v720_v50 = vmul.f32 %v3854_v32, %v4608_v43  ;;  %3855 = vpow2.f32 %v630_v45  ;;  %685 = vadd.xlane.f32.xlu1 %v684_v49 }
 0x3b5   :  { %3857 = vrcp.f32 %v662_v35 }
 0x3b6   :  { %1104 = vst.msk [vmem:[%s6425_s9 + $0x40] sm:$0xff] %vm551_vm4, %v720_v50  ;;  %3600 = vmatmul.msk.f32.vlgmr.msrb.gmra.mxu0 %vm551_vm4, %v720_v50 }
 0x3b7   :  { %v659_v46 = vpop.xlane.xlu1 %658 }
 0x3b8   :  { %3859 = vrcp.f32 %v659_v46 }
 0x3b9   :  { %3861 = vpow2.f32 %v642_v52 }
 0x3ba   :  { %v4682_v29 = vpop.eup %3855  ;;  %v4749_v9 = vpop.f32.mrf.mxu0 }
 0x3bb   :  { %v3858_v56 = vpop.eup %3857  ;;  %v677_v43 = vpop.xlane.xlu2 %676  ;;  %v669_v33 = vsel %vm551_vm4, %v4682_v29, 0.0 }
 0x3bc   :  { %v716_v51 = vmul.f32 %v3858_v56, %v4618_v54  ;;  %3863 = vrcp.f32 %v677_v43  ;;  %670 = vadd.xlane.f32.xlu2 %v669_v33 }
 0x3be   :  { %v3860_v53 = vpop.eup %3859  ;;  %1100 = vst.msk [vmem:[%s6425_s9 + $0x20] sm:$0xff] %vm551_vm4, %v716_v51  ;;  %3596 = vmatmul.msk.f32.vlgmr.msra.gmra.mxu2 %vm551_vm4, %v716_v51 }
 0x3bf   :  { %v665_v1 = vpop.xlane.xlu1 %664  ;;  %v715_v58 = vmul.f32 %v3860_v53, %v4628_v57  ;;  %v4694_v2 = vpop.eup %3861 }
 0x3c0   :  { %3865 = vrcp.f32 %v665_v1  ;;  %v687_v4 = vsel %vm551_vm4, %v4694_v2, 0.0 }
 0x3c1   :  { %1099 = vst.msk [vmem:[%s6425_s9 + $0x18] sm:$0xff] %vm551_vm4, %v715_v58  ;;  %3867 = vpow2.f32 %v644_v61 }
 0x3c2   :  { %v3864_v54 = vpop.eup %3863  ;;  %3869 = vpow2.f32 %v646_v7 }
 0x3c3   :  { %v721_v6 = vmul.f32 %v3864_v54, %v4632_v60  ;;  %3871 = vpow2.f32 %v638_v26 }
 0x3c4   :  { %688 = vadd.xlane.f32.xlu2 %v687_v4 }
 0x3c5   :  { %1105 = vst.msk [vmem:[%s6425_s9 + $0x48] sm:$0xff] %vm551_vm4, %v721_v6  ;;  %3601 = vmatmul.msk.f32.gmra.mxu0 %vm551_vm4, %v721_v6 }
 0x3c6   :  { %v3866_v57 = vpop.eup %3865  ;;  %v3756_v8 = vpop.permute.xlu0 %3755 }
 0x3c7   :  { %v3757_v11 = vunpack.i.l.bf16 %v3756_v8  ;;  %v717_v13 = vmul.f32 %v3866_v57, %v4636_v63  ;;  %v4710_v27 = vpop.eup %3867  ;;  %v3758_v19 = vunpack.i.h.bf16 %v3756_v8 }
 0x3c8   :  { %v690_v60 = vsel %vm551_vm4, %v4710_v27, 0.0  ;;  %v4724_v63 = vpop.eup %3869 }
 0x3c9   :  { %1173 = vmatpush.msrb.mxu1 %v3757_v11  ;;  %1101 = vst.msk [vmem:[%s6425_s9 + $0x28] sm:$0xff] %vm551_vm4, %v717_v13  ;;  %3597 = vmatmul.msk.f32.gmra.mxu2 %vm551_vm4, %v717_v13  ;;  %v693_v20 = vsel %vm551_vm4, %v4724_v63, 0.0  ;;  %v4734_v42 = vpop.eup %3871  ;;  %v1456_v13 = vld [vmem:[%s6426_s0 + $0x18] sm:$0xff] }
 0x3ca   :  { %v681_v28 = vsel %vm551_vm4, %v4734_v42, 0.0  ;;  %1481 = vmatpush.msra.mxu0 %v1456_v13 }
 0x3cb   :  { %1174 = vmatpush.msrb.mxu1 %v3758_v19  ;;  %v1454_v19 = vld [vmem:[%s6426_s0 + $0x8] sm:$0xff] }
 0x3cc   :  { %3594 = vmatmul.msk.f32.vlgmr.msrb.gmra.mxu1 %vm551_vm4, %v4656_v30  ;;  %691 = vadd.xlane.f32.xlu2 %v690_v60 }
 0x3cd   :  { %3760 = vrot.lane.b32.xlu1 %v3759_v62, %s6400_s12  ;;  %v1453_v62 = vld [vmem:[%s6426_s0] sm:$0xff] }
 0x3d4   :  { %3595 = vmatmul.msk.f32.gmra.mxu1 %vm551_vm4, %v715_v58  ;;  %694 = vadd.xlane.f32.xlu2 %v693_v20 }
 0x3ec   :  { %3765 = vrot.lane.b32.xlu2 %v3764_v37, %s6400_s12  ;;  %s6428_s12 = sld [smem:[#allocation8_spill]] }
 0x3f7   :  { %682 = vadd.xlane.f32.xlu1 %v681_v28 }
 0x407   :  { %v680_v30 = vpop.xlane.xlu0 %679 }
 0x408   :  { %3873 = vrcp.f32 %v680_v30 }
 0x40e   :  { %v3874_v31 = vpop.eup %3873 }
 0x40f   :  { %v722_v34 = vmul.f32 %v3874_v31, %v4645_v10  ;;  %v668_v36 = vpop.xlane.xlu1 %667 }
 0x410   :  { %3875 = vrcp.f32 %v668_v36 }
 0x411   :  { %1106 = vst.msk [vmem:[%s6425_s9 + $0x50] sm:$0xff] %vm551_vm4, %v722_v34 }
 0x416   :  { %v3876_v41 = vpop.eup %3875 }
 0x417   :  { %v718_v48 = vmul.f32 %v3876_v41, %v4651_v17 }
 0x419   :  { %1102 = vst.msk [vmem:[%s6425_s9 + $0x30] sm:$0xff] %vm551_vm4, %v718_v48  ;;  %3598 = vmatmul.msk.f32.vlgmr.msrb.gmra.mxu3 %vm551_vm4, %v718_v48 }
 0x426   :  { %v4751_v16 = vpop.f32.mrf.mxu0 }
 0x427   :  { %v686_v10 = vpop.xlane.xlu1 %685 }
 0x428   :  { %3877 = vrcp.f32 %v686_v10 }
 0x42e   :  { %v3878_v38 = vpop.eup %3877 }
 0x42f   :  { %v724_v14 = vmul.f32 %v3878_v38, %v4671_v44  ;;  %v671_v39 = vpop.xlane.xlu2 %670 }
 0x430   :  { %3879 = vrcp.f32 %v671_v39 }
 0x431   :  { %1108 = vst.msk [vmem:[%s6425_s9 + $0x60] sm:$0xff] %vm551_vm4, %v724_v14  ;;  %3604 = vmatmul.msk.f32.vlgmr.msrb.gmra.mxu2 %vm551_vm4, %v724_v14 }
 0x433   :  { %v1281_v17 = vpop.f32.mrf.mxu0 }
 0x434   :  { %1412 = vrot.lane.b32.xlu0 %v1281_v17, %s6404_s11 }
 0x436   :  { %v3880_v40 = vpop.eup %3879 }
 0x437   :  { %v689_v5 = vpop.xlane.xlu2 %688  ;;  %v719_v59 = vmul.f32 %v3880_v40, %v4682_v29 }
 0x438   :  { %3881 = vrcp.f32 %v689_v5 }
 0x439   :  { %1103 = vst.msk [vmem:[%s6425_s9 + $0x38] sm:$0xff] %vm551_vm4, %v719_v59  ;;  %3599 = vmatmul.msk.f32.gmra.mxu3 %vm551_vm4, %v719_v59 }
 0x43e   :  { %v3882_v44 = vpop.eup %3881 }
 0x43f   :  { %v3761_v45 = vpop.permute.xlu1 %3760  ;;  %v692_v32 = vpop.xlane.xlu2 %691  ;;  %v725_v47 = vmul.f32 %v3882_v44, %v4694_v2 }
 0x440   :  { %v3762_v35 = vunpack.i.l.bf16 %v3761_v45  ;;  %3883 = vrcp.f32 %v692_v32  ;;  %v3763_v50 = vunpack.i.h.bf16 %v3761_v45 }
 0x441   :  { %v1211_v49 = vpop.f32.mrf.mxu2  ;;  %1109 = vst.msk [vmem:[%s6425_s9 + $0x68] sm:$0xff] %vm551_vm4, %v725_v47  ;;  %3605 = vmatmul.msk.f32.gmra.mxu2 %vm551_vm4, %v725_v47 }
 0x442   :  { %1396 = vrot.lane.b32.xlu2 %v1211_v49, %s6406_s13  ;;  %v1284_v52 = vpop.f32.mrf.mxu0  ;;  %1383 = vmatpush.msra.mxu3 %v3762_v35 }
 0x443   :  { %1414 = vrot.lane.b32.xlu0 %v1284_v52, %s6404_s11 }
 0x444   :  { %1384 = vmatpush.msra.mxu3 %v3763_v50 }
 0x446   :  { %v3884_v46 = vpop.eup %3883 }
 0x447   :  { %v726_v29 = vmul.f32 %v3884_v46, %v4710_v27  ;;  %v695_v55 = vpop.xlane.xlu2 %694  ;;  %v1455_v27 = vld [vmem:[%s6426_s0 + $0x10] sm:$0xff] }
 0x448   :  { %3885 = vrcp.f32 %v695_v55  ;;  %1482 = vmatpush.msra.mxu0 %v1455_v27 }
 0x449   :  { %1110 = vst.msk [vmem:[%s6425_s9 + $0x70] sm:$0xff] %vm551_vm4, %v726_v29  ;;  %3606 = vmatmul.msk.f32.vlgmr.msra.gmra.mxu3 %vm551_vm4, %v726_v29  ;;  %v1176_v4 = vpop.f32.mrf.mxu1 }
 0x44a   :  { %1483 = vmatpush.msra.mxu0 %v1454_v19 }
 0x44c   :  { %v1214_v56 = vpop.f32.mrf.mxu2  ;;  %1484 = vmatpush.msra.mxu0 %v1453_v62 }
 0x44d   :  { %1398 = vrot.lane.b32.xlu2 %v1214_v56, %s6406_s13 }
 0x44e   :  { %v3886_v43 = vpop.eup %3885 }
 0x44f   :  { %v3766_v33 = vpop.permute.xlu2 %3765  ;;  %v727_v51 = vmul.f32 %v3886_v43, %v4724_v63 }
 0x450   :  { %v3767_v53 = vunpack.i.l.bf16 %v3766_v33  ;;  %v3768_v61 = vunpack.i.h.bf16 %v3766_v33  ;;  %v4187_v33 = vmov 32.0  }
 0x451   :  { %1111 = vst.msk [vmem:[%s6425_s9 + $0x78] sm:$0xff] %vm551_vm4, %v727_v51  ;;  %3607 = vmatmul.msk.f32.gmra.mxu3 %vm551_vm4, %v727_v51  ;;  %v1179_v7 = vpop.f32.mrf.mxu1 }
 0x452   :  { %1313 = vmatpush.msra.mxu1 %v3767_v53 }
 0x454   :  { %1314 = vmatpush.msra.mxu1 %v3768_v61 }
 0x455   :  { %3602 = vmatmul.msk.f32.vlgmr.msra.gmra.mxu1 %vm551_vm4, %v722_v34 }
 0x46a   :  { %v683_v1 = vpop.xlane.xlu1 %682 }
 0x46b   :  { %3887 = vrcp.f32 %v683_v1 }
 0x46c   :  { %3889 = vrcp.f32 %v4187_v33 }
 0x471   :  { %v3888_v58 = vpop.eup %3887 }
 0x472   :  { %v723_v2 = vmul.f32 %v3888_v58, %v4734_v42  ;;  %v3890_v51 = vpop.eup %3889 }
 0x473   :  { %v1513_v53 = vmul.f32 32.0, %v3890_v51  ;;  %vm1517_vm6 = vweird.f32 %v3890_v51 }
 0x474   :  { %1107 = vst.msk [vmem:[%s6425_s9 + $0x58] sm:$0xff] %vm551_vm4, %v723_v2  ;;  %3603 = vmatmul.msk.f32.gmra.mxu1 %vm551_vm4, %v723_v2 }
 0x49c   :  { %v1246_v54 = vpop.f32.mrf.mxu3  ;;  %v1397_v20 = vpop.permute.xlu2 %1396 }
 0x49d   :  { %1400 = vrot.lane.b32.xlu1 %v1246_v54, %s6406_s13  ;;  %v1440_v37 = vsel %vm258_vm3, %v4749_v9, %v1397_v20 }
 0x4a6   :  { %v1413_v26 = vpop.permute.xlu0 %1412 }
 0x4a7   :  { %v1399_v0 = vpop.permute.xlu2 %1398  ;;  %v1444_v42 = vsel %vm551_vm4, %v1440_v37, %v1413_v26  ;;  %v1612_v37 = vld [vmem:[%s6427_s6 + $0x18] sm:$0xff] }
 0x4a8   :  { %v1441_v34 = vsel %vm258_vm3, %v4751_v16, %v1399_v0  ;;  %1641 = vmatpush.msrb.mxu1 %v1612_v37 }
 0x4b4   :  { %v1351_v3 = vpop.f32.mrf.mxu2 }
 0x4b5   :  { %1428 = vrot.lane.b32.xlu2 %v1351_v3, %s6402_s7  ;;  %v1415_v31 = vpop.permute.xlu0 %1414 }
 0x4b6   :  { %v1445_v36 = vsel %vm551_vm4, %v1441_v34, %v1415_v31 }
 0x4bc   :  { %v1249_v6 = vpop.f32.mrf.mxu3 }
 0x4c4   :  { %v1354_v57 = vpop.f32.mrf.mxu2 }
 0x4c5   :  { %1430 = vrot.lane.b32.xlu2 %v1354_v57, %s6402_s7 }
 0x4cc   :  { %v1386_v8 = vpop.f32.mrf.mxu3 }
 0x4cd   :  { %1432 = vrot.lane.b32.xlu2 %v1386_v8, %s6402_s7 }
 0x4d2   :  { %v1316_v11 = vpop.f32.mrf.mxu1 }
 0x4d3   :  { %1416 = vrot.lane.b32.xlu0 %v1316_v11, %s6404_s11 }
 0x4d4   :  { %v1389_v60 = vpop.f32.mrf.mxu3 }
 0x4db   :  { %1402 = vrot.lane.b32.xlu0 %v1249_v6, %s6406_s13  ;;  %s6431_s13 = sld [smem:[#allocation10_spill]] }
 0x4e3   :  { %1434 = vrot.lane.b32.xlu0 %v1389_v60, %s6402_s7  ;;  %s6432_s7 = sld [smem:[#allocation13_spill]] }
 0x4f1   :  { %v1319_v63 = vpop.f32.mrf.mxu1 }
 0x4f2   :  { %1418 = vrot.lane.b32.xlu2 %v1319_v63, %s6404_s11  ;;  %s4190_s11 = smov 126  }
 0x50f   :  { %v1429_v28 = vpop.permute.xlu2 %1428  ;;  %v1401_v10 = vpop.permute.xlu1 %1400 }
 0x510   :  { %v1449_v30 = vsel %vm1448_vm5, %v1444_v42, %v1429_v28  ;;  %v1442_v9 = vsel %vm258_vm3, %v1176_v4, %v1401_v10  ;;  %v1611_v42 = vld [vmem:[%s6427_s6 + $0x10] sm:$0xff]  ;;  %v1610_v28 = vld [vmem:[%s6427_s6 + $0x8] sm:$0xff] }
 0x511   :  { %3608 = vmatmul.msk.f32.vlgmr.msra.gmra.mxu0 %vm148_vm2, %v1449_v30  ;;  %1642 = vmatpush.msrb.mxu1 %v1611_v42  ;;  %v1609_v30 = vld [vmem:[%s6427_s6] sm:$0xff] }
 0x513   :  { %1643 = vmatpush.msrb.mxu1 %v1610_v28 }
 0x515   :  { %1644 = vmatpush.msrb.mxu1 %v1609_v30  ;;  %v1667_v30 = vld [vmem:[%s6430_s14 + $0x28] sm:$0xff] }
 0x51f   :  { %v1431_v41 = vpop.permute.xlu2 %1430 }
 0x520   :  { %v1450_v48 = vsel %vm1448_vm5, %v1445_v36, %v1431_v41 }
 0x521   :  { %3609 = vmatmul.msk.f32.gmra.mxu0 %vm148_vm2, %v1450_v48 }
 0x527   :  { %v1433_v14 = vpop.permute.xlu2 %1432 }
 0x545   :  { %v1417_v38 = vpop.permute.xlu0 %1416 }
 0x546   :  { %v1446_v39 = vsel %vm551_vm4, %v1442_v9, %v1417_v38 }
 0x547   :  { %v1451_v17 = vsel %vm1448_vm5, %v1446_v39, %v1433_v14 }
 0x548   :  { %3610 = vmatmul.msk.f32.gmra.mxu0 %vm148_vm2, %v1451_v17 }
 0x54c   :  { %v1419_v5 = vpop.permute.xlu2 %1418 }
 0x54d   :  { %v1403_v40 = vpop.permute.xlu0 %1402 }
 0x54e   :  { %v1443_v16 = vsel %vm258_vm3, %v1179_v7, %v1403_v40 }
 0x54f   :  { %v1447_v44 = vsel %vm551_vm4, %v1443_v16, %v1419_v5  ;;  %v4875_v16 = vld [vmem:[%s6428_s12] ss:$0 sm:$0xff]  ;;  %s6435_s12 = smov 8  }
 0x555   :  { %v1435_v59 = vpop.permute.xlu0 %1434 }
 0x556   :  { %v1452_v45 = vsel %vm1448_vm5, %v1447_v44, %v1435_v59  ;;  %v4880_v44 = vld [vmem:[%s6429_s1] ss:$0 sm:$0xff] }
 0x557   :  { %3611 = vmatmul.msk.f32.gmra.mxu0 %vm148_vm2, %v1452_v45 }
 0x58e   :  { %v1486_v32 = vpop.f32.mrf.mxu0 }
 0x58f   :  { %v1487_v47 = vadd.f32 %v1486_v32, %v4370_v12 }
 0x591   :  { %v1500_v35 = vsel %vm148_vm2, %v1487_v47, 0.0 }
 0x592   :  { %1501 = vadd.xlane.f32.xlu2 %v1500_v35 }
 0x59e   :  { %v1489_v49 = vpop.f32.mrf.mxu0 }
 0x59f   :  { %v1490_v50 = vadd.f32 %v1489_v49, %v4377_v15  ;;  %v1514_v15 = vsub.f32 1.0, %v1513_v53 }
 0x5a1   :  { %v1503_v52 = vsel %vm148_vm2, %v1490_v50, 0.0  ;;  %v1515_v61 = vmul.f32 %v3890_v51, %v1514_v15 }
 0x5a2   :  { %1504 = vadd.xlane.f32.xlu1 %v1503_v52 }
 0x5a3   :  { %v1516_v1 = vadd.f32 %v3890_v51, %v1515_v61  ;;  %v1677_v61 = vld [vmem:[%s6430_s14 + $0x78] sm:$0xff] }
 0x5a4   :  { %1682 = vmatpush.msra.mxu2 %v1677_v61 }
 0x5a5   :  { %v4840_v58 = vsel %vm1517_vm6, %v3890_v51, %v1516_v1  ;;  %v1676_v1 = vld [vmem:[%s6430_s14 + $0x70] sm:$0xff] }
 0x5a6   :  { %1683 = vmatpush.msra.mxu2 %v1676_v1 }
 0x5c5   :  { %v1492_v46 = vpop.f32.mrf.mxu0 }
 0x5c6   :  { %v1493_v29 = vadd.f32 %v1492_v46, %v4384_v18 }
 0x5c8   :  { %v1506_v55 = vsel %vm148_vm2, %v1493_v29, 0.0 }
 0x5c9   :  { %1507 = vadd.xlane.f32.xlu0 %v1506_v55 }
 0x5d4   :  { %v1495_v56 = vpop.f32.mrf.mxu0 }
 0x5d5   :  { %v1496_v43 = vadd.f32 %v1495_v56, %v4391_v21 }
 0x5d7   :  { %v1509_v12 = vsel %vm148_vm2, %v1496_v43, 0.0 }
 0x5d8   :  { %1510 = vadd.xlane.f32.xlu2 %v1509_v12 }
 0x605   :  { %v1502_v18 = vpop.xlane.xlu2 %1501 }
 0x606   :  { %v1519_v2 = vmul.f32 %v4840_v58, %v1502_v18 }
 0x608   :  { %v1523_v54 = vsub.f32 %v1487_v47, %v1519_v2  ;;  %v1675_v2 = vld [vmem:[%s6430_s14 + $0x68] sm:$0xff] }
 0x609   :  { %1684 = vmatpush.msra.mxu2 %v1675_v2 }
 0x60a   :  { %v1527_v3 = vmul.f32 %v1523_v54, %v1523_v54 }
 0x60c   :  { %v1531_v21 = vsel %vm148_vm2, %v1527_v3, 0.0 }
 0x60d   :  { %1532 = vadd.xlane.f32.xlu1 %v1531_v21 }
 0x615   :  { %v1505_v4 = vpop.xlane.xlu1 %1504 }
 0x616   :  { %v1520_v6 = vmul.f32 %v4840_v58, %v1505_v4  ;;  %v1674_v4 = vld [vmem:[%s6430_s14 + $0x60] sm:$0xff] }
 0x617   :  { %1685 = vmatpush.msra.mxu2 %v1674_v4 }
 0x618   :  { %v1524_v57 = vsub.f32 %v1490_v50, %v1520_v6 }
 0x61a   :  { %v1528_v7 = vmul.f32 %v1524_v57, %v1524_v57 }
 0x61c   :  { %v1534_v8 = vsel %vm148_vm2, %v1528_v7, 0.0  ;;  %v1673_v7 = vld [vmem:[%s6430_s14 + $0x58] sm:$0xff] }
 0x61d   :  { %1535 = vadd.xlane.f32.xlu2 %v1534_v8  ;;  %1686 = vmatpush.msra.mxu2 %v1673_v7 }
 0x63c   :  { %v1508_v11 = vpop.xlane.xlu0 %1507 }
 0x63d   :  { %v1521_v13 = vmul.f32 %v4840_v58, %v1508_v11  ;;  %v1672_v11 = vld [vmem:[%s6430_s14 + $0x50] sm:$0xff] }
 0x63e   :  { %1687 = vmatpush.msra.mxu2 %v1672_v11 }
 0x63f   :  { %v4847_v27 = vsub.f32 %v1493_v29, %v1521_v13 }
 0x641   :  { %v1529_v19 = vmul.f32 %v4847_v27, %v4847_v27 }
 0x643   :  { %v1537_v60 = vsel %vm148_vm2, %v1529_v19, 0.0  ;;  %v1671_v19 = vld [vmem:[%s6430_s14 + $0x48] sm:$0xff] }
 0x644   :  { %1538 = vadd.xlane.f32.xlu0 %v1537_v60  ;;  %1688 = vmatpush.msra.mxu2 %v1671_v19 }
 0x64b   :  { %v1511_v62 = vpop.xlane.xlu2 %1510 }
 0x64c   :  { %v1522_v63 = vmul.f32 %v4840_v58, %v1511_v62  ;;  %v1670_v62 = vld [vmem:[%s6430_s14 + $0x40] sm:$0xff] }
 0x64d   :  { %1689 = vmatpush.msra.mxu2 %v1670_v62 }
 0x64e   :  { %v4853_v20 = vsub.f32 %v1496_v43, %v1522_v63 }
 0x650   :  { %v1530_v0 = vmul.f32 %v4853_v20, %v4853_v20 }
 0x652   :  { %v1540_v26 = vsel %vm148_vm2, %v1530_v0, 0.0 }
 0x653   :  { %1541 = vadd.xlane.f32.xlu1 %v1540_v26  ;;  %v1669_v26 = vld [vmem:[%s6430_s14 + $0x38] sm:$0xff] }
 0x654   :  { %1690 = vmatpush.msra.mxu2 %v1669_v26 }
 0x680   :  { %v1533_v31 = vpop.xlane.xlu1 %1532 }
 0x681   :  { %v1543_v34 = vmul.f32 %v1533_v31, %v4840_v58 }
 0x683   :  { %v1547_v36 = vadd.f32 1e-05, %v1543_v34  ;;  %v1666_v34 = vld [vmem:[%s6430_s14 + $0x20] sm:$0xff] }
 0x685   :  { %3891 = vrsqrt.f32 %v1547_v36  ;;  %vm1557_vm8 = vweird.f32 %v1547_v36 }
 0x68b   :  { %v3892_v41 = vpop.eup %3891 }
 0x68c   :  { %v1552_v48 = vmul.f32 %v3892_v41, %v1547_v36  ;;  %vm1558_vm7 = vweird.f32 %v3892_v41 }
 0x68d   :  { %vm1559_vm9 = vmor %vm1557_vm8, %vm1558_vm7 }
 0x68e   :  { %v1553_v10 = vmul.f32 %v3892_v41, %v1552_v48 }
 0x690   :  { %v1554_v9 = vmul.f32 0.5, %v1553_v10  ;;  %v1536_v38 = vpop.xlane.xlu2 %1535 }
 0x691   :  { %v1544_v14 = vmul.f32 %v1536_v38, %v4840_v58 }
 0x692   :  { %v1555_v39 = vsub.f32 1.5, %v1554_v9 }
 0x693   :  { %v1548_v17 = vadd.f32 1e-05, %v1544_v14 }
 0x694   :  { %v1556_v40 = vmul.f32 %v3892_v41, %v1555_v39  ;;  %v1664_v39 = vld [vmem:[%s6430_s14 + $0x10] sm:$0xff] }
 0x695   :  { %3893 = vrsqrt.f32 %v1548_v17  ;;  %vm1567_vm11 = vweird.f32 %v1548_v17 }
 0x696   :  { %v1560_v5 = vsel %vm1559_vm9, %v3892_v41, %v1556_v40  ;;  %v1665_v41 = vld [vmem:[%s6430_s14 + $0x18] sm:$0xff]  ;;  %v1662_v40 = vld [vmem:[%s6430_s14] sm:$0xff] }
 0x697   :  { %v1591_v59 = vmul.f32 %v1560_v5, %v1523_v54 }
 0x699   :  { %v1598_v45 = vmul.f32 %v4875_v16, %v1591_v59 }
 0x69b   :  { %v3894_v32 = vpop.eup %3893  ;;  %v4884_v47 = vadd.f32 %v4880_v44, %v1598_v45 }
 0x69c   :  { %v1562_v35 = vmul.f32 %v3894_v32, %v1548_v17  ;;  %vm1568_vm10 = vweird.f32 %v3894_v32  ;;  %v1663_v17 = vld [vmem:[%s6430_s14 + $0x8] sm:$0xff] }
 0x69d   :  { %3612 = vmatmul.msk.f32.vlgmr.msrb.gmra.mxu1 %vm148_vm2, %v4884_v47  ;;  %vm1569_vm12 = vmor %vm1567_vm11, %vm1568_vm10 }
 0x69e   :  { %v1563_v49 = vmul.f32 %v3894_v32, %v1562_v35 }
 0x6a0   :  { %v1564_v50 = vmul.f32 0.5, %v1563_v49 }
 0x6a2   :  { %v1565_v52 = vsub.f32 1.5, %v1564_v50 }
 0x6a4   :  { %v1566_v46 = vmul.f32 %v3894_v32, %v1565_v52 }
 0x6a6   :  { %v1570_v29 = vsel %vm1569_vm12, %v3894_v32, %v1566_v46 }
 0x6a7   :  { %v1592_v55 = vmul.f32 %v1570_v29, %v1524_v57 }
 0x6a9   :  { %v1599_v56 = vmul.f32 %v4875_v16, %v1592_v55  ;;  %v3815_v55 = vld [vmem:[%s6432_s7] ss:$0 sm:$0xff]  ;;  %s6433_s7 = sld [smem:[#allocation14_spill]] }
 0x6ab   :  { %v4890_v43 = vadd.f32 %v4880_v44, %v1599_v56 }
 0x6ad   :  { %3613 = vmatmul.msk.f32.gmra.mxu1 %vm148_vm2, %v4890_v43 }
 0x6b7   :  { %v1539_v12 = vpop.xlane.xlu0 %1538 }
 0x6b8   :  { %v1545_v33 = vmul.f32 %v1539_v12, %v4840_v58 }
 0x6ba   :  { %v1549_v51 = vadd.f32 1e-05, %v1545_v33 }
 0x6bc   :  { %3895 = vrsqrt.f32 %v1549_v51  ;;  %vm1577_vm14 = vweird.f32 %v1549_v51 }
 0x6c2   :  { %v3896_v53 = vpop.eup %3895 }
 0x6c3   :  { %v1572_v15 = vmul.f32 %v3896_v53, %v1549_v51  ;;  %vm1578_vm13 = vweird.f32 %v3896_v53 }
 0x6c4   :  { %vm1579_vm15 = vmor %vm1577_vm14, %vm1578_vm13 }
 0x6c5   :  { %v1573_v18 = vmul.f32 %v3896_v53, %v1572_v15 }
 0x6c6   :  { %v1542_v54 = vpop.xlane.xlu1 %1541 }
 0x6c7   :  { %v1574_v3 = vmul.f32 0.5, %v1573_v18  ;;  %v1546_v21 = vmul.f32 %v1542_v54, %v4840_v58 }
 0x6c9   :  { %v1575_v6 = vsub.f32 1.5, %v1574_v3  ;;  %v1550_v57 = vadd.f32 1e-05, %v1546_v21 }
 0x6cb   :  { %v1576_v8 = vmul.f32 %v3896_v53, %v1575_v6  ;;  %3897 = vrsqrt.f32 %v1550_v57  ;;  %vm1587_vm1 = vweird.f32 %v1550_v57 }
 0x6cd   :  { %v1580_v13 = vsel %vm1579_vm15, %v3896_v53, %v1576_v8 }
 0x6ce   :  { %v1593_v60 = vmul.f32 %v1580_v13, %v4847_v27  ;;  %v1668_v27 = vld [vmem:[%s6430_s14 + $0x30] sm:$0xff] }
 0x6cf   :  { %1691 = vmatpush.msra.mxu2 %v1668_v27 }
 0x6d0   :  { %v1600_v63 = vmul.f32 %v4875_v16, %v1593_v60 }
 0x6d1   :  { %v3898_v0 = vpop.eup %3897  ;;  %1692 = vmatpush.msra.mxu2 %v1667_v30 }
 0x6d2   :  { %v1582_v37 = vmul.f32 %v3898_v0, %v1550_v57  ;;  %v1607_v42 = vadd.f32 %v4880_v44, %v1600_v63  ;;  %vm1588_vm0 = vweird.f32 %v3898_v0 }
 0x6d3   :  { %1693 = vmatpush.msra.mxu2 %v1666_v34  ;;  %vm1589_vm6 = vmor %vm1587_vm1, %vm1588_vm0 }
 0x6d4   :  { %v1583_v28 = vmul.f32 %v3898_v0, %v1582_v37  ;;  %3614 = vmatmul.msk.f32.gmra.mxu1 %vm148_vm2, %v1607_v42 }
 0x6d5   :  { %1694 = vmatpush.msra.mxu2 %v1665_v41  ;;  %v1822_v41 = vld [vmem:[%s6377_s16 + $0x18] sm:$0xff] }
 0x6d6   :  { %v1584_v31 = vmul.f32 0.5, %v1583_v28  ;;  %1847 = vmatpush.msrb.mxu3 %v1822_v41 }
 0x6d7   :  { %1695 = vmatpush.msra.mxu2 %v1664_v39 }
 0x6d8   :  { %v1585_v36 = vsub.f32 1.5, %v1584_v31 }
 0x6d9   :  { %1696 = vmatpush.msra.mxu2 %v1663_v17 }
 0x6da   :  { %v1586_v48 = vmul.f32 %v3898_v0, %v1585_v36 }
 0x6db   :  { %1697 = vmatpush.msra.mxu2 %v1662_v40 }
 0x6dc   :  { %v1590_v10 = vsel %vm1589_vm6, %v3898_v0, %v1586_v48  ;;  %v1821_v48 = vld [vmem:[%s6377_s16 + $0x10] sm:$0xff] }
 0x6dd   :  { %v1594_v9 = vmul.f32 %v1590_v10, %v4853_v20  ;;  %v3814_v20 = vld [vmem:[%s6431_s13] ss:$0 sm:$0xff]  ;;  %1848 = vmatpush.msrb.mxu3 %v1821_v48  ;;  %v1820_v10 = vld [vmem:[%s6377_s16 + $0x8] sm:$0xff] }
 0x6df   :  { %v1601_v38 = vmul.f32 %v4875_v16, %v1594_v9  ;;  %1849 = vmatpush.msrb.mxu3 %v1820_v10  ;;  %v1819_v9 = vld [vmem:[%s6377_s16] sm:$0xff]  ;;  %s4191_s16 = smov 125  }
 0x6e1   :  { %v1608_v14 = vadd.f32 %v4880_v44, %v1601_v38  ;;  %1850 = vmatpush.msrb.mxu3 %v1819_v9 }
 0x6e3   :  { %3615 = vmatmul.msk.f32.gmra.mxu1 %vm148_vm2, %v1608_v14 }
 0x71a   :  { %v1646_v16 = vpop.f32.mrf.mxu1 }
 0x71b   :  { %v1647_v5 = vadd.f32 %v3814_v20, %v1646_v16 }
 0x71d   :  { %v1658_v59 = vmax.f32 %v1647_v5, 0.0 }
 0x71f   :  { %1698 = vmatmul.f32.vlgmr.msra.gmra.mxu2 %v1658_v59 }
 0x72a   :  { %v1649_v44 = vpop.f32.mrf.mxu1 }
 0x72b   :  { %v1650_v45 = vadd.f32 %v3814_v20, %v1649_v44 }
 0x72d   :  { %v1659_v32 = vmax.f32 %v1650_v45, 0.0 }
 0x72f   :  { %1701 = vmatmul.f32.gmra.mxu2 %v1659_v32 }
 0x751   :  { %v1652_v35 = vpop.f32.mrf.mxu1 }
 0x752   :  { %v1653_v49 = vadd.f32 %v3814_v20, %v1652_v35  ;;  %v3816_v35 = vld [vmem:[%s6433_s7] ss:$0 sm:$0xff] }
 0x754   :  { %v1660_v50 = vmax.f32 %v1653_v49, 0.0 }
 0x756   :  { %1704 = vmatmul.f32.gmra.mxu2 %v1660_v50 }
 0x760   :  { %v1655_v52 = vpop.f32.mrf.mxu1 }
 0x761   :  { %v1656_v46 = vadd.f32 %v3814_v20, %v1655_v52  ;;  %v3817_v52 = vld [vmem:[%s6376_s15] ss:$0 sm:$0xff]  ;;  %s6434_s15 = smov 64  }
 0x763   :  { %v1661_v29 = vmax.f32 %v1656_v46, 0.0 }
 0x765   :  { %1707 = vmatmul.f32.gmra.mxu2 %v1661_v29 }
 0x7a2   :  { %v1699_v56 = vpop.f32.mrf.mxu2 }
 0x7a3   :  { %v1700_v12 = vadd.f32 %v3815_v55, %v1699_v56 }
 0x7a5   :  { %v1711_v33 = vadd.f32 %v1700_v12, %v4884_v47 }
 0x7a7   :  { %v1717_v51 = vsel %vm148_vm2, %v1711_v33, 0.0 }
 0x7a8   :  { %1718 = vadd.xlane.f32.xlu2 %v1717_v51 }
 0x7b2   :  { %v1702_v53 = vpop.f32.mrf.mxu2 }
 0x7b3   :  { %v1703_v15 = vadd.f32 %v3815_v55, %v1702_v53 }
 0x7b5   :  { %v1712_v61 = vadd.f32 %v1703_v15, %v4890_v43 }
 0x7b7   :  { %v1720_v1 = vsel %vm148_vm2, %v1712_v61, 0.0 }
 0x7b8   :  { %1721 = vadd.xlane.f32.xlu0 %v1720_v1 }
 0x7d9   :  { %v1705_v18 = vpop.f32.mrf.mxu2 }
 0x7da   :  { %v1706_v2 = vadd.f32 %v3815_v55, %v1705_v18 }
 0x7dc   :  { %v1713_v54 = vadd.f32 %v1706_v2, %v1607_v42 }
 0x7de   :  { %v1723_v3 = vsel %vm148_vm2, %v1713_v54, 0.0 }
 0x7df   :  { %1724 = vadd.xlane.f32.xlu1 %v1723_v3 }
 0x7e8   :  { %v1708_v21 = vpop.f32.mrf.mxu2 }
 0x7e9   :  { %v1709_v4 = vadd.f32 %v3815_v55, %v1708_v21 }
 0x7eb   :  { %v1714_v6 = vadd.f32 %v1709_v4, %v1608_v14 }
 0x7ed   :  { %v1726_v47 = vsel %vm148_vm2, %v1714_v6, 0.0 }
 0x7ee   :  { %1727 = vadd.xlane.f32.xlu2 %v1726_v47 }
 0x81b   :  { %v1719_v57 = vpop.xlane.xlu2 %1718 }
 0x81c   :  { %v1729_v7 = vmul.f32 %v1719_v57, %v4840_v58 }
 0x81e   :  { %v1733_v8 = vsub.f32 %v1711_v33, %v1729_v7 }
 0x820   :  { %v1737_v43 = vmul.f32 %v1733_v8, %v1733_v8 }
 0x822   :  { %v1741_v11 = vsel %vm148_vm2, %v1737_v43, 0.0 }
 0x823   :  { %1742 = vadd.xlane.f32.xlu0 %v1741_v11 }
 0x82b   :  { %v1722_v13 = vpop.xlane.xlu0 %1721 }
 0x82c   :  { %v1730_v19 = vmul.f32 %v1722_v13, %v4840_v58 }
 0x82e   :  { %v1734_v60 = vsub.f32 %v1712_v61, %v1730_v19 }
 0x830   :  { %v1738_v62 = vmul.f32 %v1734_v60, %v1734_v60 }
 0x832   :  { %v1744_v63 = vsel %vm148_vm2, %v1738_v62, 0.0 }
 0x833   :  { %1745 = vadd.xlane.f32.xlu1 %v1744_v63 }
 0x852   :  { %v1725_v0 = vpop.xlane.xlu1 %1724 }
 0x853   :  { %v1731_v26 = vmul.f32 %v1725_v0, %v4840_v58 }
 0x855   :  { %v4969_v37 = vsub.f32 %v1713_v54, %v1731_v26 }
 0x857   :  { %v1739_v42 = vmul.f32 %v4969_v37, %v4969_v37 }
 0x859   :  { %v1747_v27 = vsel %vm148_vm2, %v1739_v42, 0.0 }
 0x85a   :  { %1748 = vadd.xlane.f32.xlu2 %v1747_v27 }
 0x861   :  { %v1728_v28 = vpop.xlane.xlu2 %1727 }
 0x862   :  { %v1732_v30 = vmul.f32 %v1728_v28, %v4840_v58 }
 0x864   :  { %v4975_v31 = vsub.f32 %v1714_v6, %v1732_v30 }
 0x866   :  { %v1740_v34 = vmul.f32 %v4975_v31, %v4975_v31 }
 0x868   :  { %v1750_v36 = vsel %vm148_vm2, %v1740_v34, 0.0 }
 0x869   :  { %1751 = vadd.xlane.f32.xlu0 %v1750_v36 }
 0x896   :  { %v1743_v38 = vpop.xlane.xlu0 %1742 }
 0x897   :  { %v1753_v14 = vmul.f32 %v1743_v38, %v4840_v58 }
 0x899   :  { %v1757_v39 = vadd.f32 1e-05, %v1753_v14 }
 0x89b   :  { %3899 = vrsqrt.f32 %v1757_v39  ;;  %vm1767_vm8 = vweird.f32 %v1757_v39 }
 0x8a1   :  { %v3900_v17 = vpop.eup %3899 }
 0x8a2   :  { %v1762_v40 = vmul.f32 %v3900_v17, %v1757_v39  ;;  %vm1768_vm7 = vweird.f32 %v3900_v17 }
 0x8a3   :  { %vm1769_vm9 = vmor %vm1767_vm8, %vm1768_vm7 }
 0x8a4   :  { %v1763_v20 = vmul.f32 %v3900_v17, %v1762_v40 }
 0x8a6   :  { %v1764_v16 = vmul.f32 0.5, %v1763_v20  ;;  %v1746_v5 = vpop.xlane.xlu1 %1745 }
 0x8a7   :  { %v1754_v59 = vmul.f32 %v1746_v5, %v4840_v58 }
 0x8a8   :  { %v1765_v44 = vsub.f32 1.5, %v1764_v16 }
 0x8a9   :  { %v1758_v45 = vadd.f32 1e-05, %v1754_v59 }
 0x8aa   :  { %v1766_v32 = vmul.f32 %v3900_v17, %v1765_v44 }
 0x8ab   :  { %3901 = vrsqrt.f32 %v1758_v45  ;;  %vm1777_vm11 = vweird.f32 %v1758_v45 }
 0x8ac   :  { %v1770_v49 = vsel %vm1769_vm9, %v3900_v17, %v1766_v32 }
 0x8ad   :  { %v1801_v50 = vmul.f32 %v1770_v49, %v1733_v8 }
 0x8af   :  { %v1808_v46 = vmul.f32 %v3816_v35, %v1801_v50 }
 0x8b1   :  { %v3902_v29 = vpop.eup %3901  ;;  %v5000_v55 = vadd.f32 %v3817_v52, %v1808_v46 }
 0x8b2   :  { %v1772_v56 = vmul.f32 %v3902_v29, %v1758_v45  ;;  %vm1778_vm10 = vweird.f32 %v3902_v29 }
 0x8b3   :  { %3616 = vmatmul.msk.f32.vlgmr.msrb.gmra.mxu3 %vm148_vm2, %v5000_v55  ;;  %vm1779_vm12 = vmor %vm1777_vm11, %vm1778_vm10 }
 0x8b4   :  { %v1773_v12 = vmul.f32 %v3902_v29, %v1772_v56 }
 0x8b6   :  { %v1774_v33 = vmul.f32 0.5, %v1773_v12 }
 0x8b8   :  { %v1775_v51 = vsub.f32 1.5, %v1774_v33 }
 0x8ba   :  { %v1776_v53 = vmul.f32 %v3902_v29, %v1775_v51 }
 0x8bc   :  { %v1780_v15 = vsel %vm1779_vm12, %v3902_v29, %v1776_v53 }
 0x8bd   :  { %v1802_v61 = vmul.f32 %v1780_v15, %v1734_v60 }
 0x8bf   :  { %v1809_v1 = vmul.f32 %v3816_v35, %v1802_v61 }
 0x8c1   :  { %v5004_v18 = vadd.f32 %v3817_v52, %v1809_v1 }
 0x8c3   :  { %3617 = vmatmul.msk.f32.gmra.mxu3 %vm148_vm2, %v5004_v18 }
 0x8cd   :  { %v1749_v2 = vpop.xlane.xlu2 %1748 }
 0x8ce   :  { %v1755_v54 = vmul.f32 %v1749_v2, %v4840_v58 }
 0x8d0   :  { %v1759_v3 = vadd.f32 1e-05, %v1755_v54 }
 0x8d2   :  { %3903 = vrsqrt.f32 %v1759_v3  ;;  %vm1787_vm14 = vweird.f32 %v1759_v3 }
 0x8d8   :  { %v3904_v21 = vpop.eup %3903 }
 0x8d9   :  { %v1782_v4 = vmul.f32 %v3904_v21, %v1759_v3  ;;  %vm1788_vm13 = vweird.f32 %v3904_v21 }
 0x8da   :  { %vm1789_vm15 = vmor %vm1787_vm14, %vm1788_vm13 }
 0x8db   :  { %v1783_v6 = vmul.f32 %v3904_v21, %v1782_v4 }
 0x8dc   :  { %v1752_v47 = vpop.xlane.xlu0 %1751 }
 0x8dd   :  { %v1784_v57 = vmul.f32 0.5, %v1783_v6  ;;  %v1756_v7 = vmul.f32 %v1752_v47, %v4840_v58 }
 0x8df   :  { %v1785_v8 = vsub.f32 1.5, %v1784_v57  ;;  %v1760_v43 = vadd.f32 1e-05, %v1756_v7 }
 0x8e1   :  { %v1786_v11 = vmul.f32 %v3904_v21, %v1785_v8  ;;  %3905 = vrsqrt.f32 %v1760_v43  ;;  %vm1797_vm1 = vweird.f32 %v1760_v43 }
 0x8e3   :  { %v1790_v13 = vsel %vm1789_vm15, %v3904_v21, %v1786_v11 }
 0x8e4   :  { %v1803_v19 = vmul.f32 %v1790_v13, %v4969_v37 }
 0x8e6   :  { %v1810_v60 = vmul.f32 %v3816_v35, %v1803_v19 }
 0x8e7   :  { %v3906_v62 = vpop.eup %3905 }
 0x8e8   :  { %v1792_v63 = vmul.f32 %v3906_v62, %v1760_v43  ;;  %v5011_v0 = vadd.f32 %v3817_v52, %v1810_v60  ;;  %vm1798_vm0 = vweird.f32 %v3906_v62 }
 0x8e9   :  { %vm1799_vm6 = vmor %vm1797_vm1, %vm1798_vm0 }
 0x8ea   :  { %v1793_v26 = vmul.f32 %v3906_v62, %v1792_v63  ;;  %3618 = vmatmul.msk.f32.gmra.mxu3 %vm148_vm2, %v5011_v0 }
 0x8ec   :  { %v1794_v42 = vmul.f32 0.5, %v1793_v26 }
 0x8ee   :  { %v1795_v27 = vsub.f32 1.5, %v1794_v42 }
 0x8f0   :  { %v1796_v28 = vmul.f32 %v3906_v62, %v1795_v27 }
 0x8f2   :  { %v1800_v30 = vsel %vm1799_vm6, %v3906_v62, %v1796_v28 }
 0x8f3   :  { %v1804_v34 = vmul.f32 %v1800_v30, %v4975_v31 }
 0x8f5   :  { %v1811_v36 = vmul.f32 %v3816_v35, %v1804_v34 }
 0x8f7   :  { %v5016_v37 = vadd.f32 %v3817_v52, %v1811_v36 }
 0x8f9   :  { %3619 = vmatmul.msk.f32.gmra.mxu3 %vm148_vm2, %v5016_v37 }
 0x936   :  { %v5020_v41 = vpop.f32.mrf.mxu3 }
 0x937   :  { %1868 = vrot.lane.b32.xlu2 %v5020_v41, %s4181_s2  ;;  %1884 = vrot.lane.b32.xlu0 %v5020_v41, %s4182_s8 }
 0x946   :  { %v5026_v48 = vpop.f32.mrf.mxu3 }
 0x947   :  { %1878 = vrot.lane.b32.xlu2 %v5026_v48, %s4180_s30  ;;  %1870 = vrot.lane.b32.xlu1 %v5026_v48, %s4181_s2  ;;  %v3774_v33 = vpack.i.bf16 %v5020_v41, %v5026_v48 }
 0x948   :  { %1886 = vrot.lane.b32.xlu0 %v5026_v48, %s4182_s8 }
 0x950   :  { %1876 = vrot.lane.b32.xlu0 %v5020_v41, %s4180_s30 }
 0x96d   :  { %v5036_v31 = vpop.f32.mrf.mxu3 }
 0x96e   :  { %1880 = vrot.lane.b32.xlu0 %v5036_v31, %s4180_s30 }
 0x97c   :  { %v5040_v10 = vpop.f32.mrf.mxu3 }
 0x97d   :  { %1890 = vrot.lane.b32.xlu0 %v5040_v10, %s4182_s8  ;;  %1882 = vrot.lane.b32.xlu2 %v5040_v10, %s4180_s30  ;;  %s6436_s30 = smov 16  }
 0x97e   :  { %1874 = vrot.lane.b32.xlu1 %v5040_v10, %s4181_s2 }
 0x985   :  { %1965 = vrot.lane.b32.xlu0 %v5040_v10, %s4179_s10 }
 0x986   :  { %1872 = vrot.lane.b32.xlu1 %v5036_v31, %s4181_s2 }
 0x991   :  { %v1869_v9 = vpop.permute.xlu2 %1868 }
 0x992   :  { %1998 = vrot.lane.b32.xlu1 %v1869_v9, %s4179_s10 }
 0x99a   :  { %1930 = vrot.lane.b32.xlu1 %v5026_v48, %s4179_s10 }
 0x9a1   :  { %v5057_v38 = vpop.permute.xlu2 %1878 }
 0x9a2   :  { %1963 = vrot.lane.b32.xlu1 %v5036_v31, %s4179_s10 }
 0x9a9   :  { %v1885_v14 = vpop.permute.xlu0 %1884 }
 0x9aa   :  { %2070 = vrot.lane.b32.xlu1 %v5057_v38, %s4179_s10  ;;  %v3784_v53 = vpack.i.bf16 %v1885_v14, %v5036_v31 }
 0x9b9   :  { %v1871_v39 = vpop.permute.xlu1 %1870 }
 0x9ba   :  { %v1887_v17 = vpop.permute.xlu0 %1886  ;;  %2000 = vrot.lane.b32.xlu2 %v1871_v39, %s4179_s10  ;;  %v3769_v5 = vpack.i.bf16 %v1869_v9, %v1871_v39 }
 0x9bb   :  { %2140 = vrot.lane.b32.xlu0 %v1887_v17, %s4179_s10  ;;  %v3779_v32 = vpack.i.bf16 %v1887_v17, %v5040_v10 }
 0x9c2   :  { %1888 = vrot.lane.b32.xlu2 %v5036_v31, %s4182_s8  ;;  %v5070_v20 = vpop.permute.xlu0 %1876 }
 0x9ca   :  { %1928 = vrot.lane.b32.xlu2 %v5020_v41, %s4179_s10 }
 0x9d2   :  { %2138 = vrot.lane.b32.xlu2 %v1885_v14, %s4179_s10 }
 0x9d7   :  { %v5068_v40 = vpop.permute.xlu2 %1882 }
 0x9d8   :  { %2105 = vrot.lane.b32.xlu1 %v5068_v40, %s4179_s10 }
 0x9da   :  { %2068 = vrot.lane.b32.xlu2 %v5070_v20, %s4179_s10 }
 0x9e0   :  { %v5076_v16 = vpop.permute.xlu0 %1880 }
 0x9e2   :  { %2103 = vrot.lane.b32.xlu2 %v5076_v16, %s4179_s10 }
 0x9ea   :  { %3770 = vrot.lane.b32.xlu2 %v3769_v5, %s6434_s15 }
 0x9ef   :  { %v5081_v59 = vpop.permute.xlu0 %1890 }
 0x9f0   :  { %v5083_v44 = vpop.permute.xlu1 %1874  ;;  %2175 = vrot.lane.b32.xlu1 %v5081_v59, %s4179_s10 }
 0x9f1   :  { %2035 = vrot.lane.b32.xlu0 %v5083_v44, %s4179_s10  ;;  %v3789_v45 = vpack.i.bf16 %v5083_v44, %v5057_v38 }
 0x9f3   :  { %3790 = vrot.lane.b32.xlu2 %v3789_v45, %s6434_s15 }
 0x9f7   :  { %v1966_v35 = vpop.permute.xlu0 %1965 }
 0x9f8   :  { %v5093_v49 = vpop.permute.xlu1 %1872  ;;  %3624 = vmatpush.xpose.msk.msra.mxu1 %vm258_vm3, %v1966_v35  ;;  %3780 = vrot.lane.b32.xlu1 %v3779_v32, %s6434_s15 }
 0x9f9   :  { %2033 = vrot.lane.b32.xlu0 %v5093_v49, %s4179_s10 }
 0xa04   :  { %v1999_v50 = vpop.permute.xlu1 %1998 }
 0xa0c   :  { %v1931_v52 = vpop.permute.xlu1 %1930 }
 0xa0d   :  { %3620 = vmatpush.xpose.msk.msrb.mxu0 %vm258_vm3, %v1931_v52 }
 0xa14   :  { %v1964_v46 = vpop.permute.xlu1 %1963  ;;  %v2001_v29 = vpop.permute.xlu2 %2000 }
 0xa15   :  { %3625 = vmatpush.xpose.msk.msra.mxu1 %vm258_vm3, %v1964_v46  ;;  %3628 = vmatpush.xpose.msk.msra.mxu3 %vm258_vm3, %v2001_v29 }
 0xa18   :  { %3626 = vmatmul.msk.f32.vlgmr.msra.gmra.mxu1 %vm258_vm3, %v5036_v31 }
 0xa19   :  { %3629 = vmatpush.xpose.msk.msra.mxu3 %vm258_vm3, %v1999_v50 }
 0xa1c   :  { %v2071_v56 = vpop.permute.xlu1 %2070  ;;  %3630 = vmatmul.msk.f32.vlgmr.msra.gmra.mxu3 %vm258_vm3, %v1869_v9  ;;  %v5106_v12 = vpop.permute.xlu2 %1888 }
 0xa1d   :  { %3636 = vmatpush.xpose.msk.msrb.mxu1 %vm258_vm3, %v2071_v56  ;;  %2173 = vrot.lane.b32.xlu0 %v5106_v12, %s4179_s10 }
 0xa20   :  { %3627 = vmatmul.msk.f32.gmra.mxu1 %vm258_vm3, %v5040_v10 }
 0xa24   :  { %3631 = vmatmul.msk.f32.gmra.mxu3 %vm258_vm3, %v1871_v39  ;;  %v1929_v51 = vpop.permute.xlu2 %1928 }
 0xa25   :  { %3775 = vrot.lane.b32.xlu0 %v3774_v33, %s6434_s15  ;;  %3621 = vmatpush.xpose.msk.msrb.mxu0 %vm258_vm3, %v1929_v51 }
 0xa28   :  { %3622 = vmatmul.msk.f32.vlgmr.msrb.gmra.mxu0 %vm258_vm3, %v5020_v41 }
 0xa2c   :  { %v2139_v15 = vpop.permute.xlu2 %2138 }
 0xa2d   :  { %v2141_v61 = vpop.permute.xlu0 %2140  ;;  %3785 = vrot.lane.b32.xlu0 %v3784_v53, %s6434_s15 }
 0xa2e   :  { %3644 = vmatpush.xpose.msk.msrb.mxu3 %vm258_vm3, %v2141_v61 }
 0xa30   :  { %3623 = vmatmul.msk.f32.gmra.mxu0 %vm258_vm3, %v5026_v48 }
 0xa32   :  { %3645 = vmatpush.xpose.msk.msrb.mxu3 %vm258_vm3, %v2139_v15 }
 0xa34   :  { %v2069_v1 = vpop.permute.xlu2 %2068 }
 0xa35   :  { %3646 = vmatmul.msk.f32.vlgmr.msrb.gmra.mxu3 %vm258_vm3, %v1885_v14  ;;  %3637 = vmatpush.xpose.msk.msrb.mxu1 %vm258_vm3, %v2069_v1 }
 0xa38   :  { %3638 = vmatmul.msk.f32.vlgmr.msrb.gmra.mxu1 %vm258_vm3, %v5070_v20 }
 0xa3c   :  { %v2104_v2 = vpop.permute.xlu2 %2103 }
 0xa3d   :  { %3647 = vmatmul.msk.f32.gmra.mxu3 %vm258_vm3, %v1887_v17 }
 0xa40   :  { %3639 = vmatmul.msk.f32.gmra.mxu1 %vm258_vm3, %v5057_v38 }
 0xa44   :  { %v3771_v54 = vpop.permute.xlu2 %3770 }
 0xa45   :  { %v3772_v3 = vunpack.i.l.bf16 %v3771_v54  ;;  %v3773_v21 = vunpack.i.h.bf16 %v3771_v54 }
 0xa47   :  { %2882 = vmatpush.msra.mxu3 %v3772_v3 }
 0xa49   :  { %2883 = vmatpush.msra.mxu3 %v3773_v21 }
 0xa4a   :  { %v2106_v4 = vpop.permute.xlu1 %2105 }
 0xa4b   :  { %3640 = vmatpush.xpose.msk.msrb.mxu2 %vm258_vm3, %v2106_v4 }
 0xa4d   :  { %v3791_v11 = vpop.permute.xlu2 %3790 }
 0xa4e   :  { %v3793_v13 = vunpack.i.h.bf16 %v3791_v11  ;;  %v3792_v42 = vunpack.i.l.bf16 %v3791_v11 }
 0xa4f   :  { %3641 = vmatpush.xpose.msk.msrb.mxu2 %vm258_vm3, %v2104_v2 }
 0xa52   :  { %3642 = vmatmul.msk.f32.vlgmr.msrb.gmra.mxu2 %vm258_vm3, %v5076_v16 }
 0xa5a   :  { %3643 = vmatmul.msk.f32.gmra.mxu2 %vm258_vm3, %v5068_v40 }
 0xa62   :  { %v2176_v6 = vpop.permute.xlu1 %2175 }
 0xa63   :  { %v2036_v47 = vpop.permute.xlu0 %2035 }
 0xa64   :  { %3632 = vmatpush.xpose.msk.msra.mxu0 %vm258_vm3, %v2036_v47 }
 0xa6a   :  { %v3781_v57 = vpop.permute.xlu1 %3780 }
 0xa6b   :  { %v2034_v7 = vpop.permute.xlu0 %2033  ;;  %v3783_v8 = vunpack.i.h.bf16 %v3781_v57  ;;  %v3782_v43 = vunpack.i.l.bf16 %v3781_v57 }
 0xa6c   :  { %3633 = vmatpush.xpose.msk.msra.mxu0 %vm258_vm3, %v2034_v7 }
 0xa6d   :  { %2847 = vmatpush.msra.mxu2 %v3782_v43  ;;  %3022 = vmatpush.msrb.mxu3 %v3783_v8 }
 0xa6f   :  { %3634 = vmatmul.msk.f32.vlgmr.msra.gmra.mxu0 %vm258_vm3, %v5093_v49 }
 0xa70   :  { %3648 = vmatpush.xpose.msk.msrb.mxu0 %vm258_vm3, %v2176_v6 }
 0xa77   :  { %3635 = vmatmul.msk.f32.gmra.mxu0 %vm258_vm3, %v5083_v44 }
 0xa8f   :  { %v2174_v19 = vpop.permute.xlu0 %2173 }
 0xa90   :  { %3649 = vmatpush.xpose.msk.msrb.mxu0 %vm258_vm3, %v2174_v19 }
 0xa93   :  { %3650 = vmatmul.msk.f32.vlgmr.msrb.gmra.mxu0 %vm258_vm3, %v5106_v12 }
 0xa94   :  { %2917 = vmatpush.msra.mxu0 %v3793_v13 }
 0xa95   :  { %v1992_v60 = vpop.f32.mrf.mxu1 }
 0xa96   :  { %v2210_v17 = vmul.f32 0.35355338, %v1992_v60 }
 0xa97   :  { %v3776_v62 = vpop.permute.xlu0 %3775 }
 0xa98   :  { %v3777_v63 = vunpack.i.l.bf16 %v3776_v62  ;;  %v3778_v26 = vunpack.i.h.bf16 %v3776_v62  ;;  %v2230_v45 = vsel %vm551_vm4, %v2210_v17, -inf }
 0xa9a   :  { %2812 = vmatpush.msra.mxu1 %v3777_v63 }
 0xa9b   :  { %3651 = vmatmul.msk.f32.gmra.mxu0 %vm258_vm3, %v5081_v59 }
 0xa9c   :  { %2813 = vmatpush.msra.mxu1 %v3778_v26 }
 0xa9d   :  { %v1995_v27 = vpop.f32.mrf.mxu1 }
 0xa9e   :  { %2952 = vmatpush.msrb.mxu1 %v3792_v42  ;;  %v5151_v28 = vmul.f32 0.35355338, %v1995_v27 }
 0xa9f   :  { %v3786_v30 = vpop.permute.xlu0 %3785  ;;  %v2027_v46 = vpop.f32.mrf.mxu3 }
 0xaa0   :  { %v3788_v34 = vunpack.i.h.bf16 %v3786_v30  ;;  %v3787_v36 = vunpack.i.l.bf16 %v3786_v30  ;;  %v2233_v9 = vsel %vm551_vm4, %v5151_v28, -inf  ;;  %v5162_v29 = vmul.f32 0.35355338, %v2027_v46 }
 0xaa1   :  { %2234 = vmax.xlane.f32.xlu0 %v2233_v9 }
 0xaa2   :  { %2848 = vmatpush.msra.mxu2 %v3787_v36  ;;  %3023 = vmatpush.msrb.mxu3 %v3788_v34  ;;  %v2236_v51 = vsel %vm551_vm4, %v5162_v29, -inf }
 0xaa5   :  { %v1957_v38 = vpop.f32.mrf.mxu0 }
 0xaa6   :  { %v2208_v14 = vmul.f32 0.35355338, %v1957_v38 }
 0xaa7   :  { %v2030_v15 = vpop.f32.mrf.mxu3 }
 0xaa8   :  { %v2224_v39 = vsel %vm551_vm4, %v2208_v14, -inf  ;;  %v5190_v9 = vmul.f32 0.35355338, %v2030_v15 }
 0xaa9   :  { %2225 = vmax.xlane.f32.xlu1 %v2224_v39 }
 0xaad   :  { %v1960_v5 = vpop.f32.mrf.mxu0 }
 0xaae   :  { %v2209_v44 = vmul.f32 0.35355338, %v1960_v5 }
 0xab0   :  { %v2227_v32 = vsel %vm551_vm4, %v2209_v44, -inf }
 0xab1   :  { %2231 = vmax.xlane.f32.xlu1 %v2230_v45  ;;  %2228 = vmax.xlane.f32.xlu2 %v2227_v32 }
 0xab5   :  { %v2097_v35 = vpop.f32.mrf.mxu1 }
 0xab6   :  { %v5158_v50 = vmul.f32 0.35355338, %v2097_v35 }
 0xab8   :  { %v2248_v52 = vsel %vm551_vm4, %v5158_v50, -inf  ;;  %v2167_v61 = vpop.f32.mrf.mxu3 }
 0xab9   :  { %2249 = vmax.xlane.f32.xlu2 %v2248_v52 }
 0xabd   :  { %v2100_v56 = vpop.f32.mrf.mxu1 }
 0xabe   :  { %v5164_v33 = vmul.f32 0.35355338, %v2100_v56 }
 0xac0   :  { %v2251_v53 = vsel %vm551_vm4, %v5164_v33, -inf  ;;  %v2170_v3 = vpop.f32.mrf.mxu3 }
 0xac1   :  { %2237 = vmax.xlane.f32.xlu2 %v2236_v51  ;;  %2252 = vmax.xlane.f32.xlu1 %v2251_v53  ;;  %v5174_v21 = vmul.f32 0.35355338, %v2170_v3 }
 0xac3   :  { %v2263_v4 = vsel %vm551_vm4, %v5174_v21, -inf }
 0xad5   :  { %v2132_v1 = vpop.f32.mrf.mxu2 }
 0xad6   :  { %v5170_v2 = vmul.f32 0.35355338, %v2132_v1 }
 0xad8   :  { %v2254_v54 = vsel %vm551_vm4, %v5170_v2, -inf }
 0xad9   :  { %2255 = vmax.xlane.f32.xlu2 %v2254_v54 }
 0xadd   :  { %v2135_v54 = vpop.f32.mrf.mxu2 }
 0xae1   :  { %2264 = vmax.xlane.f32.xlu2 %v2263_v4 }
 0xaec   :  { %v2062_v6 = vpop.f32.mrf.mxu0 }
 0xaed   :  { %v5178_v47 = vmul.f32 0.35355338, %v2062_v6  ;;  %v5217_v6 = vmul.f32 0.35355338, %v2135_v54 }
 0xaef   :  { %v2242_v57 = vsel %vm551_vm4, %v5178_v47, -inf }
 0xaf0   :  { %2243 = vmax.xlane.f32.xlu1 %v2242_v57 }
 0xaf4   :  { %v2065_v7 = vpop.f32.mrf.mxu0 }
 0xaf5   :  { %v5207_v56 = vmul.f32 0.35355338, %v2065_v7 }
 0xb10   :  { %v2202_v8 = vpop.f32.mrf.mxu0 }
 0xb11   :  { %v5209_v53 = vmul.f32 0.35355338, %v2202_v8 }
 0xb13   :  { %v2266_v3 = vsel %vm551_vm4, %v5209_v53, -inf }
 0xb14   :  { %v2235_v45 = vpop.xlane.xlu0 %2234 }
 0xb15   :  { %v2275_v35 = vsub.f32 %v5151_v28, %v2235_v45  ;;  %v2245_v28 = vsel %vm551_vm4, %v5207_v56, -inf }
 0xb17   :  { %v2294_v51 = vmul.f32 1.442695, %v2275_v35 }
 0xb18   :  { %v2205_v43 = vpop.f32.mrf.mxu0 }
 0xb19   :  { %v5182_v11 = vmul.f32 0.35355338, %v2205_v43 }
 0xb1b   :  { %v2269_v13 = vsel %vm551_vm4, %v5182_v11, -inf }
 0xb1c   :  { %v2226_v19 = vpop.xlane.xlu1 %2225  ;;  %2270 = vmax.xlane.f32.xlu2 %v2269_v13 }
 0xb1d   :  { %v2272_v60 = vsub.f32 %v2208_v14, %v2226_v19  ;;  %v2239_v14 = vsel %vm551_vm4, %v5190_v9, -inf }
 0xb1f   :  { %v2288_v62 = vmul.f32 1.442695, %v2272_v60 }
 0xb21   :  { %3907 = vpow2.f32 %v2288_v62 }
 0xb24   :  { %v2229_v63 = vpop.xlane.xlu2 %2228  ;;  %v2232_v26 = vpop.xlane.xlu1 %2231 }
 0xb25   :  { %v2273_v42 = vsub.f32 %v2209_v44, %v2229_v63  ;;  %v2274_v34 = vsub.f32 %v2210_v17, %v2232_v26  ;;  %v5198_v44 = vmul.f32 0.35355338, %v2167_v61 }
 0xb27   :  { %v5186_v27 = vpop.eup %3907  ;;  %v2290_v30 = vmul.f32 1.442695, %v2273_v42  ;;  %v2292_v38 = vmul.f32 1.442695, %v2274_v34  ;;  %v2260_v52 = vsel %vm551_vm4, %v5198_v44, -inf  ;;  %v3799_v42 = vpack.i.bf16 %v5076_v16, %v5068_v40 }
 0xb28   :  { %v2320_v36 = vsel %vm551_vm4, %v5186_v27, 0.0 }
 0xb29   :  { %2321 = vadd.xlane.f32.xlu0 %v2320_v36  ;;  %3909 = vpow2.f32 %v2290_v30 }
 0xb2a   :  { %3911 = vpow2.f32 %v2292_v38 }
 0xb2b   :  { %3913 = vpow2.f32 %v2294_v51 }
 0xb2c   :  { %v2250_v17 = vpop.xlane.xlu2 %2249 }
 0xb2d   :  { %v2280_v61 = vsub.f32 %v5158_v50, %v2250_v17 }
 0xb2f   :  { %v5192_v39 = vpop.eup %3909  ;;  %v2304_v4 = vmul.f32 1.442695, %v2280_v61 }
 0xb30   :  { %v2323_v5 = vsel %vm551_vm4, %v5192_v39, 0.0  ;;  %v5200_v32 = vpop.eup %3911 }
 0xb31   :  { %2240 = vmax.xlane.f32.xlu0 %v2239_v14  ;;  %2324 = vadd.xlane.f32.xlu1 %v2323_v5  ;;  %v2326_v46 = vsel %vm551_vm4, %v5200_v32, 0.0  ;;  %v5219_v8 = vpop.eup %3913  ;;  %3915 = vpow2.f32 %v2304_v4 }
 0xb32   :  { %v2329_v43 = vsel %vm551_vm4, %v5219_v8, 0.0 }
 0xb34   :  { %v2238_v15 = vpop.xlane.xlu2 %2237  ;;  %v2253_v57 = vpop.xlane.xlu1 %2252 }
 0xb35   :  { %v2276_v1 = vsub.f32 %v5162_v29, %v2238_v15  ;;  %v2281_v50 = vsub.f32 %v5164_v33, %v2253_v57  ;;  %v2257_v29 = vsel %vm551_vm4, %v5217_v6, -inf }
 0xb37   :  { %v2296_v7 = vmul.f32 1.442695, %v2276_v1  ;;  %v2306_v13 = vmul.f32 1.442695, %v2281_v50  ;;  %v5226_v19 = vpop.eup %3915 }
 0xb38   :  { %v2344_v62 = vsel %vm551_vm4, %v5226_v19, 0.0 }
 0xb39   :  { %2261 = vmax.xlane.f32.xlu0 %v2260_v52  ;;  %2327 = vadd.xlane.f32.xlu1 %v2326_v46  ;;  %3917 = vpow2.f32 %v2296_v7 }
 0xb3a   :  { %3919 = vpow2.f32 %v2306_v13 }
 0xb3f   :  { %v5228_v60 = vpop.eup %3917 }
 0xb40   :  { %v2332_v33 = vsel %vm551_vm4, %v5228_v60, 0.0  ;;  %v5234_v63 = vpop.eup %3919 }
 0xb41   :  { %2246 = vmax.xlane.f32.xlu0 %v2245_v28  ;;  %2267 = vmax.xlane.f32.xlu1 %v2266_v3  ;;  %v2347_v26 = vsel %vm551_vm4, %v5234_v63, 0.0 }
 0xb49   :  { %2258 = vmax.xlane.f32.xlu0 %v2257_v29  ;;  %2330 = vadd.xlane.f32.xlu1 %v2329_v43 }
 0xb4c   :  { %v5241_v38 = vpop.xlane.xlu2 %2255 }
 0xb51   :  { %2345 = vadd.xlane.f32.xlu0 %v2344_v62  ;;  %2333 = vadd.xlane.f32.xlu1 %v2332_v33 }
 0xb59   :  { %2348 = vadd.xlane.f32.xlu0 %v2347_v26 }
 0xb63   :  { %v2244_v34 = vpop.xlane.xlu1 %2243 }
 0xb64   :  { %v2278_v40 = vsub.f32 %v5178_v47, %v2244_v34 }
 0xb66   :  { %v2300_v35 = vmul.f32 1.442695, %v2278_v40 }
 0xb6d   :  { %3800 = vrot.lane.b32.xlu0 %v3799_v42, %s6434_s15 }
 0xb9c   :  { %v2322_v30 = vpop.xlane.xlu0 %2321 }
 0xb9d   :  { %3921 = vrcp.f32 %v2322_v30 }
 0xba3   :  { %v3922_v36 = vpop.eup %3921 }
 0xba4   :  { %v2384_v14 = vmul.f32 %v3922_v36, %v5186_v27  ;;  %v2241_v5 = vpop.xlane.xlu0 %2240  ;;  %v2325_v45 = vpop.xlane.xlu1 %2324 }
 0xba5   :  { %v2277_v17 = vsub.f32 %v5190_v9, %v2241_v5  ;;  %3923 = vrcp.f32 %v2325_v45  ;;  %v2265_v27 = vpop.xlane.xlu2 %2264 }
 0xba6   :  { %3668 = vst.msk [vmem:[%s6425_s9 + $0x80] sm:$0xff] %vm551_vm4, %v2384_v14  ;;  %3684 = vmatmul.msk.f32.vlgmr.msra.gmra.mxu1 %vm551_vm4, %v2384_v14  ;;  %v2285_v29 = vsub.f32 %v5174_v21, %v2265_v27 }
 0xba7   :  { %v2298_v16 = vmul.f32 1.442695, %v2277_v17 }
 0xba8   :  { %v2314_v21 = vmul.f32 1.442695, %v2285_v29 }
 0xba9   :  { %3925 = vpow2.f32 %v2298_v16 }
 0xbab   :  { %v3924_v52 = vpop.eup %3923 }
 0xbac   :  { %v2262_v46 = vpop.xlane.xlu0 %2261  ;;  %v2328_v9 = vpop.xlane.xlu1 %2327  ;;  %v2385_v15 = vmul.f32 %v3924_v52, %v5192_v39 }
 0xbad   :  { %v2284_v51 = vsub.f32 %v5198_v44, %v2262_v46  ;;  %3927 = vrcp.f32 %v2328_v9  ;;  %v2271_v54 = vpop.xlane.xlu2 %2270 }
 0xbae   :  { %3929 = vpow2.f32 %v2300_v35  ;;  %3669 = vst.msk [vmem:[%s6425_s9 + $0x88] sm:$0xff] %vm551_vm4, %v2385_v15  ;;  %3685 = vmatmul.msk.f32.gmra.mxu1 %vm551_vm4, %v2385_v15  ;;  %v2287_v13 = vsub.f32 %v5182_v11, %v2271_v54 }
 0xbaf   :  { %v5253_v61 = vpop.eup %3925  ;;  %v2312_v1 = vmul.f32 1.442695, %v2284_v51 }
 0xbb0   :  { %v2335_v47 = vsel %vm551_vm4, %v5253_v61, 0.0  ;;  %v2318_v62 = vmul.f32 1.442695, %v2287_v13 }
 0xbb1   :  { %3931 = vpow2.f32 %v2312_v1  ;;  %2336 = vadd.xlane.f32.xlu1 %v2335_v47 }
 0xbb3   :  { %v3928_v44 = vpop.eup %3927 }
 0xbb4   :  { %v2247_v28 = vpop.xlane.xlu0 %2246  ;;  %v5262_v39 = vpop.eup %3929  ;;  %v2386_v3 = vmul.f32 %v3928_v44, %v5200_v32 }
 0xbb5   :  { %v2279_v4 = vsub.f32 %v5207_v56, %v2247_v28  ;;  %v2268_v57 = vpop.xlane.xlu1 %2267 }
 0xbb6   :  { %v2286_v7 = vsub.f32 %v5209_v53, %v2268_v57  ;;  %3670 = vst.msk [vmem:[%s6425_s9 + $0x90] sm:$0xff] %vm551_vm4, %v2386_v3  ;;  %3686 = vmatmul.msk.f32.vlgmr.msra.gmra.mxu2 %vm551_vm4, %v2386_v3  ;;  %v2338_v53 = vsel %vm551_vm4, %v5262_v39, 0.0 }
 0xbb7   :  { %v5267_v50 = vpop.eup %3931  ;;  %v2302_v43 = vmul.f32 1.442695, %v2279_v4 }
 0xbb8   :  { %v2316_v32 = vmul.f32 1.442695, %v2286_v7  ;;  %v2356_v56 = vsel %vm551_vm4, %v5267_v50, 0.0 }
 0xbb9   :  { %3933 = vpow2.f32 %v2302_v43  ;;  %2357 = vadd.xlane.f32.xlu2 %v2356_v56  ;;  %2339 = vadd.xlane.f32.xlu1 %v2338_v53 }
 0xbba   :  { %3935 = vpow2.f32 %v2316_v32 }
 0xbbc   :  { %v2259_v33 = vpop.xlane.xlu0 %2258 }
 0xbbd   :  { %v2331_v26 = vpop.xlane.xlu1 %2330  ;;  %v2283_v11 = vsub.f32 %v5217_v6, %v2259_v33 }
 0xbbe   :  { %3937 = vrcp.f32 %v2331_v26 }
 0xbbf   :  { %v5280_v42 = vpop.eup %3933  ;;  %3939 = vpow2.f32 %v2314_v21  ;;  %v2310_v14 = vmul.f32 1.442695, %v2283_v11 }
 0xbc0   :  { %v5283_v30 = vpop.eup %3935  ;;  %3941 = vpow2.f32 %v2318_v62  ;;  %v2341_v34 = vsel %vm551_vm4, %v5280_v42, 0.0 }
 0xbc1   :  { %2342 = vadd.xlane.f32.xlu2 %v2341_v34  ;;  %v2362_v36 = vsel %vm551_vm4, %v5283_v30, 0.0 }
 0xbc2   :  { %2363 = vadd.xlane.f32.xlu0 %v2362_v36 }
 0xbc4   :  { %v3938_v5 = vpop.eup %3937  ;;  %v2346_v17 = vpop.xlane.xlu0 %2345 }
 0xbc5   :  { %v5289_v45 = vpop.eup %3939  ;;  %3943 = vrcp.f32 %v2346_v17  ;;  %v2334_v40 = vpop.xlane.xlu1 %2333  ;;  %v2387_v6 = vmul.f32 %v3938_v5, %v5219_v8 }
 0xbc6   :  { %v5292_v16 = vpop.eup %3941  ;;  %3945 = vrcp.f32 %v2334_v40  ;;  %v2359_v35 = vsel %vm551_vm4, %v5289_v45, 0.0 }
 0xbc7   :  { %3947 = vpow2.f32 %v2310_v14  ;;  %3671 = vst.msk [vmem:[%s6425_s9 + $0x98] sm:$0xff] %vm551_vm4, %v2387_v6  ;;  %3687 = vmatmul.msk.f32.gmra.mxu2 %vm551_vm4, %v2387_v6  ;;  %v2365_v52 = vsel %vm551_vm4, %v5292_v16, 0.0 }
 0xbc9   :  { %2360 = vadd.xlane.f32.xlu2 %v2359_v35 }
 0xbca   :  { %2366 = vadd.xlane.f32.xlu0 %v2365_v52 }
 0xbcb   :  { %v3944_v8 = vpop.eup %3943 }
 0xbcc   :  { %v3946_v46 = vpop.eup %3945  ;;  %v5304_v27 = vmul.f32 %v3944_v8, %v5226_v19  ;;  %v2349_v51 = vpop.xlane.xlu0 %2348  ;;  %v3794_v19 = vpack.i.bf16 %v5093_v49, %v5070_v20  ;;  %v3804_v20 = vpack.i.bf16 %v5106_v12, %v5081_v59  ;;  %v2282_v49 = vsub.f32 %v5170_v2, %v5241_v38 }
 0xbcd   :  { %v5306_v9 = vpop.eup %3947  ;;  %v2388_v15 = vmul.f32 %v3946_v46, %v5228_v60  ;;  %3949 = vrcp.f32 %v2349_v51 }
 0xbce   :  { %3676 = vst.msk [vmem:[%s6425_s9 + $0xc0] sm:$0xff] %vm551_vm4, %v5304_v27  ;;  %v2353_v60 = vsel %vm551_vm4, %v5306_v9, 0.0 }
 0xbcf   :  { %3672 = vst.msk [vmem:[%s6425_s9 + $0xa0] sm:$0xff] %vm551_vm4, %v2388_v15  ;;  %3688 = vmatmul.msk.f32.vlgmr.msra.gmra.mxu3 %vm551_vm4, %v2388_v15 }
 0xbd1   :  { %2354 = vadd.xlane.f32.xlu2 %v2353_v60 }
 0xbd2   :  { %3795 = vrot.lane.b32.xlu1 %v3794_v19, %s6434_s15 }
 0xbd3   :  { %v3950_v1 = vpop.eup %3949 }
 0xbd4   :  { %v5325_v47 = vmul.f32 %v3950_v1, %v5234_v63  ;;  %v2308_v63 = vmul.f32 1.442695, %v2282_v49 }
 0xbd6   :  { %3677 = vst.msk [vmem:[%s6425_s9 + $0xc8] sm:$0xff] %vm551_vm4, %v5325_v47  ;;  %3951 = vpow2.f32 %v2308_v63  ;;  %v3129_v63 = vld [vmem:[%s6378_s17 + $0x18] sm:$0xff] }
 0xbdc   :  { %v5337_v3 = vpop.eup %3951 }
 0xbdd   :  { %v2350_v4 = vsel %vm551_vm4, %v5337_v3, 0.0 }
 0xbdf   :  { %v3801_v44 = vpop.permute.xlu0 %3800 }
 0xbe0   :  { %v3802_v28 = vunpack.i.l.bf16 %v3801_v44  ;;  %v3803_v54 = vunpack.i.h.bf16 %v3801_v44 }
 0xbe2   :  { %2987 = vmatpush.msrb.mxu2 %v3802_v28 }
 0xbe4   :  { %2988 = vmatpush.msrb.mxu2 %v3803_v54 }
 0xbe9   :  { %3805 = vrot.lane.b32.xlu2 %v3804_v20, %s6434_s15 }
 0xbfc   :  { %2351 = vadd.xlane.f32.xlu1 %v2350_v4 }
 0xc23   :  { %v2815_v46 = vpop.f32.mrf.mxu1 }
 0xc24   :  { %v2337_v57 = vpop.xlane.xlu1 %2336 }
 0xc25   :  { %3953 = vrcp.f32 %v2337_v57  ;;  %v3127_v57 = vld [vmem:[%s6378_s17 + $0x8] sm:$0xff] }
 0xc2b   :  { %v3954_v7 = vpop.eup %3953 }
 0xc2c   :  { %v2340_v29 = vpop.xlane.xlu1 %2339  ;;  %v2389_v43 = vmul.f32 %v3954_v7, %v5253_v61  ;;  %v2358_v59 = vpop.xlane.xlu2 %2357  ;;  %v3126_v7 = vld [vmem:[%s6378_s17] sm:$0xff] }
 0xc2d   :  { %3955 = vrcp.f32 %v2340_v29 }
 0xc2e   :  { %3957 = vrcp.f32 %v2358_v59  ;;  %3673 = vst.msk [vmem:[%s6425_s9 + $0xa8] sm:$0xff] %vm551_vm4, %v2389_v43  ;;  %3689 = vmatmul.msk.f32.gmra.mxu3 %vm551_vm4, %v2389_v43 }
 0xc33   :  { %v3956_v12 = vpop.eup %3955 }
 0xc34   :  { %v3958_v2 = vpop.eup %3957  ;;  %v2390_v38 = vmul.f32 %v3956_v12, %v5262_v39  ;;  %v2343_v56 = vpop.xlane.xlu2 %2342 }
 0xc35   :  { %v2396_v13 = vmul.f32 %v3958_v2, %v5267_v50  ;;  %v2364_v32 = vpop.xlane.xlu0 %2363 }
 0xc36   :  { %3674 = vst.msk [vmem:[%s6425_s9 + $0xb0] sm:$0xff] %vm551_vm4, %v2390_v38  ;;  %3959 = vrcp.f32 %v2364_v32 }
 0xc37   :  { %3680 = vst.msk [vmem:[%s6425_s9 + $0xe0] sm:$0xff] %vm551_vm4, %v2396_v13  ;;  %3961 = vrcp.f32 %v2343_v56  ;;  %3696 = vmatmul.msk.f32.vlgmr.msrb.gmra.mxu3 %vm551_vm4, %v2396_v13 }
 0xc39   :  { %v2850_v28 = vpop.f32.mrf.mxu2 }
 0xc3c   :  { %v3960_v61 = vpop.eup %3959  ;;  %v2361_v21 = vpop.xlane.xlu2 %2360 }
 0xc3d   :  { %v3962_v39 = vpop.eup %3961  ;;  %v2398_v50 = vmul.f32 %v3960_v61, %v5283_v30  ;;  %v2367_v53 = vpop.xlane.xlu0 %2366 }
 0xc3e   :  { %3963 = vrcp.f32 %v2367_v53  ;;  %v2391_v62 = vmul.f32 %v3962_v39, %v5280_v42 }
 0xc3f   :  { %3682 = vst.msk [vmem:[%s6425_s9 + $0xf0] sm:$0xff] %vm551_vm4, %v2398_v50  ;;  %3965 = vrcp.f32 %v2361_v21 }
 0xc40   :  { %3675 = vst.msk [vmem:[%s6425_s9 + $0xb8] sm:$0xff] %vm551_vm4, %v2391_v62 }
 0xc44   :  { %v3964_v33 = vpop.eup %3963  ;;  %v3796_v26 = vpop.permute.xlu1 %3795 }
 0xc45   :  { %v3966_v11 = vpop.eup %3965  ;;  %v3798_v30 = vunpack.i.h.bf16 %v3796_v26  ;;  %v3797_v34 = vunpack.i.l.bf16 %v3796_v26  ;;  %v2355_v36 = vpop.xlane.xlu2 %2354  ;;  %v2399_v14 = vmul.f32 %v3964_v33, %v5292_v16 }
 0xc46   :  { %3967 = vrcp.f32 %v2355_v36  ;;  %v2397_v42 = vmul.f32 %v3966_v11, %v5289_v45 }
 0xc47   :  { %2918 = vmatpush.msra.mxu0 %v3798_v30  ;;  %2953 = vmatpush.msrb.mxu1 %v3797_v34  ;;  %3683 = vst.msk [vmem:[%s6425_s9 + $0xf8] sm:$0xff] %vm551_vm4, %v2399_v14 }
 0xc48   :  { %3681 = vst.msk [vmem:[%s6425_s9 + $0xe8] sm:$0xff] %vm551_vm4, %v2397_v42  ;;  %3697 = vmatmul.msk.f32.gmra.mxu3 %vm551_vm4, %v2397_v42  ;;  %3690 = vmatmul.msk.f32.vlgmr.msra.gmra.mxu0 %vm551_vm4, %v2390_v38 }
 0xc49   :  { %3692 = vmatmul.msk.f32.vlgmr.msrb.gmra.mxu1 %vm551_vm4, %v5304_v27  ;;  %v2818_v27 = vpop.f32.mrf.mxu1 }
 0xc4a   :  { %v2853_v54 = vpop.f32.mrf.mxu2  ;;  %3154 = vmatpush.msra.mxu1 %v3129_v63 }
 0xc4c   :  { %v3968_v5 = vpop.eup %3967 }
 0xc4d   :  { %v3806_v17 = vpop.permute.xlu2 %3805  ;;  %v2395_v45 = vmul.f32 %v3968_v5, %v5306_v9 }
 0xc4e   :  { %v3807_v40 = vunpack.i.l.bf16 %v3806_v17  ;;  %v3808_v6 = vunpack.i.h.bf16 %v3806_v17 }
 0xc4f   :  { %3679 = vst.msk [vmem:[%s6425_s9 + $0xd8] sm:$0xff] %vm551_vm4, %v2395_v45 }
 0xc50   :  { %3057 = vmatpush.msrb.mxu0 %v3807_v40 }
 0xc51   :  { %3691 = vmatmul.msk.f32.gmra.mxu0 %vm551_vm4, %v2391_v62  ;;  %3693 = vmatmul.msk.f32.gmra.mxu1 %vm551_vm4, %v5325_v47 }
 0xc52   :  { %v2885_v16 = vpop.f32.mrf.mxu3  ;;  %3058 = vmatpush.msrb.mxu0 %v3808_v6 }
 0xc53   :  { %3070 = vrot.lane.b32.xlu1 %v2885_v16, %s6435_s12 }
 0xc59   :  { %3698 = vmatmul.msk.f32.vlgmr.msrb.gmra.mxu0 %vm551_vm4, %v2398_v50 }
 0xc61   :  { %3699 = vmatmul.msk.f32.gmra.mxu0 %vm551_vm4, %v2399_v14 }
 0xc6f   :  { %v2352_v35 = vpop.xlane.xlu1 %2351 }
 0xc70   :  { %3969 = vrcp.f32 %v2352_v35 }
 0xc71   :  { %3971 = vrcp.f32 %v4395_v22 }
 0xc72   :  { %3973 = vrcp.f32 %v4405_v24 }
 0xc73   :  { %3975 = vrcp.f32 %v4397_v23 }
 0xc76   :  { %v3970_v52 = vpop.eup %3969 }
 0xc77   :  { %v2394_v8 = vmul.f32 %v3970_v52, %v5337_v3  ;;  %v3128_v3 = vld [vmem:[%s6378_s17 + $0x10] sm:$0xff]  ;;  %s4188_s17 = smov 127  }
 0xc78   :  { %3155 = vmatpush.msra.mxu1 %v3128_v3 }
 0xc79   :  { %3678 = vst.msk [vmem:[%s6425_s9 + $0xd0] sm:$0xff] %vm551_vm4, %v2394_v8  ;;  %3694 = vmatmul.msk.f32.vlgmr.msrb.gmra.mxu2 %vm551_vm4, %v2394_v8  ;;  %s6437_s9 = smov 24  }
 0xc7a   :  { %3156 = vmatpush.msra.mxu1 %v3127_v57 }
 0xc7c   :  { %3157 = vmatpush.msra.mxu1 %v3126_v7 }
 0xc81   :  { %3695 = vmatmul.msk.f32.gmra.mxu2 %vm551_vm4, %v2395_v45 }
 0xcb1   :  { %v2888_v15 = vpop.f32.mrf.mxu3 }
 0xcba   :  { %v3025_v60 = vpop.f32.mrf.mxu3 }
 0xcc5   :  { %v2920_v51 = vpop.f32.mrf.mxu0  ;;  %v3071_v59 = vpop.permute.xlu1 %3070 }
 0xcc6   :  { %v2955_v9 = vpop.f32.mrf.mxu1  ;;  %3074 = vrot.lane.b32.xlu0 %v2920_v51, %s6435_s12  ;;  %v3114_v12 = vsel %vm258_vm3, %v2815_v46, %v3071_v59 }
 0xcc7   :  { %3086 = vrot.lane.b32.xlu2 %v2955_v9, %s6436_s30 }
 0xccb   :  { %v3028_v47 = vpop.f32.mrf.mxu3 }
 0xcce   :  { %v2958_v19 = vpop.f32.mrf.mxu1  ;;  %v2923_v1 = vpop.f32.mrf.mxu0 }
 0xccf   :  { %3088 = vrot.lane.b32.xlu1 %v2958_v19, %s6436_s30  ;;  %3072 = vrot.lane.b32.xlu2 %v2888_v15, %s6435_s12 }
 0xcd6   :  { %v3060_v44 = vpop.f32.mrf.mxu0 }
 0xcd7   :  { %3102 = vrot.lane.b32.xlu2 %v3025_v60, %s6437_s9 }
 0xcde   :  { %v3063_v4 = vpop.f32.mrf.mxu0 }
 0xcdf   :  { %3104 = vrot.lane.b32.xlu2 %v3028_v47, %s6437_s9 }
 0xce7   :  { %3106 = vrot.lane.b32.xlu2 %v3060_v44, %s6437_s9 }
 0xcfc   :  { %v2990_v20 = vpop.f32.mrf.mxu2 }
 0xcfd   :  { %3090 = vrot.lane.b32.xlu1 %v2990_v20, %s6436_s30 }
 0xd04   :  { %v2993_v49 = vpop.f32.mrf.mxu2 }
 0xd05   :  { %3076 = vrot.lane.b32.xlu1 %v2923_v1, %s6435_s12  ;;  %3092 = vrot.lane.b32.xlu2 %v2993_v49, %s6436_s30 }
 0xd0d   :  { %3108 = vrot.lane.b32.xlu1 %v3063_v4, %s6437_s9  ;;  %v5474_v4 = vpop.eup %3971 }
 0xd21   :  { %v3087_v29 = vpop.permute.xlu2 %3086 }
 0xd22   :  { %v3118_v2 = vsel %vm551_vm4, %v3114_v12, %v3087_v29  ;;  %v760_v29 = vmul.f32 %v5474_v4, %v5474_v4 }
 0xd29   :  { %v3073_v43 = vpop.permute.xlu2 %3072 }
 0xd2a   :  { %v3115_v32 = vsel %vm258_vm3, %v2818_v27, %v3073_v43 }
 0xd31   :  { %v3103_v38 = vpop.permute.xlu2 %3102 }
 0xd32   :  { %v3122_v13 = vsel %vm1448_vm5, %v3118_v2, %v3103_v38  ;;  %v3277_v2 = vld [vmem:[%s6381_s20 + $0x10] sm:$0xff]  ;;  %v5509_v38 = vpop.eup %3973 }
 0xd33   :  { %3700 = vmatmul.msk.f32.vlgmr.msra.gmra.mxu1 %vm148_vm2, %v3122_v13  ;;  %v3276_v13 = vld [vmem:[%s6381_s20 + $0x8] sm:$0xff] }
 0xd38   :  { %v3075_v53 = vpop.permute.xlu0 %3074 }
 0xd39   :  { %v3105_v61 = vpop.permute.xlu2 %3104  ;;  %v3116_v21 = vsel %vm258_vm3, %v2850_v28, %v3075_v53  ;;  %v4189_v28 = vmov 96   ;;  %v5529_v53 = vpop.eup %3975 }
 0xd3a   :  { %3810 = vset.pattern.permute.xlu0 %v4189_v28  ;;  %3809 = vset.pattern.permute.xlu1 %v4189_v28 }
 0xd3b   :  { %3811 = vset.pattern.permute.xlu2 %v4189_v28 }
 0xd41   :  { %v3089_v56 = vpop.permute.xlu1 %3088  ;;  %v3107_v33 = vpop.permute.xlu2 %3106 }
 0xd42   :  { %v3119_v39 = vsel %vm551_vm4, %v3115_v32, %v3089_v56  ;;  %v3275_v32 = vld [vmem:[%s6381_s20] sm:$0xff]  ;;  %v762_v56 = vmul.f32 %v5509_v38, %v5509_v38 }
 0xd43   :  { %v3123_v50 = vsel %vm1448_vm5, %v3119_v39, %v3105_v61 }
 0xd44   :  { %3701 = vmatmul.msk.f32.gmra.mxu1 %vm148_vm2, %v3123_v50 }
 0xd5f   :  { %v3093_v36 = vpop.permute.xlu2 %3092 }
 0xd6f   :  { %v3091_v62 = vpop.permute.xlu1 %3090 }
 0xd70   :  { %v3120_v26 = vsel %vm551_vm4, %v3116_v21, %v3091_v62 }
 0xd71   :  { %v3124_v11 = vsel %vm1448_vm5, %v3120_v26, %v3107_v33  ;;  %v761_v33 = vmul.f32 %v5529_v53, %v5529_v53 }
 0xd72   :  { %3702 = vmatmul.msk.f32.gmra.mxu1 %vm148_vm2, %v3124_v11 }
 0xd77   :  { %v3077_v30 = vpop.permute.xlu1 %3076 }
 0xd78   :  { %v3117_v34 = vsel %vm258_vm3, %v2853_v54, %v3077_v30 }
 0xd79   :  { %v3121_v42 = vsel %vm551_vm4, %v3117_v34, %v3093_v36 }
 0xd7f   :  { %v3109_v14 = vpop.permute.xlu1 %3108 }
 0xd80   :  { %v3125_v5 = vsel %vm1448_vm5, %v3121_v42, %v3109_v14  ;;  %v5541_v14 = vld [vmem:[%s6379_s18] ss:$0 sm:$0xff] }
 0xd81   :  { %3703 = vmatmul.msk.f32.gmra.mxu1 %vm148_vm2, %v3125_v5 }
 0xdb0   :  { %v3159_v17 = vpop.f32.mrf.mxu1 }
 0xdb1   :  { %v3160_v45 = vadd.f32 %v3159_v17, %v5000_v55  ;;  %v5549_v17 = vld [vmem:[%s6380_s19] ss:$0 sm:$0xff] }
 0xdb3   :  { %v3173_v40 = vsel %vm148_vm2, %v3160_v45, 0.0 }
 0xdb4   :  { %3174 = vadd.xlane.f32.xlu2 %v3173_v40 }
 0xdc1   :  { %v3162_v6 = vpop.f32.mrf.mxu1 }
 0xdc2   :  { %v3163_v16 = vadd.f32 %v3162_v6, %v5004_v18 }
 0xdc4   :  { %v3176_v35 = vsel %vm148_vm2, %v3163_v16, 0.0 }
 0xdc5   :  { %3177 = vadd.xlane.f32.xlu0 %v3176_v35 }
 0xdef   :  { %v3165_v52 = vpop.f32.mrf.mxu1 }
 0xdf0   :  { %v3166_v8 = vadd.f32 %v3165_v52, %v5011_v0 }
 0xdf2   :  { %v3179_v46 = vsel %vm148_vm2, %v3166_v8, 0.0 }
 0xdf3   :  { %3180 = vadd.xlane.f32.xlu1 %v3179_v46 }
 0xdfe   :  { %v3168_v27 = vpop.f32.mrf.mxu1 }
 0xdff   :  { %v3169_v51 = vadd.f32 %v3168_v27, %v5016_v37 }
 0xe01   :  { %v3182_v55 = vsel %vm148_vm2, %v3169_v51, 0.0 }
 0xe02   :  { %3183 = vadd.xlane.f32.xlu2 %v3182_v55 }
 0xe27   :  { %v3175_v9 = vpop.xlane.xlu2 %3174 }
 0xe28   :  { %v3185_v15 = vmul.f32 %v3175_v9, %v4840_v58 }
 0xe2a   :  { %v5448_v19 = vsub.f32 %v3160_v45, %v3185_v15 }
 0xe2c   :  { %v3193_v18 = vmul.f32 %v5448_v19, %v5448_v19 }
 0xe2e   :  { %v3197_v60 = vsel %vm148_vm2, %v3193_v18, 0.0 }
 0xe2f   :  { %3198 = vadd.xlane.f32.xlu0 %v3197_v60 }
 0xe38   :  { %v3178_v0 = vpop.xlane.xlu0 %3177 }
 0xe39   :  { %v3186_v1 = vmul.f32 %v3178_v0, %v4840_v58 }
 0xe3b   :  { %v5454_v47 = vsub.f32 %v3163_v16, %v3186_v1 }
 0xe3d   :  { %v3194_v37 = vmul.f32 %v5454_v47, %v5454_v47 }
 0xe3f   :  { %v3200_v44 = vsel %vm148_vm2, %v3194_v37, 0.0 }
 0xe40   :  { %3201 = vadd.xlane.f32.xlu1 %v3200_v44 }
 0xe59   :  { %218 = vrot.lane.b32.xlu1 %v4395_v22, %s4188_s17 }
 0xe61   :  { %224 = vrot.lane.b32.xlu1 %v4413_v25, %s4188_s17 }
 0xe66   :  { %v3181_v54 = vpop.xlane.xlu1 %3180 }
 0xe67   :  { %v3187_v20 = vmul.f32 %v3181_v54, %v4840_v58 }
 0xe69   :  { %v5464_v49 = vsub.f32 %v3166_v8, %v3187_v20  ;;  %230 = vrot.lane.b32.xlu1 %v4395_v22, %s4190_s11 }
 0xe6b   :  { %v3195_v63 = vmul.f32 %v5464_v49, %v5464_v49 }
 0xe6d   :  { %v3203_v3 = vsel %vm148_vm2, %v3195_v63, 0.0 }
 0xe6e   :  { %3204 = vadd.xlane.f32.xlu2 %v3203_v3 }
 0xe71   :  { %242 = vrot.lane.b32.xlu1 %v4395_v22, %s4191_s16  ;;  %v3278_v22 = vld [vmem:[%s6381_s20 + $0x18] sm:$0xff] }
 0xe72   :  { %3307 = vmatpush.msra.mxu2 %v3278_v22 }
 0xe74   :  { %3308 = vmatpush.msra.mxu2 %v3277_v2 }
 0xe75   :  { %v3184_v57 = vpop.xlane.xlu2 %3183 }
 0xe76   :  { %v3188_v7 = vmul.f32 %v3184_v57, %v4840_v58  ;;  %3309 = vmatpush.msra.mxu2 %v3276_v13 }
 0xe78   :  { %v5479_v43 = vsub.f32 %v3169_v51, %v3188_v7  ;;  %3310 = vmatpush.msra.mxu2 %v3275_v32 }
 0xe79   :  { %778 = vperm.xlu1 %3809, %v760_v29  }
 0xe7a   :  { %v3196_v59 = vmul.f32 %v5479_v43, %v5479_v43 }
 0xe7c   :  { %v3206_v12 = vsel %vm148_vm2, %v3196_v59, 0.0 }
 0xe7d   :  { %3207 = vadd.xlane.f32.xlu0 %v3206_v12 }
 0xe81   :  { %1894 = vrot.lane.b32.xlu1 %v5026_v48, %s4188_s17 }
 0xe86   :  { %220 = vrot.lane.b32.xlu2 %v4397_v23, %s4188_s17 }
 0xe89   :  { %1898 = vrot.lane.b32.xlu1 %v5040_v10, %s4188_s17 }
 0xe8e   :  { %234 = vrot.lane.b32.xlu2 %v4405_v24, %s4190_s11 }
 0xe91   :  { %1908 = vrot.lane.b32.xlu1 %v5036_v31, %s4190_s11  ;;  %222 = vrot.lane.b32.xlu0 %v4405_v24, %s4188_s17 }
 0xe96   :  { %244 = vrot.lane.b32.xlu2 %v4397_v23, %s4191_s16 }
 0xe99   :  { %1918 = vrot.lane.b32.xlu1 %v5026_v48, %s4191_s16  ;;  %232 = vrot.lane.b32.xlu0 %v4397_v23, %s4190_s11 }
 0xe9e   :  { %248 = vrot.lane.b32.xlu2 %v4413_v25, %s4191_s16 }
 0xea1   :  { %788 = vperm.xlu1 %3809, %v762_v56   ;;  %236 = vrot.lane.b32.xlu0 %v4413_v25, %s4190_s11 }
 0xea2   :  { %v3199_v61 = vpop.xlane.xlu0 %3198 }
 0xea3   :  { %v3209_v39 = vmul.f32 %v3199_v61, %v4840_v58 }
 0xea5   :  { %v3213_v50 = vadd.f32 1e-05, %v3209_v39 }
 0xea6   :  { %1892 = vrot.lane.b32.xlu2 %v5020_v41, %s4188_s17 }
 0xea7   :  { %3977 = vrsqrt.f32 %v3213_v50  ;;  %vm3223_vm5 = vweird.f32 %v3213_v50 }
 0xea9   :  { %246 = vrot.lane.b32.xlu0 %v4405_v24, %s4191_s16 }
 0xead   :  { %v3978_v21 = vpop.eup %3977 }
 0xeae   :  { %v3218_v62 = vmul.f32 %v3978_v21, %v3213_v50  ;;  %1896 = vrot.lane.b32.xlu2 %v5036_v31, %s4188_s17  ;;  %vm3224_vm3 = vweird.f32 %v3978_v21 }
 0xeaf   :  { %vm3225_vm7 = vmor %vm3223_vm5, %vm3224_vm3 }
 0xeb0   :  { %v3219_v26 = vmul.f32 %v3978_v21, %v3218_v62 }
 0xeb1   :  { %783 = vperm.xlu0 %3810, %v761_v33  }
 0xeb2   :  { %v3220_v11 = vmul.f32 0.5, %v3219_v26 }
 0xeb3   :  { %v3202_v30 = vpop.xlane.xlu1 %3201 }
 0xeb4   :  { %v3221_v34 = vsub.f32 1.5, %v3220_v11  ;;  %v3210_v23 = vmul.f32 %v3202_v30, %v4840_v58 }
 0xeb6   :  { %v3222_v36 = vmul.f32 %v3978_v21, %v3221_v34  ;;  %v3214_v24 = vadd.f32 1e-05, %v3210_v23  ;;  %1906 = vrot.lane.b32.xlu2 %v5026_v48, %s4190_s11 }
 0xeb8   :  { %v3226_v42 = vsel %vm3225_vm7, %v3978_v21, %v3222_v36  ;;  %3979 = vrsqrt.f32 %v3214_v24  ;;  %vm3233_vm9 = vweird.f32 %v3214_v24 }
 0xeb9   :  { %v3257_v5 = vmul.f32 %v3226_v42, %v5448_v19  ;;  %1904 = vrot.lane.b32.xlu0 %v5020_v41, %s4190_s11  ;;  %3981 = vrcp.f32 %v4413_v25 }
 0xebb   :  { %v3264_v45 = vmul.f32 %v5541_v14, %v3257_v5 }
 0xebd   :  { %v5553_v40 = vadd.f32 %v5549_v17, %v3264_v45 }
 0xebe   :  { %v3980_v6 = vpop.eup %3979  ;;  %1916 = vrot.lane.b32.xlu2 %v5020_v41, %s4191_s16 }
 0xebf   :  { %v3228_v16 = vmul.f32 %v3980_v6, %v3214_v24  ;;  %3704 = vmatmul.msk.f32.vlgmr.msra.gmra.mxu2 %vm148_vm2, %v5553_v40  ;;  %vm3234_vm8 = vweird.f32 %v3980_v6  ;;  %v5567_v9 = vpop.eup %3981 }
 0xec0   :  { %vm3235_vm10 = vmor %vm3233_vm9, %vm3234_vm8  ;;  %v763_v25 = vmul.f32 %v5567_v9, %v5567_v9 }
 0xec1   :  { %v3229_v35 = vmul.f32 %v3980_v6, %v3228_v16  ;;  %1910 = vrot.lane.b32.xlu0 %v5040_v10, %s4190_s11 }
 0xec3   :  { %v3230_v52 = vmul.f32 0.5, %v3229_v35 }
 0xec5   :  { %v3231_v8 = vsub.f32 1.5, %v3230_v52 }
 0xec6   :  { %1922 = vrot.lane.b32.xlu2 %v5040_v10, %s4191_s16 }
 0xec7   :  { %v3232_v46 = vmul.f32 %v3980_v6, %v3231_v8 }
 0xec9   :  { %v3236_v27 = vsel %vm3235_vm10, %v3980_v6, %v3232_v46  ;;  %1920 = vrot.lane.b32.xlu0 %v5036_v31, %s4191_s16  ;;  %v3342_v46 = vld [vmem:[%s6383_s22 + $0x70] sm:$0xff] }
 0xeca   :  { %v3258_v51 = vmul.f32 %v3236_v27, %v5454_v47 }
 0xecb   :  { %v219_v55 = vpop.permute.xlu1 %218 }
 0xecc   :  { %3983 = vrcp.f32 %v219_v55  ;;  %v3265_v15 = vmul.f32 %v5541_v14, %v3258_v51 }
 0xece   :  { %v5571_v19 = vadd.f32 %v5549_v17, %v3265_v15 }
 0xed0   :  { %3705 = vmatmul.msk.f32.gmra.mxu2 %vm148_vm2, %v5571_v19 }
 0xed1   :  { %793 = vperm.xlu0 %3810, %v763_v25  }
 0xed2   :  { %v5577_v18 = vpop.eup %3983 }
 0xed3   :  { %v225_v60 = vpop.permute.xlu1 %224  ;;  %v764_v0 = vmul.f32 %v5577_v18, %v5577_v18 }
 0xed4   :  { %3985 = vrcp.f32 %v225_v60 }
 0xed5   :  { %798 = vperm.xlu2 %3811, %v764_v0  }
 0xeda   :  { %v5581_v1 = vpop.eup %3985 }
 0xedb   :  { %v767_v47 = vmul.f32 %v5581_v1, %v5581_v1  ;;  %v231_v63 = vpop.permute.xlu1 %230 }
 0xedd   :  { %813 = vperm.xlu2 %3811, %v767_v47  }
 0xee1   :  { %v3205_v37 = vpop.xlane.xlu2 %3204 }
 0xee2   :  { %v3211_v44 = vmul.f32 %v3205_v37, %v4840_v58  ;;  %v3338_v37 = vld [vmem:[%s6383_s22 + $0x50] sm:$0xff] }
 0xee3   :  { %v243_v0 = vpop.permute.xlu1 %242 }
 0xee4   :  { %v3215_v28 = vadd.f32 1e-05, %v3211_v44 }
 0xee6   :  { %3987 = vrsqrt.f32 %v3215_v28  ;;  %vm3243_vm12 = vweird.f32 %v3215_v28 }
 0xee9   :  { %v221_v54 = vpop.permute.xlu2 %220 }
 0xeea   :  { %3989 = vrcp.f32 %v221_v54 }
 0xeeb   :  { %3991 = vrcp.f32 %v231_v63 }
 0xeec   :  { %v3988_v20 = vpop.eup %3987 }
 0xeed   :  { %v3238_v3 = vmul.f32 %v3988_v20, %v3215_v28  ;;  %vm3244_vm11 = vweird.f32 %v3988_v20 }
 0xeee   :  { %vm3245_vm13 = vmor %vm3243_vm12, %vm3244_vm11 }
 0xeef   :  { %v3239_v57 = vmul.f32 %v3988_v20, %v3238_v3  ;;  %v3337_v3 = vld [vmem:[%s6383_s22 + $0x48] sm:$0xff] }
 0xef0   :  { %v5586_v7 = vpop.eup %3989  ;;  %v3208_v29 = vpop.xlane.xlu0 %3207 }
 0xef1   :  { %v3240_v59 = vmul.f32 0.5, %v3239_v57  ;;  %v3212_v12 = vmul.f32 %v3208_v29, %v4840_v58  ;;  %v235_v22 = vpop.permute.xlu2 %234  ;;  %v765_v2 = vmul.f32 %v5586_v7, %v5586_v7  ;;  %v5591_v61 = vpop.eup %3991  ;;  %v3336_v57 = vld [vmem:[%s6383_s22 + $0x40] sm:$0xff]  ;;  %v3335_v29 = vld [vmem:[%s6383_s22 + $0x38] sm:$0xff] }
 0xef2   :  { %3993 = vrcp.f32 %v235_v22  ;;  %v768_v33 = vmul.f32 %v5591_v61, %v5591_v61  ;;  %v3334_v22 = vld [vmem:[%s6383_s22 + $0x30] sm:$0xff] }
 0xef3   :  { %v3241_v13 = vsub.f32 1.5, %v3240_v59  ;;  %v3216_v32 = vadd.f32 1e-05, %v3212_v12  ;;  %803 = vperm.xlu1 %3809, %v765_v2   ;;  %v5666_v59 = vpop.permute.xlu1 %778 }
 0xef5   :  { %v3242_v56 = vmul.f32 %v3988_v20, %v3241_v13  ;;  %3995 = vrsqrt.f32 %v3216_v32  ;;  %vm3253_vm15 = vweird.f32 %v3216_v32 }
 0xef7   :  { %v3246_v39 = vsel %vm3245_vm13, %v3988_v20, %v3242_v56 }
 0xef8   :  { %v5593_v50 = vpop.eup %3993  ;;  %v3259_v21 = vmul.f32 %v3246_v39, %v5464_v49 }
 0xef9   :  { %v245_v62 = vpop.permute.xlu2 %244  ;;  %v770_v26 = vmul.f32 %v5593_v50, %v5593_v50 }
 0xefa   :  { %3997 = vrcp.f32 %v245_v62  ;;  %v3266_v11 = vmul.f32 %v5541_v14, %v3259_v21 }
 0xefb   :  { %v3996_v30 = vpop.eup %3995  ;;  %818 = vperm.xlu1 %3809, %v768_v33   ;;  %828 = vperm.xlu2 %3811, %v770_v26   ;;  %3999 = vrcp.f32 %v5020_v41  ;;  %v3343_v41 = vld [vmem:[%s6383_s22 + $0x78] sm:$0xff]  ;;  %v3333_v33 = vld [vmem:[%s6383_s22 + $0x28] sm:$0xff]  ;;  %v3332_v26 = vld [vmem:[%s6383_s22 + $0x20] sm:$0xff] }
 0xefc   :  { %v3248_v34 = vmul.f32 %v3996_v30, %v3216_v32  ;;  %v5602_v23 = vadd.f32 %v5549_v17, %v3266_v11  ;;  %vm3254_vm14 = vweird.f32 %v3996_v30  ;;  %3348 = vmatpush.msra.mxu3 %v3343_v41  ;;  %v3331_v11 = vld [vmem:[%s6383_s22 + $0x18] sm:$0xff] }
 0xefd   :  { %vm3255_vm0 = vmor %vm3253_vm15, %vm3254_vm14 }
 0xefe   :  { %v3249_v36 = vmul.f32 %v3996_v30, %v3248_v34  ;;  %3706 = vmatmul.msk.f32.gmra.mxu2 %vm148_vm2, %v5602_v23  ;;  %3349 = vmatpush.msra.mxu3 %v3342_v46 }
 0xf00   :  { %v5606_v49 = vpop.eup %3997  ;;  %v3250_v24 = vmul.f32 0.5, %v3249_v36  ;;  %v1895_v36 = vpop.permute.xlu1 %1894 }
 0xf01   :  { %v5609_v42 = vpop.permute.xlu2 %248  ;;  %v773_v5 = vmul.f32 %v5606_v49, %v5606_v49  ;;  %v5613_v35 = vpop.eup %3999 }
 0xf02   :  { %v3251_v45 = vsub.f32 1.5, %v3250_v24  ;;  %v2432_v51 = vmul.f32 %v5613_v35, %v5613_v35 }
 0xf03   :  { %v223_v6 = vpop.permute.xlu0 %222  ;;  %843 = vperm.xlu2 %3811, %v773_v5  }
 0xf04   :  { %v3252_v16 = vmul.f32 %v3996_v30, %v3251_v45  ;;  %4001 = vrcp.f32 %v223_v6  ;;  %v3330_v45 = vld [vmem:[%s6383_s22 + $0x10] sm:$0xff] }
 0xf05   :  { %4003 = vrcp.f32 %v5040_v10  ;;  %v3341_v10 = vld [vmem:[%s6383_s22 + $0x68] sm:$0xff] }
 0xf06   :  { %v3256_v52 = vsel %vm3255_vm0, %v3996_v30, %v3252_v16  ;;  %3350 = vmatpush.msra.mxu3 %v3341_v10 }
 0xf07   :  { %v3260_v8 = vmul.f32 %v3256_v52, %v5479_v43  ;;  %v3329_v52 = vld [vmem:[%s6383_s22 + $0x8] sm:$0xff] }
 0xf08   :  { %v1899_v10 = vpop.permute.xlu1 %1898 }
 0xf09   :  { %v5623_v27 = vpop.permute.xlu2 %1892  ;;  %v3267_v55 = vmul.f32 %v5541_v14, %v3260_v8  ;;  %v3340_v14 = vld [vmem:[%s6383_s22 + $0x60] sm:$0xff] }
 0xf0a   :  { %v5631_v43 = vpop.eup %4001  ;;  %3351 = vmatpush.msra.mxu3 %v3340_v14  ;;  %v3328_v8 = vld [vmem:[%s6383_s22] sm:$0xff] }
 0xf0b   :  { %v233_v15 = vpop.permute.xlu0 %232  ;;  %2450 = vperm.xlu2 %3811, %v2432_v51   ;;  %v5634_v25 = vadd.f32 %v5549_v17, %v3267_v55  ;;  %v766_v60 = vmul.f32 %v5631_v43, %v5631_v43  ;;  %v5643_v47 = vpop.eup %4003  ;;  %v3339_v17 = vld [vmem:[%s6383_s22 + $0x58] sm:$0xff] }
 0xf0c   :  { %4005 = vrcp.f32 %v233_v15  ;;  %v2435_v28 = vmul.f32 %v5643_v47, %v5643_v47  ;;  %3352 = vmatpush.msra.mxu3 %v3339_v17 }
 0xf0d   :  { %3707 = vmatmul.msk.f32.gmra.mxu2 %vm148_vm2, %v5634_v25  ;;  %808 = vperm.xlu0 %3810, %v766_v60  }
 0xf0e   :  { %3353 = vmatpush.msra.mxu3 %v3338_v37 }
 0xf10   :  { %3354 = vmatpush.msra.mxu3 %v3337_v3 }
 0xf11   :  { %v1897_v44 = vpop.permute.xlu2 %1896 }
 0xf12   :  { %4007 = vrcp.f32 %v1897_v44  ;;  %v5653_v54 = vpop.eup %4005  ;;  %3355 = vmatpush.msra.mxu3 %v3336_v57 }
 0xf13   :  { %4009 = vrcp.f32 %v243_v0  ;;  %v237_v20 = vpop.permute.xlu0 %236  ;;  %2465 = vperm.xlu2 %3811, %v2435_v28   ;;  %v769_v63 = vmul.f32 %v5653_v54, %v5653_v54 }
 0xf14   :  { %4011 = vrcp.f32 %v237_v20  ;;  %3356 = vmatpush.msra.mxu3 %v3335_v29  ;;  %v1909_v20 = vpop.permute.xlu1 %1908  ;;  %v746_v29 = vmul.f32 0.3989423, %v5509_v38 }
 0xf15   :  { %823 = vperm.xlu0 %3810, %v769_v63  }
 0xf16   :  { %3357 = vmatpush.msra.mxu3 %v3334_v22 }
 0xf18   :  { %v5668_v12 = vpop.eup %4007  ;;  %3358 = vmatpush.msra.mxu3 %v3333_v33  ;;  %v749_v33 = vmul.f32 0.3989423, %v5586_v7 }
 0xf19   :  { %v5673_v2 = vpop.eup %4009  ;;  %v1907_v13 = vpop.permute.xlu2 %1906  ;;  %v2438_v32 = vmul.f32 %v5668_v12, %v5668_v12 }
 0xf1a   :  { %v5677_v56 = vpop.eup %4011  ;;  %4013 = vrcp.f32 %v1907_v13  ;;  %v772_v62 = vmul.f32 %v5673_v2, %v5673_v2  ;;  %3359 = vmatpush.msra.mxu3 %v3332_v26 }
 0xf1b   :  { %4015 = vrcp.f32 %v5609_v42  ;;  %v247_v39 = vpop.permute.xlu0 %246  ;;  %2480 = vperm.xlu2 %3811, %v2438_v32   ;;  %v771_v21 = vmul.f32 %v5677_v56, %v5677_v56 }
 0xf1c   :  { %4017 = vrcp.f32 %v247_v39  ;;  %3360 = vmatpush.msra.mxu3 %v3331_v11  ;;  %v1919_v32 = vpop.permute.xlu1 %1918  ;;  %v5755_v39 = vld [vmem:[%s6382_s21] ss:$0 sm:$0xff] }
 0xf1d   :  { %833 = vperm.xlu1 %3809, %v771_v21   ;;  %838 = vperm.xlu0 %3810, %v772_v62   ;;  %4019 = vrcp.f32 %v5026_v48 }
 0xf1e   :  { %3361 = vmatpush.msra.mxu3 %v3330_v45 }
 0xf20   :  { %v5693_v30 = vpop.eup %4013  ;;  %3362 = vmatpush.msra.mxu3 %v3329_v52 }
 0xf21   :  { %v5695_v34 = vpop.eup %4015  ;;  %v1917_v24 = vpop.permute.xlu2 %1916  ;;  %v2441_v42 = vmul.f32 %v5693_v30, %v5693_v30 }
 0xf22   :  { %v5700_v5 = vpop.eup %4017  ;;  %4021 = vrcp.f32 %v1917_v24  ;;  %v775_v48 = vmul.f32 %v5695_v34, %v5695_v34  ;;  %3363 = vmatpush.msra.mxu3 %v3328_v8 }
 0xf23   :  { %v5705_v6 = vpop.permute.xlu0 %783  ;;  %2495 = vperm.xlu2 %3811, %v2441_v42   ;;  %v774_v16 = vmul.f32 %v5700_v5, %v5700_v5  ;;  %4023 = vrcp.f32 %v5036_v31  ;;  %v5718_v41 = vpop.eup %4019 }
 0xf24   :  { %4025 = vrcp.f32 %v5623_v27  ;;  %v2433_v15 = vmul.f32 %v5718_v41, %v5718_v41 }
 0xf25   :  { %848 = vperm.xlu1 %3809, %v774_v16   ;;  %853 = vperm.xlu0 %3810, %v775_v48   ;;  %v752_v48 = vmul.f32 0.3989423, %v5591_v61  ;;  %v745_v61 = vmul.f32 0.3989423, %v5529_v53  ;;  %v753_v53 = vmul.f32 0.3989423, %v5653_v54 }
 0xf28   :  { %v5720_v46 = vpop.eup %4021 }
 0xf29   :  { %v5722_v31 = vpop.eup %4023  ;;  %v1923_v51 = vpop.permute.xlu2 %1922  ;;  %v2444_v55 = vmul.f32 %v5720_v46, %v5720_v46 }
 0xf2a   :  { %4027 = vrcp.f32 %v1923_v51  ;;  %v2434_v14 = vmul.f32 %v5722_v31, %v5722_v31  ;;  %v5731_v0 = vpop.eup %4025 }
 0xf2b   :  { %4029 = vrcp.f32 %v1895_v36  ;;  %2510 = vperm.xlu2 %3811, %v2444_v55   ;;  %v1905_v60 = vpop.permute.xlu0 %1904  ;;  %v2436_v44 = vmul.f32 %v5731_v0, %v5731_v0  ;;  %v755_v55 = vmul.f32 0.3989423, %v5677_v56  ;;  %v751_v56 = vmul.f32 0.3989423, %v5581_v1 }
 0xf2c   :  { %4031 = vrcp.f32 %v1899_v10 }
 0xf2d   :  { %2455 = vperm.xlu1 %3809, %v2433_v15   ;;  %2460 = vperm.xlu0 %3810, %v2434_v14   ;;  %4033 = vrcp.f32 %v1905_v60  ;;  %v744_v15 = vmul.f32 0.3989423, %v5474_v4  ;;  %v750_v4 = vmul.f32 0.3989423, %v5631_v43  ;;  %v759_v43 = vmul.f32 0.3989423, %v5695_v34 }
 0xf2e   :  { %4035 = vrcp.f32 %v1909_v20 }
 0xf30   :  { %v5733_v27 = vpop.eup %4027 }
 0xf31   :  { %v5735_v17 = vpop.eup %4029  ;;  %v2447_v37 = vmul.f32 %v5733_v27, %v5733_v27  ;;  %v5762_v11 = vpop.permute.xlu2 %798 }
 0xf32   :  { %v2437_v28 = vmul.f32 %v5735_v17, %v5735_v17  ;;  %v5743_v3 = vpop.eup %4031 }
 0xf33   :  { %2525 = vperm.xlu2 %3811, %v2447_v37   ;;  %v1911_v63 = vpop.permute.xlu0 %1910  ;;  %v5745_v57 = vpop.eup %4033  ;;  %v2439_v22 = vmul.f32 %v5743_v3, %v5743_v3 }
 0xf34   :  { %4037 = vrcp.f32 %v1911_v63  ;;  %v2440_v13 = vmul.f32 %v5745_v57, %v5745_v57  ;;  %v5757_v21 = vpop.eup %4035 }
 0xf35   :  { %2470 = vperm.xlu1 %3809, %v2436_v44   ;;  %2475 = vperm.xlu0 %3810, %v2437_v28   ;;  %4039 = vrcp.f32 %v1919_v32  ;;  %v2442_v24 = vmul.f32 %v5757_v21, %v5757_v21  ;;  %v747_v44 = vmul.f32 0.3989423, %v5567_v9  ;;  %v748_v28 = vmul.f32 0.3989423, %v5577_v18 }
 0xf36   :  { %v756_v9 = vmul.f32 0.3989423, %v5673_v2  ;;  %v757_v18 = vmul.f32 0.3989423, %v5606_v49  ;;  %v2418_v49 = vmul.f32 0.3989423, %v5722_v31 }
 0xf39   :  { %v5778_v51 = vpop.permute.xlu2 %813 }
 0xf3a   :  { %v5759_v62 = vpop.eup %4037 }
 0xf3b   :  { %916 = vperm.xlu2 %3811, %v746_v29   ;;  %v1921_v38 = vpop.permute.xlu0 %1920  ;;  %v2443_v42 = vmul.f32 %v5759_v62, %v5759_v62  ;;  %v5769_v16 = vpop.eup %4039  ;;  %v754_v29 = vmul.f32 0.3989423, %v5593_v50 }
 0xf3c   :  { %4041 = vrcp.f32 %v1921_v38  ;;  %v2445_v52 = vmul.f32 %v5769_v16, %v5769_v16  ;;  %v5809_v38 = vpop.permute.xlu1 %788 }
 0xf3d   :  { %2485 = vperm.xlu1 %3809, %v2439_v22   ;;  %2490 = vperm.xlu0 %3810, %v2440_v13  }
 0xf42   :  { %v3312_v26 = vpop.f32.mrf.mxu2  ;;  %v5771_v7 = vpop.eup %4041 }
 0xf43   :  { %v3313_v36 = vadd.f32 %v5755_v39, %v3312_v26  ;;  %931 = vperm.xlu2 %3811, %v749_v33   ;;  %v2446_v8 = vmul.f32 %v5771_v7, %v5771_v7  ;;  %v5802_v1 = vpop.permute.xlu0 %793 }
 0xf45   :  { %v3324_v45 = vmax.f32 %v3313_v36, 0.0  ;;  %2500 = vperm.xlu1 %3809, %v2442_v24   ;;  %2505 = vperm.xlu0 %3810, %v2443_v42   ;;  %v2421_v24 = vmul.f32 0.3989423, %v5735_v17 }
 0xf47   :  { %3364 = vmatmul.f32.vlgmr.msra.gmra.mxu3 %v3324_v45  ;;  %v5823_v45 = vld [vmem:[%s6385_s3 + $0x8] sm:$0xff] }
 0xf4b   :  { %946 = vperm.xlu2 %3811, %v752_v48  }
 0xf4d   :  { %2515 = vperm.xlu1 %3809, %v2445_v52   ;;  %2520 = vperm.xlu0 %3810, %v2446_v8  }
 0xf53   :  { %v3315_v10 = vpop.f32.mrf.mxu2  ;;  %961 = vperm.xlu2 %3811, %v755_v55  }
 0xf54   :  { %v3316_v60 = vadd.f32 %v5755_v39, %v3315_v10 }
 0xf55   :  { %906 = vperm.xlu1 %3809, %v744_v15   ;;  %v5784_v14 = vpop.permute.xlu2 %828  ;;  %911 = vperm.xlu0 %3810, %v745_v61   ;;  %v2424_v15 = vmul.f32 0.3989423, %v5745_v57  ;;  %v5835_v61 = vld [vmem:[%s6385_s3] sm:$0xff] }
 0xf56   :  { %v3325_v37 = vmax.f32 %v3316_v60, 0.0 }
 0xf58   :  { %3367 = vmatmul.f32.gmra.mxu3 %v3325_v37 }
 0xf5d   :  { %v5788_v20 = vpop.permute.xlu2 %843  ;;  %921 = vperm.xlu1 %3809, %v747_v44   ;;  %926 = vperm.xlu0 %3810, %v748_v28  }
 0xf65   :  { %v5792_v63 = vpop.permute.xlu2 %2450  ;;  %936 = vperm.xlu1 %3809, %v750_v4   ;;  %941 = vperm.xlu0 %3810, %v751_v56   ;;  %v804_v34 = vpop.permute.xlu1 %803 }
 0xf66   :  { %v861_v31 = vmul.f32 %v804_v34, %v5823_v45  ;;  %v860_v34 = vmul.f32 %v5762_v11, %v5835_v61 }
 0xf68   :  { %v882_v55 = vmul.f32 1.442695, %v861_v31  ;;  %v3821_v31 = vld [vmem:[%s6384_s23] ss:$0 sm:$0xff] }
 0xf6a   :  { %4043 = vpow2.f32 %v882_v55 }
 0xf6d   :  { %v5796_v22 = vpop.permute.xlu2 %2465  ;;  %951 = vperm.xlu1 %3809, %v753_v53   ;;  %956 = vperm.xlu0 %3810, %v754_v29   ;;  %v819_v17 = vpop.permute.xlu1 %818 }
 0xf6e   :  { %v864_v37 = vmul.f32 %v819_v17, %v5835_v61 }
 0xf70   :  { %v4044_v28 = vpop.eup %4043 }
 0xf75   :  { %v5800_v13 = vpop.permute.xlu2 %2480  ;;  %966 = vperm.xlu1 %3809, %v756_v9   ;;  %971 = vperm.xlu0 %3810, %v757_v18  }
 0xf7d   :  { %v5805_v32 = vpop.permute.xlu2 %2495  ;;  %981 = vperm.xlu1 %3809, %v759_v43  }
 0xf7f   :  { %v5807_v50 = vpop.permute.xlu0 %808 }
 0xf81   :  { %v3318_v54 = vpop.f32.mrf.mxu2 }
 0xf82   :  { %v3319_v2 = vadd.f32 %v5755_v39, %v3318_v54 }
 0xf84   :  { %v3326_v33 = vmax.f32 %v3319_v2, 0.0  ;;  %v857_v2 = vmul.f32 %v5705_v6, %v5823_v45  ;;  %v863_v6 = vmul.f32 %v5778_v51, %v5823_v45 }
 0xf85   :  { %v5813_v26 = vpop.permute.xlu2 %2510  ;;  %2588 = vperm.xlu1 %3809, %v2418_v49  }
 0xf86   :  { %3370 = vmatmul.f32.gmra.mxu3 %v3326_v33  ;;  %v874_v49 = vmul.f32 1.442695, %v857_v2 }
 0xf87   :  { %v5815_v36 = vpop.permute.xlu0 %823 }
 0xf8d   :  { %v5818_v42 = vpop.permute.xlu2 %2525  ;;  %2603 = vperm.xlu1 %3809, %v2421_v24   ;;  %v880_v24 = vmul.f32 1.442695, %v860_v34 }
 0xf8f   :  { %v5826_v48 = vpop.permute.xlu0 %838 }
 0xf90   :  { %v3321_v52 = vpop.f32.mrf.mxu2 }
 0xf91   :  { %v3322_v8 = vadd.f32 %v5755_v39, %v3321_v52  ;;  %v888_v39 = vmul.f32 1.442695, %v864_v37  ;;  %v886_v37 = vmul.f32 1.442695, %v863_v6 }
 0xf93   :  { %v3327_v10 = vmax.f32 %v3322_v8, 0.0  ;;  %4045 = vpow2.f32 %v888_v39 }
 0xf94   :  { %4047 = vpow2.f32 %v874_v49 }
 0xf95   :  { %3373 = vmatmul.f32.gmra.mxu3 %v3327_v10  ;;  %v5830_v60 = vpop.permute.xlu2 %916  ;;  %2618 = vperm.xlu1 %3809, %v2424_v15   ;;  %4049 = vpow2.f32 %v880_v24 }
 0xf96   :  { %4051 = vpow2.f32 %v886_v37 }
 0xf97   :  { %v5838_v44 = vpop.permute.xlu0 %853 }
 0xf99   :  { %v4046_v53 = vpop.eup %4045 }
 0xf9a   :  { %v4048_v52 = vpop.eup %4047 }
 0xf9b   :  { %v4050_v39 = vpop.eup %4049 }
 0xf9c   :  { %v4052_v2 = vpop.eup %4051 }
 0xf9d   :  { %v932_v4 = vpop.permute.xlu2 %931 }
 0xf9e   :  { %v5840_v56 = vmul.f32 %v4044_v28, %v932_v4 }
 0xf9f   :  { %v5842_v57 = vpop.permute.xlu0 %2460 }
 0xfa5   :  { %v947_v29 = vpop.permute.xlu2 %946 }
 0xfa6   :  { %v5844_v9 = vmul.f32 %v4046_v53, %v947_v29  ;;  %v866_v53 = vmul.f32 %v5784_v14, %v5835_v61 }
 0xfa7   :  { %v5846_v18 = vpop.permute.xlu0 %2475 }
 0xfa8   :  { %v892_v29 = vmul.f32 1.442695, %v866_v53 }
 0xfaa   :  { %4053 = vpow2.f32 %v892_v29 }
 0xfaf   :  { %v5848_v43 = vpop.permute.xlu0 %2490 }
 0xfb7   :  { %v5850_v54 = vpop.permute.xlu0 %2505 }
 0xfbf   :  { %v5854_v33 = vpop.permute.xlu0 %2520 }
 0xfc7   :  { %v912_v8 = vpop.permute.xlu0 %911 }
 0xfc8   :  { %v5861_v55 = vmul.f32 %v4048_v52, %v912_v8  ;;  %v4054_v52 = vpop.eup %4053 }
 0xfca   :  { %v3365_v10 = vpop.f32.mrf.mxu3 }
 0xfcb   :  { %v3366_v15 = vadd.f32 %v3821_v31, %v3365_v10 }
 0xfcd   :  { %v3377_v17 = vadd.f32 %v3366_v15, %v5553_v40  ;;  %v2416_v15 = vmul.f32 0.3989423, %v5613_v35  ;;  %v5886_v35 = vpop.permute.xlu1 %833 }
 0xfcf   :  { %v3383_v11 = vsel %vm148_vm2, %v3377_v17, 0.0  ;;  %v927_v28 = vpop.permute.xlu0 %926 }
 0xfd0   :  { %3384 = vadd.xlane.f32.xlu2 %v3383_v11  ;;  %v5867_v4 = vmul.f32 %v4050_v39, %v927_v28 }
 0xfd7   :  { %v942_v49 = vpop.permute.xlu0 %941 }
 0xfd8   :  { %v5871_v51 = vmul.f32 %v4052_v2, %v942_v49  ;;  %v758_v2 = vmul.f32 0.3989423, %v5700_v5  ;;  %v2419_v49 = vmul.f32 0.3989423, %v5643_v47 }
 0xfdb   :  { %v3368_v34 = vpop.f32.mrf.mxu3 }
 0xfdc   :  { %v3369_v40 = vadd.f32 %v3821_v31, %v3368_v34  ;;  %v5890_v34 = vpop.permute.xlu1 %848 }
 0xfde   :  { %v3378_v24 = vadd.f32 %v3369_v40, %v5571_v19 }
 0xfdf   :  { %v957_v8 = vpop.permute.xlu0 %956 }
 0xfe0   :  { %v3386_v6 = vsel %vm148_vm2, %v3378_v24, 0.0  ;;  %v5875_v10 = vmul.f32 %v4054_v52, %v957_v8 }
 0xfe1   :  { %3387 = vadd.xlane.f32.xlu0 %v3386_v6 }
 0xfe4   :  { %v5896_v5 = vpop.permute.xlu1 %2455 }
 0xfe7   :  { %v5902_v6 = vpop.permute.xlu0 %971 }
 0xff5   :  { %2578 = vperm.xlu0 %3810, %v2416_v15  }
0x1009   :  { %v3371_v14 = vpop.f32.mrf.mxu3 }
0x100a   :  { %v3372_v37 = vadd.f32 %v3821_v31, %v3371_v14 }
0x100c   :  { %v3379_v11 = vadd.f32 %v3372_v37, %v5602_v23  ;;  %v2422_v23 = vmul.f32 0.3989423, %v5668_v12  ;;  %v5904_v12 = vpop.permute.xlu1 %2470 }
0x100e   :  { %v3389_v39 = vsel %vm148_vm2, %v3379_v11, 0.0 }
0x100f   :  { %3390 = vadd.xlane.f32.xlu2 %v3389_v39  ;;  %v2528_v39 = vmul.f32 %v5792_v63, %v5835_v61 }
0x1018   :  { %v3374_v28 = vpop.f32.mrf.mxu3 }
0x1019   :  { %v3375_v53 = vadd.f32 %v3821_v31, %v3374_v28  ;;  %v5892_v31 = vpop.permute.xlu2 %961 }
0x101b   :  { %v5881_v19 = vadd.f32 %v3375_v53, %v5634_v25  ;;  %v2425_v25 = vmul.f32 0.3989423, %v5693_v30 }
0x101d   :  { %v3392_v29 = vsel %vm148_vm2, %v5881_v19, 0.0 }
0x101f   :  { %3393 = vadd.xlane.f32.xlu0 %v3392_v29  ;;  %v2544_v29 = vmul.f32 1.442695, %v2528_v39 }
0x1021   :  { %4055 = vpow2.f32 %v2544_v29 }
0x1027   :  { %976 = vperm.xlu2 %3811, %v758_v2  }
0x1033   :  { %2593 = vperm.xlu0 %3810, %v2419_v49   ;;  %v2417_v49 = vmul.f32 0.3989423, %v5718_v41 }
0x103b   :  { %2608 = vperm.xlu0 %3810, %v2422_v23   ;;  %v4056_v23 = vpop.eup %4055 }
0x1043   :  { %v3385_v40 = vpop.xlane.xlu2 %3384  ;;  %2623 = vperm.xlu0 %3810, %v2425_v25  }
0x1044   :  { %v3395_v52 = vmul.f32 %v3385_v40, %v4840_v58  ;;  %v2420_v40 = vmul.f32 0.3989423, %v5731_v0 }
0x1046   :  { %v5898_v8 = vsub.f32 %v3377_v17, %v3395_v52  ;;  %v5912_v17 = vpop.permute.xlu1 %2485  ;;  %v2427_v52 = vmul.f32 0.3989423, %v5759_v62 }
0x1048   :  { %v3403_v47 = vmul.f32 %v5898_v8, %v5898_v8 }
0x104a   :  { %v3407_v15 = vsel %vm148_vm2, %v3403_v47, 0.0  ;;  %v2423_v47 = vmul.f32 0.3989423, %v5743_v3 }
0x104e   :  { %v5917_v2 = vpop.permute.xlu1 %2500 }
0x1050   :  { %3408 = vadd.xlane.f32.xlu2 %v3407_v15 }
0x1054   :  { %v3388_v14 = vpop.xlane.xlu0 %3387 }
0x1055   :  { %v3396_v30 = vmul.f32 %v3388_v14, %v4840_v58  ;;  %v2426_v14 = vmul.f32 0.3989423, %v5757_v21 }
0x1056   :  { %v5922_v63 = vpop.permute.xlu1 %2515 }
0x1057   :  { %v5908_v37 = vsub.f32 %v3378_v24, %v3396_v30 }
0x1059   :  { %v3404_v28 = vmul.f32 %v5908_v37, %v5908_v37 }
0x105b   :  { %v3410_v53 = vsel %vm148_vm2, %v3404_v28, 0.0 }
0x105c   :  { %3411 = vadd.xlane.f32.xlu1 %v3410_v53  ;;  %v2429_v53 = vmul.f32 0.3989423, %v5769_v16  ;;  %v2428_v16 = vmul.f32 0.3989423, %v5720_v46 }
0x105e   :  { %v907_v15 = vpop.permute.xlu1 %906 }
0x1066   :  { %v922_v41 = vpop.permute.xlu1 %921 }
0x1067   :  { %v2579_v24 = vpop.permute.xlu0 %2578 }
0x1068   :  { %v5920_v25 = vmul.f32 %v4056_v23, %v2579_v24  ;;  %2583 = vperm.xlu2 %3811, %v2417_v49   ;;  %v856_v24 = vmul.f32 %v5666_v59, %v5835_v61  ;;  %v862_v59 = vmul.f32 %v5807_v50, %v5835_v61 }
0x106e   :  { %v937_v3 = vpop.permute.xlu1 %936 }
0x1070   :  { %2598 = vperm.xlu2 %3811, %v2420_v40  }
0x1075   :  { %2633 = vperm.xlu1 %3809, %v2427_v52  }
0x1076   :  { %v952_v49 = vpop.permute.xlu1 %951 }
0x1078   :  { %2613 = vperm.xlu2 %3811, %v2423_v47   ;;  %v872_v47 = vmul.f32 1.442695, %v856_v24 }
0x107a   :  { %4057 = vpow2.f32 %v872_v47  ;;  %v868_v47 = vmul.f32 %v5826_v48, %v5835_v61 }
0x107e   :  { %v967_v52 = vpop.permute.xlu1 %966 }
0x1080   :  { %2628 = vperm.xlu2 %3811, %v2426_v14   ;;  %v2431_v14 = vmul.f32 0.3989423, %v5733_v27  ;;  %v4058_v46 = vpop.eup %4057 }
0x1082   :  { %v3391_v30 = vpop.xlane.xlu2 %3390 }
0x1083   :  { %v3397_v39 = vmul.f32 %v3391_v30, %v4840_v58 }
0x1085   :  { %v5929_v28 = vsub.f32 %v3379_v11, %v3397_v39 }
0x1086   :  { %v5948_v39 = vpop.permute.xlu1 %981 }
0x1087   :  { %v3405_v0 = vmul.f32 %v5929_v28, %v5929_v28 }
0x1088   :  { %2643 = vperm.xlu2 %3811, %v2429_v53   ;;  %v5950_v53 = vmul.f32 %v4058_v46, %v907_v15  ;;  %v2430_v15 = vmul.f32 0.3989423, %v5771_v7  ;;  %v3487_v7 = vld [vmem:[%s6388_s4 + $0x10] sm:$0xff]  ;;  %v896_v46 = vmul.f32 1.442695, %v868_v47 }
0x1089   :  { %v3413_v62 = vsel %vm148_vm2, %v3405_v0, 0.0 }
0x108a   :  { %3414 = vadd.xlane.f32.xlu0 %v3413_v62  ;;  %v1000_v0 = vsel %vm551_vm4, %v5950_v53, 0.0  ;;  %v884_v62 = vmul.f32 1.442695, %v862_v59 }
0x1092   :  { %v3394_v29 = vpop.xlane.xlu0 %3393 }
0x1093   :  { %v3398_v21 = vmul.f32 %v3394_v29, %v4840_v58  ;;  %v5956_v29 = vpop.permute.xlu1 %2588 }
0x1095   :  { %v5937_v23 = vsub.f32 %v5881_v19, %v3398_v21  ;;  %v859_v19 = vmul.f32 %v5802_v1, %v5823_v45  ;;  %v865_v21 = vmul.f32 %v5815_v36, %v5823_v45 }
0x1097   :  { %v3406_v11 = vmul.f32 %v5937_v23, %v5937_v23  ;;  %v878_v30 = vmul.f32 1.442695, %v859_v19  ;;  %v3486_v19 = vld [vmem:[%s6388_s4 + $0x8] sm:$0xff] }
0x1099   :  { %v3416_v40 = vsel %vm148_vm2, %v3406_v11, 0.0  ;;  %4059 = vpow2.f32 %v878_v30  ;;  %v890_v11 = vmul.f32 1.442695, %v865_v21 }
0x109a   :  { %4061 = vpow2.f32 %v884_v62 }
0x109b   :  { %4063 = vpow2.f32 %v890_v11 }
0x109e   :  { %2638 = vperm.xlu0 %3810, %v2428_v16   ;;  %v3488_v16 = vld [vmem:[%s6388_s4 + $0x18] sm:$0xff] }
0x109f   :  { %3417 = vadd.xlane.f32.xlu1 %v3416_v40  ;;  %v4060_v27 = vpop.eup %4059  ;;  %v5968_v40 = vpop.permute.xlu2 %976  ;;  %3517 = vmatpush.msra.mxu0 %v3488_v16 }
0x10a0   :  { %v5958_v1 = vmul.f32 %v4060_v27, %v922_v41  ;;  %v4062_v24 = vpop.eup %4061  ;;  %v858_v41 = vmul.f32 %v5809_v38, %v5835_v61  ;;  %v871_v27 = vmul.f32 %v5838_v44, %v5823_v45  ;;  %v2530_v44 = vmul.f32 %v5842_v57, %v5835_v61 }
0x10a1   :  { %v5972_v36 = vmul.f32 %v4062_v24, %v937_v3  ;;  %3518 = vmatpush.msra.mxu0 %v3487_v7  ;;  %v3485_v3 = vld [vmem:[%s6388_s4] sm:$0xff]  ;;  %v4064_v48 = vpop.eup %4063  ;;  %v867_v57 = vmul.f32 %v5886_v35, %v5823_v45 }
0x10a2   :  { %v1009_v50 = vsel %vm551_vm4, %v5958_v1, 0.0  ;;  %v876_v30 = vmul.f32 1.442695, %v858_v41  ;;  %v902_v11 = vmul.f32 1.442695, %v871_v27  ;;  %v2533_v27 = vmul.f32 %v5846_v18, %v5823_v45 }
0x10a3   :  { %3519 = vmatpush.msra.mxu0 %v3486_v19  ;;  %v1018_v38 = vsel %vm551_vm4, %v5972_v36, 0.0  ;;  %v6022_v35 = vld [vmem:[%s6386_s24] ss:$0 sm:$0xff] }
0x10a4   :  { %4065 = vpow2.f32 %v876_v30 }
0x10a5   :  { %3520 = vmatpush.msra.mxu0 %v3485_v3  ;;  %4067 = vpow2.f32 %v896_v46 }
0x10a6   :  { %2653 = vperm.xlu0 %3810, %v2431_v14   ;;  %v5979_v14 = vpop.permute.xlu1 %2603 }
0x10aa   :  { %v4066_v16 = vpop.eup %4065 }
0x10ab   :  { %v4068_v24 = vpop.eup %4067 }
0x10ac   :  { %v6001_v41 = vmul.f32 %v4068_v24, %v967_v52  ;;  %v894_v24 = vmul.f32 1.442695, %v867_v57  ;;  %v1024_v57 = vsel %vm551_vm4, %v5844_v9, 0.0 }
0x10ae   :  { %v1036_v3 = vsel %vm551_vm4, %v6001_v41, 0.0 }
0x10b1   :  { %1001 = vadd.xlane.f32.xlu2 %v1000_v0  ;;  %v5989_v0 = vmul.f32 %v4064_v48, %v952_v49  ;;  %v5999_v49 = vmul.f32 %v4066_v16, %v5830_v60  ;;  %v2548_v60 = vmul.f32 1.442695, %v2530_v44  ;;  %v1015_v16 = vsel %vm551_vm4, %v5840_v56, 0.0 }
0x10b2   :  { %v2554_v44 = vmul.f32 1.442695, %v2533_v27 }
0x10b3   :  { %v1006_v30 = vsel %vm551_vm4, %v5999_v49, 0.0 }
0x10b8   :  { %2648 = vperm.xlu1 %3809, %v2430_v15   ;;  %v5994_v15 = vpop.permute.xlu1 %2618 }
0x10b9   :  { %1010 = vadd.xlane.f32.xlu2 %v1009_v50  ;;  %v1027_v50 = vsel %vm551_vm4, %v5989_v0, 0.0 }
0x10c1   :  { %1019 = vadd.xlane.f32.xlu2 %v1018_v38 }
0x10c3   :  { %v3409_v59 = vpop.xlane.xlu2 %3408 }
0x10c4   :  { %v3419_v62 = vmul.f32 %v3409_v59, %v4840_v58 }
0x10c6   :  { %v3423_v21 = vadd.f32 1e-05, %v3419_v62 }
0x10c8   :  { %4069 = vrsqrt.f32 %v3423_v21  ;;  %vm3433_vm6 = vweird.f32 %v3423_v21 }
0x10c9   :  { %1028 = vadd.xlane.f32.xlu2 %v1027_v50  ;;  %4071 = vpow2.f32 %v902_v11 }
0x10ce   :  { %v4070_v7 = vpop.eup %4069 }
0x10cf   :  { %v3428_v47 = vmul.f32 %v4070_v7, %v3423_v21  ;;  %v3412_v19 = vpop.xlane.xlu1 %3411  ;;  %v4072_v48 = vpop.eup %4071  ;;  %vm3434_vm1 = vweird.f32 %v4070_v7 }
0x10d0   :  { %v3420_v38 = vmul.f32 %v3412_v19, %v4840_v58  ;;  %1007 = vadd.xlane.f32.xlu0 %v1006_v30  ;;  %v6013_v62 = vmul.f32 %v4072_v48, %v5948_v39  ;;  %vm3435_vm3 = vmor %vm3433_vm6, %vm3434_vm1  ;;  %v6030_v19 = vld [vmem:[%s6387_s25] ss:$0 sm:$0xff] }
0x10d1   :  { %v3429_v46 = vmul.f32 %v4070_v7, %v3428_v47  ;;  %1037 = vadd.xlane.f32.xlu2 %v1036_v3  ;;  %v870_v3 = vmul.f32 %v5890_v34, %v5835_v61 }
0x10d2   :  { %v3424_v52 = vadd.f32 1e-05, %v3420_v38  ;;  %v1045_v39 = vsel %vm551_vm4, %v6013_v62, 0.0 }
0x10d3   :  { %v3430_v59 = vmul.f32 0.5, %v3429_v46  ;;  %v900_v27 = vmul.f32 1.442695, %v870_v3 }
0x10d4   :  { %4073 = vrsqrt.f32 %v3424_v52  ;;  %vm3443_vm7 = vweird.f32 %v3424_v52 }
0x10d5   :  { %4075 = vpow2.f32 %v2548_v60  ;;  %v3431_v50 = vsub.f32 1.5, %v3430_v59 }
0x10d6   :  { %4077 = vpow2.f32 %v894_v24 }
0x10d7   :  { %v3432_v11 = vmul.f32 %v4070_v7, %v3431_v50  ;;  %4079 = vpow2.f32 %v2554_v44  ;;  %v6046_v50 = vpop.permute.xlu0 %2593 }
0x10d8   :  { %1016 = vadd.xlane.f32.xlu0 %v1015_v16  ;;  %4081 = vpow2.f32 %v900_v27 }
0x10d9   :  { %v3436_v18 = vsel %vm3435_vm3, %v4070_v7, %v3432_v11  ;;  %1046 = vadd.xlane.f32.xlu2 %v1045_v39 }
0x10da   :  { %v4074_v47 = vpop.eup %4073  ;;  %v3467_v21 = vmul.f32 %v3436_v18, %v5898_v8  ;;  %v2536_v8 = vmul.f32 %v5848_v43, %v5835_v61  ;;  %v1003_v43 = vsel %vm551_vm4, %v5861_v55, 0.0  ;;  %v2529_v18 = vmul.f32 %v5896_v5, %v5823_v45 }
0x10db   :  { %v4076_v30 = vpop.eup %4075  ;;  %v3438_v38 = vmul.f32 %v4074_v47, %v3424_v52  ;;  %vm3444_vm5 = vweird.f32 %v4074_v47  ;;  %v2584_v52 = vpop.permute.xlu2 %2583 }
0x10dc   :  { %v6035_v60 = vmul.f32 %v4076_v30, %v5956_v29  ;;  %v3474_v7 = vmul.f32 %v6022_v35, %v3467_v21  ;;  %v2560_v29 = vmul.f32 1.442695, %v2536_v8  ;;  %v4078_v16 = vpop.eup %4077  ;;  %vm3445_vm8 = vmor %vm3443_vm7, %vm3444_vm5  ;;  %v2539_v30 = vmul.f32 %v5850_v54, %v5823_v45 }
0x10dd   :  { %v3439_v46 = vmul.f32 %v4074_v47, %v3438_v38  ;;  %v4080_v24 = vpop.eup %4079  ;;  %v6051_v39 = vmul.f32 %v4078_v16, %v5892_v31 }
0x10de   :  { %v3481_v48 = vadd.f32 %v6030_v19, %v3474_v7  ;;  %v2678_v34 = vsel %vm551_vm4, %v6035_v60, 0.0  ;;  %v6056_v21 = vmul.f32 %v4080_v24, %v5979_v14  ;;  %4083 = vpow2.f32 %v2560_v29  ;;  %v4082_v54 = vpop.eup %4081 }
0x10df   :  { %v3440_v59 = vmul.f32 0.5, %v3439_v46  ;;  %v1033_v31 = vsel %vm551_vm4, %v6051_v39, 0.0  ;;  %v2546_v7 = vmul.f32 1.442695, %v2529_v18  ;;  %v2566_v8 = vmul.f32 1.442695, %v2539_v30 }
0x10e0   :  { %3708 = vmatmul.msk.f32.vlgmr.msra.gmra.mxu0 %vm148_vm2, %v3481_v48  ;;  %1025 = vadd.xlane.f32.xlu0 %v1024_v57  ;;  %v2687_v5 = vsel %vm551_vm4, %v6056_v21, 0.0  ;;  %v1012_v46 = vsel %vm551_vm4, %v5867_v4, 0.0  ;;  %v6070_v48 = vmul.f32 %v4082_v54, %v5968_v40  ;;  %v2532_v57 = vmul.f32 %v5904_v12, %v5835_v61 }
0x10e1   :  { %v3441_v11 = vsub.f32 1.5, %v3440_v59  ;;  %2679 = vadd.xlane.f32.xlu2 %v2678_v34  ;;  %v6072_v59 = vpop.permute.xlu0 %2608  ;;  %4085 = vpow2.f32 %v2546_v7  ;;  %v869_v34 = vmul.f32 %v5788_v20, %v5823_v45  ;;  %v1021_v12 = vsel %vm551_vm4, %v5871_v51, 0.0 }
0x10e2   :  { %1004 = vadd.xlane.f32.xlu1 %v1003_v43  ;;  %4087 = vpow2.f32 %v2566_v8  ;;  %v1042_v29 = vsel %vm551_vm4, %v6070_v48, 0.0  ;;  %v2552_v40 = vmul.f32 1.442695, %v2532_v57  ;;  %v2535_v20 = vmul.f32 %v5912_v17, %v5823_v45 }
0x10e3   :  { %v3442_v44 = vmul.f32 %v4074_v47, %v3441_v11  ;;  %v898_v16 = vmul.f32 1.442695, %v869_v34  ;;  %v2599_v24 = vpop.permute.xlu2 %2598  ;;  %v2538_v8 = vmul.f32 %v5917_v2, %v5835_v61 }
0x10e4   :  { %4089 = vpow2.f32 %v2552_v40 }
0x10e5   :  { %v3446_v38 = vsel %vm3445_vm8, %v4074_v47, %v3442_v44  ;;  %v4084_v47 = vpop.eup %4083  ;;  %4091 = vpow2.f32 %v898_v16 }
0x10e6   :  { %v3468_v3 = vmul.f32 %v3446_v38, %v5908_v37  ;;  %v6077_v27 = vmul.f32 %v4084_v47, %v5994_v15  ;;  %v2531_v47 = vmul.f32 %v5796_v22, %v5823_v45  ;;  %v2541_v22 = vmul.f32 %v5922_v63, %v5823_v45 }
0x10e7   :  { %v2634_v43 = vpop.permute.xlu1 %2633  ;;  %v4086_v15 = vpop.eup %4085 }
0x10e8   :  { %1034 = vadd.xlane.f32.xlu0 %v1033_v31  ;;  %v3475_v14 = vmul.f32 %v6022_v35, %v3468_v3  ;;  %v2696_v11 = vsel %vm551_vm4, %v6077_v27, 0.0  ;;  %v4088_v44 = vpop.eup %4087  ;;  %v6088_v18 = vmul.f32 %v4086_v15, %v2584_v52  ;;  %v2558_v31 = vmul.f32 1.442695, %v2535_v20 }
0x10e9   :  { %2688 = vadd.xlane.f32.xlu2 %v2687_v5  ;;  %v6092_v30 = vmul.f32 %v4088_v44, %v2634_v43  ;;  %v6094_v38 = vpop.permute.xlu0 %2623  ;;  %v1030_v52 = vsel %vm551_vm4, %v5875_v10, 0.0  ;;  %v2550_v43 = vmul.f32 1.442695, %v2531_v47  ;;  %v2570_v44 = vmul.f32 1.442695, %v2541_v22 }
0x10ea   :  { %1013 = vadd.xlane.f32.xlu1 %v1012_v46  ;;  %v3482_v37 = vadd.f32 %v6030_v19, %v3475_v14  ;;  %v2675_v3 = vsel %vm551_vm4, %v6088_v18, 0.0  ;;  %v4090_v5 = vpop.eup %4089  ;;  %4093 = vpow2.f32 %v2558_v31 }
0x10eb   :  { %v2705_v7 = vsel %vm551_vm4, %v6092_v30, 0.0  ;;  %v6102_v17 = vmul.f32 %v4090_v5, %v2599_v24  ;;  %v4092_v14 = vpop.eup %4091  ;;  %v2614_v46 = vpop.permute.xlu2 %2613 }
0x10ec   :  { %3709 = vmatmul.msk.f32.gmra.mxu0 %vm148_vm2, %v3482_v37  ;;  %v6107_v54 = vmul.f32 %v4092_v14, %v5902_v6 }
0x10ed   :  { %v2684_v34 = vsel %vm551_vm4, %v6102_v17, 0.0 }
0x10f0   :  { %1043 = vadd.xlane.f32.xlu0 %v1042_v29  ;;  %v2564_v29 = vmul.f32 1.442695, %v2538_v8  ;;  %v4094_v2 = vpop.eup %4093  ;;  %v2537_v8 = vmul.f32 %v5805_v32, %v5823_v45 }
0x10f1   :  { %2697 = vadd.xlane.f32.xlu2 %v2696_v11  ;;  %v1039_v11 = vsel %vm551_vm4, %v6107_v54, 0.0  ;;  %v6116_v6 = vmul.f32 %v4094_v2, %v2614_v46 }
0x10f2   :  { %1022 = vadd.xlane.f32.xlu1 %v1021_v12  ;;  %v2534_v12 = vmul.f32 %v5800_v13, %v5835_v61 }
0x10f3   :  { %v2629_v15 = vpop.permute.xlu2 %2628  ;;  %v2693_v16 = vsel %vm551_vm4, %v6116_v6, 0.0 }
0x10f8   :  { %2676 = vadd.xlane.f32.xlu0 %v2675_v3  ;;  %v2672_v3 = vsel %vm551_vm4, %v5920_v25, 0.0 }
0x10f9   :  { %2706 = vadd.xlane.f32.xlu2 %v2705_v7  ;;  %v2556_v7 = vmul.f32 1.442695, %v2534_v12 }
0x10fa   :  { %1031 = vadd.xlane.f32.xlu1 %v1030_v52 }
0x10fb   :  { %v2644_v47 = vpop.permute.xlu2 %2643 }
0x10fd   :  { %v3415_v37 = vpop.xlane.xlu0 %3414 }
0x10fe   :  { %v3421_v57 = vmul.f32 %v3415_v37, %v4840_v58 }
0x1100   :  { %v3425_v40 = vadd.f32 1e-05, %v3421_v57  ;;  %2685 = vadd.xlane.f32.xlu0 %v2684_v34 }
0x1102   :  { %4095 = vrsqrt.f32 %v3425_v40  ;;  %1040 = vadd.xlane.f32.xlu1 %v1039_v11  ;;  %vm3453_vm10 = vweird.f32 %v3425_v40 }
0x1103   :  { %4097 = vpow2.f32 %v2564_v29 }
0x1104   :  { %4099 = vpow2.f32 %v2550_v43 }
0x1105   :  { %4101 = vpow2.f32 %v2570_v44 }
0x1106   :  { %4103 = vpow2.f32 %v2556_v7  ;;  %v2543_v7 = vmul.f32 %v5818_v42, %v5823_v45 }
0x1108   :  { %v4096_v24 = vpop.eup %4095  ;;  %2694 = vadd.xlane.f32.xlu0 %v2693_v16  ;;  %v2540_v16 = vmul.f32 %v5813_v26, %v5835_v61  ;;  %v2542_v26 = vmul.f32 %v5854_v33, %v5835_v61 }
0x1109   :  { %v3448_v20 = vmul.f32 %v4096_v24, %v3425_v40  ;;  %v4098_v31 = vpop.eup %4097  ;;  %vm3454_vm9 = vweird.f32 %v4096_v24 }
0x110a   :  { %2673 = vadd.xlane.f32.xlu1 %v2672_v3  ;;  %v6126_v52 = vmul.f32 %v4098_v31, %v2629_v15  ;;  %v4100_v5 = vpop.eup %4099  ;;  %vm3455_vm11 = vmor %vm3453_vm10, %vm3454_vm9 }
0x110b   :  { %v3449_v63 = vmul.f32 %v4096_v24, %v3448_v20  ;;  %v6129_v13 = vmul.f32 %v4100_v5, %v6046_v50  ;;  %v4102_v29 = vpop.eup %4101  ;;  %v2562_v50 = vmul.f32 1.442695, %v2537_v8  ;;  %v2572_v5 = vmul.f32 1.442695, %v2542_v26 }
0x110c   :  { %v2702_v37 = vsel %vm551_vm4, %v6126_v52, 0.0  ;;  %v6137_v2 = vmul.f32 %v4102_v29, %v2644_v47  ;;  %v4104_v22 = vpop.eup %4103 }
0x110d   :  { %v3450_v14 = vmul.f32 0.5, %v3449_v63  ;;  %v2681_v34 = vsel %vm551_vm4, %v6129_v13, 0.0  ;;  %v6142_v15 = vmul.f32 %v4104_v22, %v6072_v59  ;;  %4105 = vpow2.f32 %v2562_v50 }
0x110e   :  { %v2711_v20 = vsel %vm551_vm4, %v6137_v2, 0.0 }
0x110f   :  { %v3451_v46 = vsub.f32 1.5, %v3450_v14 }
0x1110   :  { %2703 = vadd.xlane.f32.xlu0 %v2702_v37  ;;  %v2639_v14 = vpop.permute.xlu0 %2638  ;;  %v2574_v37 = vmul.f32 1.442695, %v2543_v7 }
0x1111   :  { %v3452_v57 = vmul.f32 %v4096_v24, %v3451_v46 }
0x1112   :  { %2682 = vadd.xlane.f32.xlu1 %v2681_v34  ;;  %v3418_v11 = vpop.xlane.xlu1 %3417 }
0x1113   :  { %v3456_v32 = vsel %vm3455_vm11, %v4096_v24, %v3452_v57  ;;  %v3422_v43 = vmul.f32 %v3418_v11, %v4840_v58  ;;  %v2568_v24 = vmul.f32 1.442695, %v2540_v16  ;;  %v4106_v59 = vpop.eup %4105 }
0x1114   :  { %v3469_v12 = vmul.f32 %v3456_v32, %v5929_v28  ;;  %v2690_v28 = vsel %vm551_vm4, %v6142_v15, 0.0  ;;  %v6156_v31 = vmul.f32 %v4106_v59, %v6094_v38 }
0x1115   :  { %v3426_v40 = vadd.f32 1e-05, %v3422_v43 }
0x1116   :  { %v3476_v44 = vmul.f32 %v6022_v35, %v3469_v12  ;;  %v2699_v46 = vsel %vm551_vm4, %v6156_v31, 0.0 }
0x1117   :  { %4107 = vrsqrt.f32 %v3426_v40  ;;  %vm3463_vm13 = vweird.f32 %v3426_v40 }
0x1118   :  { %2712 = vadd.xlane.f32.xlu0 %v2711_v20  ;;  %v3483_v58 = vadd.f32 %v6030_v19, %v3476_v44  ;;  %4109 = vpow2.f32 %v2568_v24  ;;  %v2654_v11 = vpop.permute.xlu0 %2653 }
0x1119   :  { %4111 = vpow2.f32 %v2572_v5 }
0x111a   :  { %2691 = vadd.xlane.f32.xlu1 %v2690_v28  ;;  %3710 = vmatmul.msk.f32.gmra.mxu0 %vm148_vm2, %v3483_v58 }
0x111d   :  { %v4108_v3 = vpop.eup %4107 }
0x111e   :  { %v3458_v63 = vmul.f32 %v4108_v3, %v3426_v40  ;;  %v4110_v57 = vpop.eup %4109  ;;  %vm3464_vm12 = vweird.f32 %v4108_v3 }
0x111f   :  { %v6162_v38 = vmul.f32 %v4110_v57, %v2639_v14  ;;  %vm3465_vm14 = vmor %vm3463_vm13, %vm3464_vm12  ;;  %v4112_v50 = vpop.eup %4111 }
0x1120   :  { %v3459_v8 = vmul.f32 %v4108_v3, %v3458_v63 }
0x1121   :  { %v2708_v29 = vsel %vm551_vm4, %v6162_v38, 0.0 }
0x1122   :  { %v3460_v47 = vmul.f32 0.5, %v3459_v8  ;;  %2700 = vadd.xlane.f32.xlu1 %v2699_v46 }
0x1124   :  { %v3461_v61 = vsub.f32 1.5, %v3460_v47  ;;  %v1002_v33 = vpop.xlane.xlu2 %1001 }
0x1125   :  { %4113 = vrcp.f32 %v1002_v33 }
0x1126   :  { %4115 = vpow2.f32 %v2574_v37  ;;  %v3462_v42 = vmul.f32 %v4108_v3, %v3461_v61 }
0x1128   :  { %v3466_v45 = vsel %vm3465_vm14, %v4108_v3, %v3462_v42 }
0x1129   :  { %v3470_v34 = vmul.f32 %v3466_v45, %v5937_v23 }
0x112a   :  { %2709 = vadd.xlane.f32.xlu1 %v2708_v29  ;;  %v2649_v32 = vpop.permute.xlu1 %2648 }
0x112b   :  { %v4114_v43 = vpop.eup %4113  ;;  %v6167_v22 = vmul.f32 %v4112_v50, %v2649_v32  ;;  %v3477_v12 = vmul.f32 %v6022_v35, %v3470_v34 }
0x112c   :  { %v4116_v16 = vpop.eup %4115  ;;  %v1064_v44 = vmul.f32 %v4114_v43, %v5950_v53  ;;  %v1011_v40 = vpop.xlane.xlu2 %1010 }
0x112d   :  { %v6171_v20 = vmul.f32 %v4116_v16, %v2654_v11  ;;  %4117 = vrcp.f32 %v1011_v40  ;;  %v2714_v23 = vsel %vm551_vm4, %v6167_v22, 0.0  ;;  %v3484_v58 = vadd.f32 %v6030_v19, %v3477_v12 }
0x112e   :  { %1080 = vst.msk [vmem:[%s6390_s26] sm:$0xff] %vm551_vm4, %v1064_v44  ;;  %2715 = vadd.xlane.f32.xlu2 %v2714_v23 }
0x112f   :  { %3711 = vmatmul.msk.f32.gmra.mxu0 %vm148_vm2, %v3484_v58  ;;  %v2717_v53 = vsel %vm551_vm4, %v6171_v20, 0.0  ;;  %vm3534_vm2 = vcmask 31744  }
0x1132   :  { %2718 = vadd.xlane.f32.xlu1 %v2717_v53 }
0x1133   :  { %v4118_v35 = vpop.eup %4117 }
0x1134   :  { %v1067_v28 = vmul.f32 %v4118_v35, %v5958_v1  ;;  %v1020_v24 = vpop.xlane.xlu2 %1019 }
0x1135   :  { %4119 = vrcp.f32 %v1020_v24 }
0x1136   :  { %1083 = vst.msk [vmem:[%s6390_s26 + $0x18] sm:$0xff] %vm551_vm4, %v1067_v28 }
0x113b   :  { %v4120_v19 = vpop.eup %4119 }
0x113c   :  { %v1070_v59 = vmul.f32 %v4120_v19, %v5972_v36  ;;  %v1029_v26 = vpop.xlane.xlu2 %1028 }
0x113d   :  { %4121 = vrcp.f32 %v1029_v26 }
0x113e   :  { %1086 = vst.msk [vmem:[%s6390_s26 + $0x30] sm:$0xff] %vm551_vm4, %v1070_v59 }
0x1143   :  { %v4122_v3 = vpop.eup %4121  ;;  %v1008_v7 = vpop.xlane.xlu0 %1007 }
0x1144   :  { %v1073_v1 = vmul.f32 %v4122_v3, %v5989_v0  ;;  %4123 = vrcp.f32 %v1008_v7  ;;  %v1038_v63 = vpop.xlane.xlu2 %1037 }
0x1145   :  { %4125 = vrcp.f32 %v1038_v63 }
0x1146   :  { %1089 = vst.msk [vmem:[%s6390_s26 + $0x48] sm:$0xff] %vm551_vm4, %v1073_v1 }
0x114a   :  { %v4124_v36 = vpop.eup %4123 }
0x114b   :  { %v4126_v5 = vpop.eup %4125  ;;  %v1066_v14 = vmul.f32 %v4124_v36, %v5999_v49  ;;  %v1017_v8 = vpop.xlane.xlu0 %1016 }
0x114c   :  { %v1076_v46 = vmul.f32 %v4126_v5, %v6001_v41  ;;  %4127 = vrcp.f32 %v1017_v8  ;;  %v1047_v37 = vpop.xlane.xlu2 %1046 }
0x114d   :  { %1082 = vst.msk [vmem:[%s6390_s26 + $0x10] sm:$0xff] %vm551_vm4, %v1066_v14  ;;  %4129 = vrcp.f32 %v1047_v37 }
0x114e   :  { %1092 = vst.msk [vmem:[%s6390_s26 + $0x60] sm:$0xff] %vm551_vm4, %v1076_v46 }
0x1152   :  { %v4128_v0 = vpop.eup %4127 }
0x1153   :  { %v4130_v47 = vpop.eup %4129  ;;  %v1069_v49 = vmul.f32 %v4128_v0, %v5840_v56  ;;  %v1026_v57 = vpop.xlane.xlu0 %1025  ;;  %v6221_v56 = vld [vmem:[%s6389_s5] ss:$0 sm:$0xff] }
0x1154   :  { %v1079_v41 = vmul.f32 %v4130_v47, %v6013_v62  ;;  %4131 = vrcp.f32 %v1026_v57  ;;  %v2680_v61 = vpop.xlane.xlu2 %2679 }
0x1155   :  { %1085 = vst.msk [vmem:[%s6390_s26 + $0x28] sm:$0xff] %vm551_vm4, %v1069_v49  ;;  %4133 = vrcp.f32 %v2680_v61  ;;  %v1005_v33 = vpop.xlane.xlu1 %1004 }
0x1156   :  { %1095 = vst.msk [vmem:[%s6390_s26 + $0x78] sm:$0xff] %vm551_vm4, %v1079_v41  ;;  %4135 = vrcp.f32 %v1005_v33 }
0x115a   :  { %v4132_v42 = vpop.eup %4131 }
0x115b   :  { %v4134_v62 = vpop.eup %4133  ;;  %v1072_v45 = vmul.f32 %v4132_v42, %v5844_v9  ;;  %v1035_v34 = vpop.xlane.xlu0 %1034 }
0x115c   :  { %v4136_v29 = vpop.eup %4135  ;;  %v2738_v50 = vmul.f32 %v4134_v62, %v6035_v60  ;;  %4137 = vrcp.f32 %v1035_v34  ;;  %v2689_v11 = vpop.xlane.xlu2 %2688 }
0x115d   :  { %1088 = vst.msk [vmem:[%s6390_s26 + $0x40] sm:$0xff] %vm551_vm4, %v1072_v45  ;;  %v1065_v32 = vmul.f32 %v4136_v29, %v5861_v55  ;;  %4139 = vrcp.f32 %v2689_v11  ;;  %v1014_v43 = vpop.xlane.xlu1 %1013  ;;  %v3522_v12 = vpop.f32.mrf.mxu0 }
0x115e   :  { %3654 = vst.msk [vmem:[%s6390_s26 + $0x90] sm:$0xff] %vm551_vm4, %v2738_v50  ;;  %4141 = vrcp.f32 %v1014_v43  ;;  %v3523_v9 = vadd.f32 %v6221_v56, %v3522_v12 }
0x115f   :  { %1081 = vst.msk [vmem:[%s6390_s26 + $0x8] sm:$0xff] %vm551_vm4, %v1065_v32 }
0x1160   :  { %3535 = vst.msk [vmem:[%s6391_s28] sm:$0xff] %vm3534_vm2, %v3523_v9 }
0x1162   :  { %v4138_v55 = vpop.eup %4137 }
0x1163   :  { %v4140_v60 = vpop.eup %4139  ;;  %v1075_v16 = vmul.f32 %v4138_v55, %v6051_v39  ;;  %v1044_v44 = vpop.xlane.xlu0 %1043 }
0x1164   :  { %v4142_v40 = vpop.eup %4141  ;;  %v2741_v23 = vmul.f32 %v4140_v60, %v6056_v21  ;;  %4143 = vrcp.f32 %v1044_v44  ;;  %v2698_v58 = vpop.xlane.xlu2 %2697 }
0x1165   :  { %1091 = vst.msk [vmem:[%s6390_s26 + $0x58] sm:$0xff] %vm551_vm4, %v1075_v16  ;;  %v1068_v53 = vmul.f32 %v4142_v40, %v5867_v4  ;;  %4145 = vrcp.f32 %v2698_v58  ;;  %v1023_v35 = vpop.xlane.xlu1 %1022 }
0x1166   :  { %3657 = vst.msk [vmem:[%s6390_s26 + $0xa8] sm:$0xff] %vm551_vm4, %v2741_v23  ;;  %4147 = vrcp.f32 %v1023_v35 }
0x1167   :  { %1084 = vst.msk [vmem:[%s6390_s26 + $0x20] sm:$0xff] %vm551_vm4, %v1068_v53 }
0x1169   :  { %v3525_v39 = vpop.f32.mrf.mxu0 }
0x116a   :  { %v4144_v21 = vpop.eup %4143  ;;  %v3526_v28 = vadd.f32 %v6221_v56, %v3525_v39 }
0x116b   :  { %v4146_v24 = vpop.eup %4145  ;;  %v1078_v4 = vmul.f32 %v4144_v21, %v6070_v48  ;;  %v2677_v19 = vpop.xlane.xlu0 %2676 }
0x116c   :  { %v4148_v59 = vpop.eup %4147  ;;  %v2744_v26 = vmul.f32 %v4146_v24, %v6077_v27  ;;  %3536 = vst.msk [vmem:[%s6391_s28 + $0x8] sm:$0xff] %vm3534_vm2, %v3526_v28  ;;  %4149 = vrcp.f32 %v2677_v19  ;;  %v2707_v3 = vpop.xlane.xlu2 %2706 }
0x116d   :  { %1094 = vst.msk [vmem:[%s6390_s26 + $0x70] sm:$0xff] %vm551_vm4, %v1078_v4  ;;  %v1071_v7 = vmul.f32 %v4148_v59, %v5871_v51  ;;  %4151 = vrcp.f32 %v2707_v3  ;;  %v1032_v48 = vpop.xlane.xlu1 %1031 }
0x116e   :  { %3660 = vst.msk [vmem:[%s6390_s26 + $0xc0] sm:$0xff] %vm551_vm4, %v2744_v26  ;;  %4153 = vrcp.f32 %v1032_v48 }
0x116f   :  { %1087 = vst.msk [vmem:[%s6390_s26 + $0x38] sm:$0xff] %vm551_vm4, %v1071_v7 }
0x1172   :  { %v4150_v27 = vpop.eup %4149 }
0x1173   :  { %v4152_v1 = vpop.eup %4151  ;;  %v2737_v63 = vmul.f32 %v4150_v27, %v6088_v18  ;;  %v2686_v36 = vpop.xlane.xlu0 %2685 }
0x1174   :  { %v4154_v5 = vpop.eup %4153  ;;  %v2747_v51 = vmul.f32 %v4152_v1, %v6092_v30  ;;  %4155 = vrcp.f32 %v2686_v36 }
0x1175   :  { %3653 = vst.msk [vmem:[%s6390_s26 + $0x88] sm:$0xff] %vm551_vm4, %v2737_v63  ;;  %v1074_v14 = vmul.f32 %v4154_v5, %v5875_v10  ;;  %v1041_v8 = vpop.xlane.xlu1 %1040 }
0x1176   :  { %3663 = vst.msk [vmem:[%s6390_s26 + $0xd8] sm:$0xff] %vm551_vm4, %v2747_v51  ;;  %4157 = vrcp.f32 %v1041_v8 }
0x1177   :  { %1090 = vst.msk [vmem:[%s6390_s26 + $0x50] sm:$0xff] %vm551_vm4, %v1074_v14 }
0x117a   :  { %v4156_v18 = vpop.eup %4155 }
0x117b   :  { %v2740_v30 = vmul.f32 %v4156_v18, %v6102_v17  ;;  %v2695_v46 = vpop.xlane.xlu0 %2694 }
0x117c   :  { %v4158_v37 = vpop.eup %4157  ;;  %4159 = vrcp.f32 %v2695_v46 }
0x117d   :  { %3656 = vst.msk [vmem:[%s6390_s26 + $0xa0] sm:$0xff] %vm551_vm4, %v2740_v30  ;;  %v1077_v10 = vmul.f32 %v4158_v37, %v6107_v54  ;;  %v2674_v0 = vpop.xlane.xlu1 %2673 }
0x117e   :  { %4161 = vrcp.f32 %v2674_v0 }
0x117f   :  { %1093 = vst.msk [vmem:[%s6390_s26 + $0x68] sm:$0xff] %vm551_vm4, %v1077_v10 }
0x1182   :  { %v4160_v47 = vpop.eup %4159 }
0x1183   :  { %v2743_v17 = vmul.f32 %v4160_v47, %v6116_v6  ;;  %v2704_v49 = vpop.xlane.xlu0 %2703 }
0x1184   :  { %v4162_v57 = vpop.eup %4161  ;;  %4163 = vrcp.f32 %v2704_v49 }
0x1185   :  { %3659 = vst.msk [vmem:[%s6390_s26 + $0xb8] sm:$0xff] %vm551_vm4, %v2743_v17  ;;  %v2736_v54 = vmul.f32 %v4162_v57, %v5920_v25  ;;  %v2683_v41 = vpop.xlane.xlu1 %2682 }
0x1186   :  { %4165 = vrcp.f32 %v2683_v41 }
0x1187   :  { %3652 = vst.msk [vmem:[%s6390_s26 + $0x80] sm:$0xff] %vm551_vm4, %v2736_v54 }
0x118a   :  { %v4164_v61 = vpop.eup %4163 }
0x118b   :  { %v2746_v6 = vmul.f32 %v4164_v61, %v6126_v52  ;;  %v2713_v33 = vpop.xlane.xlu0 %2712 }
0x118c   :  { %v4166_v42 = vpop.eup %4165  ;;  %4167 = vrcp.f32 %v2713_v33 }
0x118d   :  { %3662 = vst.msk [vmem:[%s6390_s26 + $0xd0] sm:$0xff] %vm551_vm4, %v2746_v6  ;;  %v2739_v25 = vmul.f32 %v4166_v42, %v6129_v13  ;;  %v2692_v62 = vpop.xlane.xlu1 %2691 }
0x118e   :  { %4169 = vrcp.f32 %v2692_v62 }
0x118f   :  { %3655 = vst.msk [vmem:[%s6390_s26 + $0x98] sm:$0xff] %vm551_vm4, %v2739_v25 }
0x1192   :  { %v4168_v45 = vpop.eup %4167 }
0x1193   :  { %v2749_v52 = vmul.f32 %v4168_v45, %v6137_v2 }
0x1194   :  { %v4170_v34 = vpop.eup %4169 }
0x1195   :  { %3665 = vst.msk [vmem:[%s6390_s26 + $0xe8] sm:$0xff] %vm551_vm4, %v2749_v52  ;;  %v2742_v29 = vmul.f32 %v4170_v34, %v6142_v15  ;;  %v2701_v50 = vpop.xlane.xlu1 %2700 }
0x1196   :  { %4171 = vrcp.f32 %v2701_v50 }
0x1197   :  { %3658 = vst.msk [vmem:[%s6390_s26 + $0xb0] sm:$0xff] %vm551_vm4, %v2742_v29  ;;  %v3528_v13 = vpop.f32.mrf.mxu0 }
0x1198   :  { %v3529_v11 = vadd.f32 %v6221_v56, %v3528_v13 }
0x119a   :  { %3537 = vst.msk [vmem:[%s6391_s28 + $0x10] sm:$0xff] %vm3534_vm2, %v3529_v11 }
0x119c   :  { %v4172_v2 = vpop.eup %4171 }
0x119d   :  { %v2745_v32 = vmul.f32 %v4172_v2, %v6156_v31  ;;  %v2710_v43 = vpop.xlane.xlu1 %2709 }
0x119e   :  { %4173 = vrcp.f32 %v2710_v43 }
0x119f   :  { %3661 = vst.msk [vmem:[%s6390_s26 + $0xc8] sm:$0xff] %vm551_vm4, %v2745_v32 }
0x11a1   :  { %v2716_v15 = vpop.xlane.xlu2 %2715 }
0x11a2   :  { %4175 = vrcp.f32 %v2716_v15 }
0x11a4   :  { %v4174_v12 = vpop.eup %4173 }
0x11a5   :  { %v2748_v9 = vmul.f32 %v4174_v12, %v6162_v38  ;;  %v2719_v55 = vpop.xlane.xlu1 %2718 }
0x11a6   :  { %4177 = vrcp.f32 %v2719_v55 }
0x11a7   :  { %3664 = vst.msk [vmem:[%s6390_s26 + $0xe0] sm:$0xff] %vm551_vm4, %v2748_v9 }
0x11a8   :  { %v4176_v31 = vpop.eup %4175 }
0x11a9   :  { %v2750_v60 = vmul.f32 %v4176_v31, %v6167_v22 }
0x11ab   :  { %3666 = vst.msk [vmem:[%s6390_s26 + $0xf0] sm:$0xff] %vm551_vm4, %v2750_v60 }
0x11ac   :  { %v4178_v16 = vpop.eup %4177  ;;  %v3531_v44 = vpop.f32.mrf.mxu0 }
0x11ad   :  { %v2751_v40 = vmul.f32 %v4178_v16, %v6171_v20  ;;  %v3532_v38 = vadd.f32 %v6221_v56, %v3531_v44 }
0x11af   :  { %3667 = vst.msk [vmem:[%s6390_s26 + $0xf8] sm:$0xff] %vm551_vm4, %v2751_v40 }
0x11b0   :  { %3538 = vst.msk [vmem:[%s6391_s28 + $0x18] sm:$0xff] %vm3534_vm2, %v3532_v38 }

</bundles_post_ra>
